<compile_context>
chip_gen: v6e
topology: v6e:2x2x1
jax: 0.10.0
libtpu: 0.0.40
codegen_flags: <defaults>
</compile_context>

<pallas_src>
import functools
import math

import jax
import jax.numpy as jnp
from jax.experimental import pallas as pl
from jax.experimental.pallas import tpu as pltpu

BN_EPS = 1e-5
ACT_DTYPE = jnp.bfloat16     # activation / residual dtype between layers
MATMUL_DTYPE = jnp.bfloat16  # MXU operand dtype (accumulation is always f32)


def _round_up(x, m):
    return (x + m - 1) // m * m


def _pad2d(x, rows, cols):
    r, c = x.shape
    if (r, c) == (rows, cols):
        return x
    return jnp.pad(x, ((0, rows - r), (0, cols - c)))


@functools.lru_cache(maxsize=None)
def _vmem_budget_bytes():
    # Generation-aware VMEM cap: ~60% of physical VMEM (v7x 64 MiB -> ~38 MiB,
    # v5e/v6e 128 MiB -> ~77 MiB).  Conservative fallback if the query fails.
    try:
        cap = int(pltpu.get_tpu_info().vmem_capacity_bytes)
    except Exception:
        cap = 64 << 20
    return max(16 << 20, min(int(cap * 0.6), 96 << 20))


# ==========================================================================
# Pallas kernel 1: fused  relu( (A @ W) [+ residual] )   (GEMM path)
#   A: (M, K) activation / im2col matrix (bf16), W: (K, C) BN-folded weights.
#   Grid = (M tiles, C tiles, K tiles); f32 VMEM scratch is the accumulator,
#   the bf16 output block is written once at the last K step.
# ==========================================================================
def _gemm_tiles(M, K, C):
    # M tile: whole M when small, else 256-row tiles.
    if M <= 512:
        tm, Mp = M, M
    else:
        tm, Mp = 256, _round_up(M, 256)
    # Cout tile: full dim when < 128 (full-dim blocks are exempt from the
    # 128-lane rule), else a 128-multiple chunk up to 1024.
    if C < 128:
        tn, Cp = C, C
    else:
        Cp = _round_up(C, 128)
        if Cp <= 1024:
            tn = Cp
        elif Cp % 1024 == 0:
            tn = 1024
        elif Cp % 512 == 0:
            tn = 512
        elif Cp % 256 == 0:
            tn = 256
        else:
            tn = 128
    # K (reduction) tile: single step whenever it fits, else the largest
    # 128-multiple divisor <= 2048.  Explicit zero-pad keeps the reduction exact.
    Kp = _round_up(K, 128)
    if Kp <= 2048:
        tk = Kp
    else:
        tk = 128
        for cand in (2048, 1792, 1536, 1280, 1152, 1024, 896, 768, 640, 512,
                     384, 256, 128):
            if Kp % cand == 0:
                tk = cand
                break
    # v7x megacore: keep >=2 tiles along a "parallel" axis so both TCs get work
    # (no-op cost on single-TC v5e/v6e beyond one extra tiny grid step).
    if (Mp // tm) * (Cp // tn) == 1:
        if tn >= 256 and tn % 256 == 0:
            tn //= 2
        elif tm >= 16 and tm % 16 == 0 and Mp % (tm // 2) == 0:
            tm //= 2
    return tm, Mp, tn, Cp, tk, Kp


def fused_matmul_bn_act(a, w, residual=None, relu=True):
    M, K = a.shape
    Kw, C = w.shape
    assert K == Kw
    has_res = residual is not None

    tm, Mp, tn, Cp, tk, Kp = _gemm_tiles(M, K, C)

    a_p = _pad2d(a.astype(MATMUL_DTYPE), Mp, Kp)
    w_p = _pad2d(w.astype(MATMUL_DTYPE), Kp, Cp)

    inputs = [a_p, w_p]
    # TODO(synk): A (i,k) block is re-fetched per j tile; reorder grid to
    # (j,i,k) if A ever becomes large at UperNet-scale resolutions.
    in_specs = [
        pl.BlockSpec((tm, tk), lambda i, j, k: (i, k)),   # A tile
        pl.BlockSpec((tk, tn), lambda i, j, k: (k, j)),   # W tile
    ]
    if has_res:
        inputs.append(_pad2d(residual.astype(ACT_DTYPE), Mp, Cp))
        in_specs.append(pl.BlockSpec((tm, tn), lambda i, j, k: (i, j)))

    def kernel(*refs):
        if has_res:
            a_ref, w_ref, r_ref, o_ref, acc_ref = refs
        else:
            a_ref, w_ref, o_ref, acc_ref = refs
        k = pl.program_id(2)
        prod = jnp.dot(a_ref[...], w_ref[...],
                       preferred_element_type=jnp.float32)

        @pl.when(k == 0)
        def _():
            acc_ref[...] = prod          # first K step: plain store, no zero-init pass

        @pl.when(k > 0)
        def _():
            acc_ref[...] += prod

        @pl.when(k == pl.num_programs(2) - 1)
        def _():
            y = acc_ref[...]
            if has_res:
                y = y + r_ref[...].astype(jnp.float32)
            if relu:
                y = jnp.maximum(y, 0.0)
            o_ref[...] = y.astype(o_ref.dtype)

    c_in = jnp.dtype(MATMUL_DTYPE).itemsize
    c_act = jnp.dtype(ACT_DTYPE).itemsize
    tile_bytes = (2 * (tm * tk + tk * tn) * c_in      # double-buffered A, W
                  + tm * tn * 4                       # f32 accumulator scratch
                  + 2 * tm * tn * c_act)              # double-buffered output
    if has_res:
        tile_bytes += 2 * tm * tn * c_act
    vmem_limit = int(min(max(2 * tile_bytes, 16 << 20), _vmem_budget_bytes()))

    out = pl.pallas_call(
        kernel,
        out_shape=jax.ShapeDtypeStruct((Mp, Cp), ACT_DTYPE),
        grid_spec=pltpu.PrefetchScalarGridSpec(
            num_scalar_prefetch=0,
            grid=(Mp // tm, Cp // tn, Kp // tk),
            in_specs=in_specs,
            out_specs=pl.BlockSpec((tm, tn), lambda i, j, k: (i, j)),
            scratch_shapes=[pltpu.VMEM((tm, tn), jnp.float32)],
        ),
        compiler_params=pltpu.CompilerParams(
            dimension_semantics=("parallel", "parallel", "arbitrary"),
            vmem_limit_bytes=vmem_limit,
        ),
    )(*inputs)
    if (Mp, Cp) != (M, C):
        out = out[:M, :C]
    return out


# ==========================================================================
# Pallas kernel 2: stride-1 kxk conv without HBM im2col (direct path).
#   The padded NHWC image, flattened over (H, W), is DMAed to VMEM once per
#   (image, Cout tile); the kh*kw shifted windows are contiguous static VMEM
#   slices in padded-row space, so the conv is kh*kw shifted 1x1 GEMMs
#   accumulated in an f32 scratch.  Output is produced in padded-row space
#   (width Wp) and the kw-1 garbage columns are dropped afterwards.
# ==========================================================================
def _direct_conv_plan(x_shape, w_shape, pad):
    N, H, W_, Cin = x_shape
    Cout, _, kh, kw = w_shape
    Hp, Wp = H + 2 * pad, W_ + 2 * pad
    Ho, Wo = Hp - kh + 1, Wp - kw + 1
    Mq = Ho * Wp                       # output rows in padded-row space
    L = Hp * Wp + (kw - 1)             # flattened input + read margin
    if Cout < 128:
        tn = Cout
    elif Cout % 128 != 0:
        return None
    elif Cout <= 512:
        tn = Cout
    elif Cout % 512 == 0:
        tn = 512
    elif Cout % 256 == 0:
        tn = 256
    else:
        tn = 128
    if N == 1 and Cout // tn == 1 and tn >= 256 and tn % 256 == 0:
        tn //= 2                       # keep >=2 parallel tiles for v7x megacore
    c = jnp.dtype(ACT_DTYPE).itemsize
    vmem_bytes = (2 * L * Cin * c                 # double-buffered activation
                  + 2 * kh * kw * Cin * tn * c    # double-buffered weights
                  + Mq * tn * 4                   # f32 accumulator
                  + 2 * Mq * tn * c)              # double-buffered output
    if vmem_bytes > _vmem_budget_bytes() // 2:
        return None                    # too large for VMEM -> im2col fallback
    return dict(Hp=Hp, Wp=Wp, Ho=Ho, Wo=Wo, Mq=Mq, L=L, tn=tn,
                vmem_bytes=vmem_bytes)


def conv_kxk_s1_direct(x, w, pad, relu, bn_scale, plan):
    N, H, W_, Cin = x.shape
    Cout, _, kh, kw = w.shape
    Hp, Wp, Ho, Wo = plan["Hp"], plan["Wp"], plan["Ho"], plan["Wo"]
    Mq, L, tn = plan["Mq"], plan["L"], plan["tn"]
    n_q = kh * kw

    xp = jnp.pad(x.astype(ACT_DTYPE), ((0, 0), (pad, pad), (pad, pad), (0, 0)))
    xflat = jnp.pad(xp.reshape(N, Hp * Wp, Cin),
                    ((0, 0), (0, L - Hp * Wp), (0, 0)))
    # Weights as (kh*kw, Cin, Cout), BN scale folded, bf16 MXU operands.
    wk = (w.transpose(2, 3, 1, 0).reshape(n_q, Cin, Cout)
          * bn_scale).astype(MATMUL_DTYPE)

    def kernel(x_ref, w_ref, o_ref, acc_ref):
        for q in range(n_q):                       # static unrolled window loop
            di, dj = q // kw, q % kw
            start = di * Wp + dj                   # static shift in padded-row space
            prod = jnp.dot(x_ref[0, start:start + Mq, :], w_ref[q],
                           preferred_element_type=jnp.float32)
            if q == 0:
                acc_ref[...] = prod
            else:
                acc_ref[...] += prod
        y = acc_ref[...]
        if relu:
            y = jnp.maximum(y, 0.0)
        o_ref[0] = y.astype(o_ref.dtype)

    vmem_limit = int(min(max(4 * plan["vmem_bytes"], 16 << 20),
                         _vmem_budget_bytes()))

    out = pl.pallas_call(
        kernel,
        out_shape=jax.ShapeDtypeStruct((N, Mq, Cout), ACT_DTYPE),
        grid_spec=pltpu.PrefetchScalarGridSpec(
            num_scalar_prefetch=0,
            grid=(N, Cout // tn),
            in_specs=[
                pl.BlockSpec((1, L, Cin), lambda b, j: (b, 0, 0)),
                pl.BlockSpec((n_q, Cin, tn), lambda b, j: (0, 0, j)),
            ],
            out_specs=pl.BlockSpec((1, Mq, tn), lambda b, j: (b, 0, j)),
            scratch_shapes=[pltpu.VMEM((Mq, tn), jnp.float32)],
        ),
        compiler_params=pltpu.CompilerParams(
            dimension_semantics=("parallel", "parallel"),
            vmem_limit_bytes=vmem_limit,
        ),
    )(xflat, wk)
    # Drop the kw-1 garbage columns produced by computing in padded-row space.
    return out.reshape(N, Ho, Wp, Cout)[:, :, :Wo, :]


# ==========================================================================
# Glue (NHWC bf16 everywhere): im2col for strided convs, conv wrapper, maxpool.
# ==========================================================================
def _im2col_nhwc(x, kh, kw, stride, pad):
    # x: (N,H,W,C) bf16 -> (N*Ho*Wo, kh*kw*C) bf16, K ordered (kh, kw, cin).
    N, H, W_, C = x.shape
    xp = jnp.pad(x, ((0, 0), (pad, pad), (pad, pad), (0, 0)))
    Hp, Wp = H + 2 * pad, W_ + 2 * pad
    Ho = (Hp - kh) // stride + 1
    Wo = (Wp - kw) // stride + 1
    cols = []
    for i in range(kh):
        for j in range(kw):
            cols.append(xp[:, i:i + stride * Ho:stride,
                           j:j + stride * Wo:stride, :])
    p = jnp.concatenate(cols, axis=-1)            # (N, Ho, Wo, kh*kw*C)
    return p.reshape(N * Ho * Wo, kh * kw * C), Ho, Wo


def conv_bn_act(x, w, stride, pad, relu, residual=None):
    # x: NHWC bf16 activation.  w: PyTorch layout (Cout, Cin, kh, kw), bias=False.
    # BatchNorm2d (inference, constant-initialized params) folds to a scalar
    # scale on the weights (see TODO at top for trained checkpoints).
    Cout, Cin, kh, kw = w.shape
    bn_scale = 1.0 / math.sqrt(1.0 + BN_EPS)
    N = x.shape[0]

    if kh == 1 and kw == 1:
        xs = x[:, ::stride, ::stride, :] if stride > 1 else x
        _, Ho, Wo, _ = xs.shape
        a = xs.reshape(N * Ho * Wo, Cin)
        wmat = w.reshape(Cout, Cin).T * bn_scale
        res = residual.reshape(N * Ho * Wo, Cout) if residual is not None else None
        y = fused_matmul_bn_act(a, wmat, residual=res, relu=relu)
        return y.reshape(N, Ho, Wo, Cout)

    if stride == 1 and residual is None:
        plan = _direct_conv_plan(x.shape, w.shape, pad)
        if plan is not None:
            return conv_kxk_s1_direct(x, w, pad, relu, bn_scale, plan)

    # Strided kxk convs (7x7/s2 stem, stage-entry 3x3/s2): bf16 im2col + GEMM.
    a, Ho, Wo = _im2col_nhwc(x, kh, kw, stride, pad)
    wmat = w.transpose(2, 3, 1, 0).reshape(kh * kw * Cin, Cout) * bn_scale
    res = residual.reshape(N * Ho * Wo, Cout) if residual is not None else None
    y = fused_matmul_bn_act(a, wmat, residual=res, relu=relu)
    return y.reshape(N, Ho, Wo, Cout)


def maxpool_3x3_s2(x):
    # TODO(synk): maxpool stays as XLA strided-slice max glue (cheap, not hot path).
    N, H, W_, C = x.shape
    pad_val = float(jnp.finfo(x.dtype).min)
    xp = jnp.pad(x, ((0, 0), (1, 1), (1, 1), (0, 0)), constant_values=pad_val)
    Ho = (H + 2 - 3) // 2 + 1
    Wo = (W_ + 2 - 3) // 2 + 1
    out = None
    for i in range(3):
        for j in range(3):
            v = xp[:, i:i + 2 * Ho:2, j:j + 2 * Wo:2, :]
            out = v if out is None else jnp.maximum(out, v)
    return out


# ==========================================================================
# Parameter init (deterministic, mimics kaiming_normal_ fan_out for convs).
# ==========================================================================
def _conv_w(key, cout, cin, kh, kw):
    fan_out = cout * kh * kw
    std = math.sqrt(2.0 / fan_out)
    return jax.random.normal(key, (cout, cin, kh, kw), jnp.float32) * std


def init_resnet_params(key, layers, inch):
    keys = iter(jax.random.split(key, 256))
    params = {"conv1": _conv_w(next(keys), 64, inch, 7, 7), "layers": []}
    cfg = []
    inplanes = 64
    expansion = 4
    plan = [(64, 1), (128, 2), (256, 2), (512, 2)]
    for li, (planes, layer_stride) in enumerate(plan):
        blk_params, blk_cfg = [], []
        for b in range(layers[li]):
            stride = layer_stride if b == 0 else 1
            width = planes
            bp = {
                "conv1": _conv_w(next(keys), width, inplanes, 1, 1),
                "conv2": _conv_w(next(keys), width, width, 3, 3),
                "conv3": _conv_w(next(keys), planes * expansion, width, 1, 1),
            }
            has_ds = (stride != 1) or (inplanes != planes * expansion)
            if has_ds:
                bp["downsample"] = _conv_w(next(keys), planes * expansion,
                                           inplanes, 1, 1)
            blk_params.append(bp)
            blk_cfg.append({"stride": stride, "downsample": has_ds})
            inplanes = planes * expansion
        params["layers"].append(blk_params)
        cfg.append(blk_cfg)
    return params, cfg


# ==========================================================================
# Forward pass (Bottleneck ResNet; returns the 4 stage feature maps, NCHW f32).
# ==========================================================================
def bottleneck_forward(x, bp, stride, has_ds):
    out = conv_bn_act(x, bp["conv1"], stride=1, pad=0, relu=True)
    out = conv_bn_act(out, bp["conv2"], stride=stride, pad=1, relu=True)
    if has_ds:
        identity = conv_bn_act(x, bp["downsample"], stride=stride, pad=0,
                               relu=False)
    else:
        identity = x
    # conv3 + bn3 + residual add + relu fused in one Pallas call
    out = conv_bn_act(out, bp["conv3"], stride=1, pad=0, relu=True,
                      residual=identity)
    return out


def resnet_forward(params, x, cfg):
    # External API is NCHW f32 (PyTorch); convert to NHWC bf16 once here.
    x = jnp.transpose(x, (0, 2, 3, 1)).astype(ACT_DTYPE)
    x = conv_bn_act(x, params["conv1"], stride=2, pad=3, relu=True)
    x = maxpool_3x3_s2(x)
    outs = []
    for li in range(4):
        for bp, bc in zip(params["layers"][li], cfg[li]):
            x = bottleneck_forward(x, bp, bc["stride"], bc["downsample"])
        outs.append(jnp.transpose(x, (0, 3, 1, 2)).astype(jnp.float32))
    return outs


# ==========================================================================
if __name__ == "__main__":
    key = jax.random.PRNGKey(0)
    k_param, k_x = jax.random.split(key)

    # --- quick numeric sanity checks of both Pallas kernels ---------------
    bn_scale = 1.0 / math.sqrt(1.0 + BN_EPS)

    xs = jax.random.normal(jax.random.PRNGKey(1), (2, 16, 16, 64),
                           jnp.float32).astype(ACT_DTYPE)
    ws = _conv_w(jax.random.PRNGKey(2), 64, 64, 3, 3)
    got = conv_bn_act(xs, ws, stride=1, pad=1, relu=True)   # direct-conv path
    wf = (ws.transpose(2, 3, 1, 0) * bn_scale).astype(ACT_DTYPE).astype(jnp.float32)
    ref = jax.lax.conv_general_dilated(
        xs.astype(jnp.float32), wf, window_strides=(1, 1),
        padding=((1, 1), (1, 1)),
        dimension_numbers=("NHWC", "HWIO", "NHWC"))
    ref = jnp.maximum(ref, 0.0)
    assert jnp.allclose(got.astype(jnp.float32), ref, atol=2e-2, rtol=2e-2), \
        float(jnp.max(jnp.abs(got.astype(jnp.float32) - ref)))

    am = jax.random.normal(jax.random.PRNGKey(3), (128, 192),
                           jnp.float32).astype(ACT_DTYPE)
    wm = jax.random.normal(jax.random.PRNGKey(4), (192, 256),
                           jnp.float32).astype(ACT_DTYPE)
    rm = jax.random.normal(jax.random.PRNGKey(5), (128, 256),
                           jnp.float32).astype(ACT_DTYPE)
    got2 = fused_matmul_bn_act(am, wm, residual=rm, relu=True)
    ref2 = jnp.maximum(am.astype(jnp.float32) @ wm.astype(jnp.float32)
                       + rm.astype(jnp.float32), 0.0)
    assert jnp.allclose(got2.astype(jnp.float32), ref2, atol=2e-2, rtol=2e-2)

    # --- full backbone forward --------------------------------------------
    LAYERS = (2, 1, 1, 1)   # small Bottleneck ResNet (same block structure as resnet50)
    INCH = 6
    params, cfg = init_resnet_params(k_param, LAYERS, INCH)

    x = jax.random.normal(k_x, (2, INCH, 64, 64), jnp.float32)

    fwd = jax.jit(functools.partial(resnet_forward, cfg=cfg))
    outs = fwd(params, x)
    outs = jax.block_until_ready(outs)

    expected = [(2, 256, 16, 16), (2, 512, 8, 8), (2, 1024, 4, 4), (2, 2048, 2, 2)]
    assert [tuple(o.shape) for o in outs] == expected, \
        [tuple(o.shape) for o in outs]
    assert all(bool(jnp.all(jnp.isfinite(o))) for o in outs)
    # note: self.avgpool / self.fc exist in __init__ but are unused in forward()
    print("KERNEL_OK")
</pallas_src>

<mosaic_0001>
module attributes {stable_mosaic.version = 11 : i64} {
  func.func @kernel(%arg0: i32, %arg1: i32, %arg2: memref<1x326x64xbf16, #tpu.memory_space<vmem>>, %arg3: memref<9x64x64xbf16, #tpu.memory_space<vmem>>, %arg4: memref<1x288x64xbf16, #tpu.memory_space<vmem>>, %arg5: memref<288x64xf32, #tpu.memory_space<vmem>>) attributes {dimension_semantics = [#tpu.dimension_semantics<parallel>, #tpu.dimension_semantics<parallel>], iteration_bounds = array<i64: 2, 1>, scalar_prefetch = 0 : i64, scratch_operands = 1 : i64, tpu.core_type = #tpu.core_type<tc>, window_params = [{transform_indices = @transform_0, window_bounds = array<i64: 1, 326, 64>}, {transform_indices = @transform_1, window_bounds = array<i64: 9, 64, 64>}, {transform_indices = @transform_2, window_bounds = array<i64: 1, 288, 64>}]} {
    %c0 = arith.constant 0 : index
    %c0_0 = arith.constant 0 : index
    %c0_1 = arith.constant 0 : index
    %0 = vector.load %arg2[%c0, %c0_0, %c0_1] : memref<1x326x64xbf16, #tpu.memory_space<vmem>>, vector<1x288x64xbf16>
    %1 = vector.shape_cast %0 : vector<1x288x64xbf16> to vector<288x64xbf16>
    %c0_2 = arith.constant 0 : index
    %c0_3 = arith.constant 0 : index
    %c0_4 = arith.constant 0 : index
    %2 = vector.load %arg3[%c0_2, %c0_3, %c0_4] : memref<9x64x64xbf16, #tpu.memory_space<vmem>>, vector<1x64x64xbf16>
    %3 = vector.shape_cast %2 : vector<1x64x64xbf16> to vector<64x64xbf16>
    %cst = arith.constant dense<0.000000e+00> : vector<288x64xf32>
    %4 = tpu.matmul %1, %3, %cst {dimension_numbers = #tpu.dot_dimension_numbers<[1], [0], [0], [1], [0, 0, 1, 1], [], []>} : vector<288x64xbf16>, vector<64x64xbf16>, vector<288x64xf32> -> vector<288x64xf32>
    %c0_5 = arith.constant 0 : index
    %c0_6 = arith.constant 0 : index
    %5 = vector.load %arg5[%c0_5, %c0_6] : memref<288x64xf32, #tpu.memory_space<vmem>>, vector<288x64xf32>
    tpu.vector_store %arg5[%c0_5, %c0_6], %4 {strides = array<i32>} : memref<288x64xf32, #tpu.memory_space<vmem>>, vector<288x64xf32>,
    %c0_7 = arith.constant 0 : index
    %c1 = arith.constant 1 : index
    %c0_8 = arith.constant 0 : index
    %6 = vector.load %arg2[%c0_7, %c1, %c0_8] : memref<1x326x64xbf16, #tpu.memory_space<vmem>>, vector<1x288x64xbf16>
    %7 = vector.shape_cast %6 : vector<1x288x64xbf16> to vector<288x64xbf16>
    %c1_9 = arith.constant 1 : index
    %c0_10 = arith.constant 0 : index
    %c0_11 = arith.constant 0 : index
    %8 = vector.load %arg3[%c1_9, %c0_10, %c0_11] : memref<9x64x64xbf16, #tpu.memory_space<vmem>>, vector<1x64x64xbf16>
    %9 = vector.shape_cast %8 : vector<1x64x64xbf16> to vector<64x64xbf16>
    %cst_12 = arith.constant dense<0.000000e+00> : vector<288x64xf32>
    %10 = tpu.matmul %7, %9, %cst_12 {dimension_numbers = #tpu.dot_dimension_numbers<[1], [0], [0], [1], [0, 0, 1, 1], [], []>} : vector<288x64xbf16>, vector<64x64xbf16>, vector<288x64xf32> -> vector<288x64xf32>
    %c0_13 = arith.constant 0 : index
    %c0_14 = arith.constant 0 : index
    %11 = vector.load %arg5[%c0_13, %c0_14] : memref<288x64xf32, #tpu.memory_space<vmem>>, vector<288x64xf32>
    %12 = arith.addf %11, %10 : vector<288x64xf32>
    %c0_15 = arith.constant 0 : index
    %c0_16 = arith.constant 0 : index
    %13 = vector.load %arg5[%c0_15, %c0_16] : memref<288x64xf32, #tpu.memory_space<vmem>>, vector<288x64xf32>
    tpu.vector_store %arg5[%c0_15, %c0_16], %12 {strides = array<i32>} : memref<288x64xf32, #tpu.memory_space<vmem>>, vector<288x64xf32>,
    %c0_17 = arith.constant 0 : index
    %c2 = arith.constant 2 : index
    %c0_18 = arith.constant 0 : index
    %14 = vector.load %arg2[%c0_17, %c2, %c0_18] : memref<1x326x64xbf16, #tpu.memory_space<vmem>>, vector<1x288x64xbf16>
    %15 = vector.shape_cast %14 : vector<1x288x64xbf16> to vector<288x64xbf16>
    %c2_19 = arith.constant 2 : index
    %c0_20 = arith.constant 0 : index
    %c0_21 = arith.constant 0 : index
    %16 = vector.load %arg3[%c2_19, %c0_20, %c0_21] : memref<9x64x64xbf16, #tpu.memory_space<vmem>>, vector<1x64x64xbf16>
    %17 = vector.shape_cast %16 : vector<1x64x64xbf16> to vector<64x64xbf16>
    %cst_22 = arith.constant dense<0.000000e+00> : vector<288x64xf32>
    %18 = tpu.matmul %15, %17, %cst_22 {dimension_numbers = #tpu.dot_dimension_numbers<[1], [0], [0], [1], [0, 0, 1, 1], [], []>} : vector<288x64xbf16>, vector<64x64xbf16>, vector<288x64xf32> -> vector<288x64xf32>
    %c0_23 = arith.constant 0 : index
    %c0_24 = arith.constant 0 : index
    %19 = vector.load %arg5[%c0_23, %c0_24] : memref<288x64xf32, #tpu.memory_space<vmem>>, vector<288x64xf32>
    %20 = arith.addf %19, %18 : vector<288x64xf32>
    %c0_25 = arith.constant 0 : index
    %c0_26 = arith.constant 0 : index
    %21 = vector.load %arg5[%c0_25, %c0_26] : memref<288x64xf32, #tpu.memory_space<vmem>>, vector<288x64xf32>
    tpu.vector_store %arg5[%c0_25, %c0_26], %20 {strides = array<i32>} : memref<288x64xf32, #tpu.memory_space<vmem>>, vector<288x64xf32>,
    %c0_27 = arith.constant 0 : index
    %c18 = arith.constant 18 : index
    %c0_28 = arith.constant 0 : index
    %22 = vector.load %arg2[%c0_27, %c18, %c0_28] : memref<1x326x64xbf16, #tpu.memory_space<vmem>>, vector<1x288x64xbf16>
    %23 = vector.shape_cast %22 : vector<1x288x64xbf16> to vector<288x64xbf16>
    %c3 = arith.constant 3 : index
    %c0_29 = arith.constant 0 : index
    %c0_30 = arith.constant 0 : index
    %24 = vector.load %arg3[%c3, %c0_29, %c0_30] : memref<9x64x64xbf16, #tpu.memory_space<vmem>>, vector<1x64x64xbf16>
    %25 = vector.shape_cast %24 : vector<1x64x64xbf16> to vector<64x64xbf16>
    %cst_31 = arith.constant dense<0.000000e+00> : vector<288x64xf32>
    %26 = tpu.matmul %23, %25, %cst_31 {dimension_numbers = #tpu.dot_dimension_numbers<[1], [0], [0], [1], [0, 0, 1, 1], [], []>} : vector<288x64xbf16>, vector<64x64xbf16>, vector<288x64xf32> -> vector<288x64xf32>
    %c0_32 = arith.constant 0 : index
    %c0_33 = arith.constant 0 : index
    %27 = vector.load %arg5[%c0_32, %c0_33] : memref<288x64xf32, #tpu.memory_space<vmem>>, vector<288x64xf32>
    %28 = arith.addf %27, %26 : vector<288x64xf32>
    %c0_34 = arith.constant 0 : index
    %c0_35 = arith.constant 0 : index
    %29 = vector.load %arg5[%c0_34, %c0_35] : memref<288x64xf32, #tpu.memory_space<vmem>>, vector<288x64xf32>
    tpu.vector_store %arg5[%c0_34, %c0_35], %28 {strides = array<i32>} : memref<288x64xf32, #tpu.memory_space<vmem>>, vector<288x64xf32>,
    %c0_36 = arith.constant 0 : index
    %c19 = arith.constant 19 : index
    %c0_37 = arith.constant 0 : index
    %30 = vector.load %arg2[%c0_36, %c19, %c0_37] : memref<1x326x64xbf16, #tpu.memory_space<vmem>>, vector<1x288x64xbf16>
    %31 = vector.shape_cast %30 : vector<1x288x64xbf16> to vector<288x64xbf16>
    %c4 = arith.constant 4 : index
    %c0_38 = arith.constant 0 : index
    %c0_39 = arith.constant 0 : index
    %32 = vector.load %arg3[%c4, %c0_38, %c0_39] : memref<9x64x64xbf16, #tpu.memory_space<vmem>>, vector<1x64x64xbf16>
    %33 = vector.shape_cast %32 : vector<1x64x64xbf16> to vector<64x64xbf16>
    %cst_40 = arith.constant dense<0.000000e+00> : vector<288x64xf32>
    %34 = tpu.matmul %31, %33, %cst_40 {dimension_numbers = #tpu.dot_dimension_numbers<[1], [0], [0], [1], [0, 0, 1, 1], [], []>} : vector<288x64xbf16>, vector<64x64xbf16>, vector<288x64xf32> -> vector<288x64xf32>
    %c0_41 = arith.constant 0 : index
    %c0_42 = arith.constant 0 : index
    %35 = vector.load %arg5[%c0_41, %c0_42] : memref<288x64xf32, #tpu.memory_space<vmem>>, vector<288x64xf32>
    %36 = arith.addf %35, %34 : vector<288x64xf32>
    %c0_43 = arith.constant 0 : index
    %c0_44 = arith.constant 0 : index
    %37 = vector.load %arg5[%c0_43, %c0_44] : memref<288x64xf32, #tpu.memory_space<vmem>>, vector<288x64xf32>
    tpu.vector_store %arg5[%c0_43, %c0_44], %36 {strides = array<i32>} : memref<288x64xf32, #tpu.memory_space<vmem>>, vector<288x64xf32>,
    %c0_45 = arith.constant 0 : index
    %c20 = arith.constant 20 : index
    %c0_46 = arith.constant 0 : index
    %38 = vector.load %arg2[%c0_45, %c20, %c0_46] : memref<1x326x64xbf16, #tpu.memory_space<vmem>>, vector<1x288x64xbf16>
    %39 = vector.shape_cast %38 : vector<1x288x64xbf16> to vector<288x64xbf16>
    %c5 = arith.constant 5 : index
    %c0_47 = arith.constant 0 : index
    %c0_48 = arith.constant 0 : index
    %40 = vector.load %arg3[%c5, %c0_47, %c0_48] : memref<9x64x64xbf16, #tpu.memory_space<vmem>>, vector<1x64x64xbf16>
    %41 = vector.shape_cast %40 : vector<1x64x64xbf16> to vector<64x64xbf16>
    %cst_49 = arith.constant dense<0.000000e+00> : vector<288x64xf32>
    %42 = tpu.matmul %39, %41, %cst_49 {dimension_numbers = #tpu.dot_dimension_numbers<[1], [0], [0], [1], [0, 0, 1, 1], [], []>} : vector<288x64xbf16>, vector<64x64xbf16>, vector<288x64xf32> -> vector<288x64xf32>
    %c0_50 = arith.constant 0 : index
    %c0_51 = arith.constant 0 : index
    %43 = vector.load %arg5[%c0_50, %c0_51] : memref<288x64xf32, #tpu.memory_space<vmem>>, vector<288x64xf32>
    %44 = arith.addf %43, %42 : vector<288x64xf32>
    %c0_52 = arith.constant 0 : index
    %c0_53 = arith.constant 0 : index
    %45 = vector.load %arg5[%c0_52, %c0_53] : memref<288x64xf32, #tpu.memory_space<vmem>>, vector<288x64xf32>
    tpu.vector_store %arg5[%c0_52, %c0_53], %44 {strides = array<i32>} : memref<288x64xf32, #tpu.memory_space<vmem>>, vector<288x64xf32>,
    %c0_54 = arith.constant 0 : index
    %c36 = arith.constant 36 : index
    %c0_55 = arith.constant 0 : index
    %46 = vector.load %arg2[%c0_54, %c36, %c0_55] : memref<1x326x64xbf16, #tpu.memory_space<vmem>>, vector<1x288x64xbf16>
    %47 = vector.shape_cast %46 : vector<1x288x64xbf16> to vector<288x64xbf16>
    %c6 = arith.constant 6 : index
    %c0_56 = arith.constant 0 : index
    %c0_57 = arith.constant 0 : index
    %48 = vector.load %arg3[%c6, %c0_56, %c0_57] : memref<9x64x64xbf16, #tpu.memory_space<vmem>>, vector<1x64x64xbf16>
    %49 = vector.shape_cast %48 : vector<1x64x64xbf16> to vector<64x64xbf16>
    %cst_58 = arith.constant dense<0.000000e+00> : vector<288x64xf32>
    %50 = tpu.matmul %47, %49, %cst_58 {dimension_numbers = #tpu.dot_dimension_numbers<[1], [0], [0], [1], [0, 0, 1, 1], [], []>} : vector<288x64xbf16>, vector<64x64xbf16>, vector<288x64xf32> -> vector<288x64xf32>
    %c0_59 = arith.constant 0 : index
    %c0_60 = arith.constant 0 : index
    %51 = vector.load %arg5[%c0_59, %c0_60] : memref<288x64xf32, #tpu.memory_space<vmem>>, vector<288x64xf32>
    %52 = arith.addf %51, %50 : vector<288x64xf32>
    %c0_61 = arith.constant 0 : index
    %c0_62 = arith.constant 0 : index
    %53 = vector.load %arg5[%c0_61, %c0_62] : memref<288x64xf32, #tpu.memory_space<vmem>>, vector<288x64xf32>
    tpu.vector_store %arg5[%c0_61, %c0_62], %52 {strides = array<i32>} : memref<288x64xf32, #tpu.memory_space<vmem>>, vector<288x64xf32>,
    %c0_63 = arith.constant 0 : index
    %c37 = arith.constant 37 : index
    %c0_64 = arith.constant 0 : index
    %54 = vector.load %arg2[%c0_63, %c37, %c0_64] : memref<1x326x64xbf16, #tpu.memory_space<vmem>>, vector<1x288x64xbf16>
    %55 = vector.shape_cast %54 : vector<1x288x64xbf16> to vector<288x64xbf16>
    %c7 = arith.constant 7 : index
    %c0_65 = arith.constant 0 : index
    %c0_66 = arith.constant 0 : index
    %56 = vector.load %arg3[%c7, %c0_65, %c0_66] : memref<9x64x64xbf16, #tpu.memory_space<vmem>>, vector<1x64x64xbf16>
    %57 = vector.shape_cast %56 : vector<1x64x64xbf16> to vector<64x64xbf16>
    %cst_67 = arith.constant dense<0.000000e+00> : vector<288x64xf32>
    %58 = tpu.matmul %55, %57, %cst_67 {dimension_numbers = #tpu.dot_dimension_numbers<[1], [0], [0], [1], [0, 0, 1, 1], [], []>} : vector<288x64xbf16>, vector<64x64xbf16>, vector<288x64xf32> -> vector<288x64xf32>
    %c0_68 = arith.constant 0 : index
    %c0_69 = arith.constant 0 : index
    %59 = vector.load %arg5[%c0_68, %c0_69] : memref<288x64xf32, #tpu.memory_space<vmem>>, vector<288x64xf32>
    %60 = arith.addf %59, %58 : vector<288x64xf32>
    %c0_70 = arith.constant 0 : index
    %c0_71 = arith.constant 0 : index
    %61 = vector.load %arg5[%c0_70, %c0_71] : memref<288x64xf32, #tpu.memory_space<vmem>>, vector<288x64xf32>
    tpu.vector_store %arg5[%c0_70, %c0_71], %60 {strides = array<i32>} : memref<288x64xf32, #tpu.memory_space<vmem>>, vector<288x64xf32>,
    %c0_72 = arith.constant 0 : index
    %c38 = arith.constant 38 : index
    %c0_73 = arith.constant 0 : index
    %62 = vector.load %arg2[%c0_72, %c38, %c0_73] : memref<1x326x64xbf16, #tpu.memory_space<vmem>>, vector<1x288x64xbf16>
    %63 = vector.shape_cast %62 : vector<1x288x64xbf16> to vector<288x64xbf16>
    %c8 = arith.constant 8 : index
    %c0_74 = arith.constant 0 : index
    %c0_75 = arith.constant 0 : index
    %64 = vector.load %arg3[%c8, %c0_74, %c0_75] : memref<9x64x64xbf16, #tpu.memory_space<vmem>>, vector<1x64x64xbf16>
    %65 = vector.shape_cast %64 : vector<1x64x64xbf16> to vector<64x64xbf16>
    %cst_76 = arith.constant dense<0.000000e+00> : vector<288x64xf32>
    %66 = tpu.matmul %63, %65, %cst_76 {dimension_numbers = #tpu.dot_dimension_numbers<[1], [0], [0], [1], [0, 0, 1, 1], [], []>} : vector<288x64xbf16>, vector<64x64xbf16>, vector<288x64xf32> -> vector<288x64xf32>
    %c0_77 = arith.constant 0 : index
    %c0_78 = arith.constant 0 : index
    %67 = vector.load %arg5[%c0_77, %c0_78] : memref<288x64xf32, #tpu.memory_space<vmem>>, vector<288x64xf32>
    %68 = arith.addf %67, %66 : vector<288x64xf32>
    %c0_79 = arith.constant 0 : index
    %c0_80 = arith.constant 0 : index
    %69 = vector.load %arg5[%c0_79, %c0_80] : memref<288x64xf32, #tpu.memory_space<vmem>>, vector<288x64xf32>
    tpu.vector_store %arg5[%c0_79, %c0_80], %68 {strides = array<i32>} : memref<288x64xf32, #tpu.memory_space<vmem>>, vector<288x64xf32>,
    %c0_81 = arith.constant 0 : index
    %c0_82 = arith.constant 0 : index
    %70 = vector.load %arg5[%c0_81, %c0_82] : memref<288x64xf32, #tpu.memory_space<vmem>>, vector<288x64xf32>
    %cst_83 = arith.constant 0.000000e+00 : f32
    %71 = vector.broadcast %cst_83 : f32 to vector<288x64xf32>
    %72 = arith.maximumf %70, %71 : vector<288x64xf32>
    %73 = arith.truncf %72 : vector<288x64xf32> to vector<288x64xbf16>
    %c0_84 = arith.constant 0 : index
    %c0_85 = arith.constant 0 : index
    %c0_86 = arith.constant 0 : index
    %74 = vector.load %arg4[%c0_84, %c0_85, %c0_86] : memref<1x288x64xbf16, #tpu.memory_space<vmem>>, vector<1x288x64xbf16>
    %75 = vector.shape_cast %74 : vector<1x288x64xbf16> to vector<288x64xbf16>
    %76 = vector.shape_cast %73 : vector<288x64xbf16> to vector<1x288x64xbf16>
    tpu.vector_store %arg4[%c0_84, %c0_85, %c0_86], %76 {strides = array<i32>} : memref<1x288x64xbf16, #tpu.memory_space<vmem>>, vector<1x288x64xbf16>,
    return
  }
  func.func @transform_0(%arg0: i32, %arg1: i32) -> (i32, i32, i32) {
    %c0_i32 = arith.constant 0 : i32
    %c0_i32_0 = arith.constant 0 : i32
    %c0_i32_1 = arith.constant 0 : i32
    return %arg0, %c0_i32, %c0_i32_0 : i32, i32, i32
  }
  func.func @transform_1(%arg0: i32, %arg1: i32) -> (i32, i32, i32) {
    %c0_i32 = arith.constant 0 : i32
    %c0_i32_0 = arith.constant 0 : i32
    %c0_i32_1 = arith.constant 0 : i32
    return %c0_i32, %c0_i32_0, %arg1 : i32, i32, i32
  }
  func.func @transform_2(%arg0: i32, %arg1: i32) -> (i32, i32, i32) {
    %c0_i32 = arith.constant 0 : i32
    %c0_i32_0 = arith.constant 0 : i32
    return %arg0, %c0_i32, %arg1 : i32, i32, i32
  }
}

</mosaic_0001>

<bundles_post_ra>
// kernel: tpu_custom_call.1
= control target key start
LH: loop header
LB: loop body
LE: loop exit
PB: predicated region body
PF: predicated region fallthrough
CT: control target
= control target key end

     0   :  { %s7036_s9 = smov 0   ;;  %s7038_s10 = smov 0   ;;  %s8235_s0 = inlined_call_operand.vmem [shape: bf16[2,326,64], index: 0, kind: input, shape index: {}]   ;;  %s8236_s1 = inlined_call_operand.vmem [shape: bf16[9,64,64], index: 1, kind: input, shape index: {}]   ;;  %s8237_s2 = inlined_call_operand.vmem [shape: bf16[2,288,64], index: 2, kind: output, shape index: {}]  }
   0x1   :  { %s7040_s11 = smov 0  }
   0x2 LB: > { %s24_s12 = sadd.s32 1, %s7015_s10  ;;  %p5654_p0 = scmp.ge.s32.totalorder %s7019_s11, 1  ;;  %s7019_s11 = sphi %s7040_s11, %s12_s11   ;;  %s7015_s10 = sphi %s7038_s10, %s8239_s10   ;;  %s7011_s9 = sphi %s7036_s9, %s8238_s9  }
   0x3   : > { %p26_p1 = scmp.ge.s32.totalorder %s24_s12, 2  ;;  %p135_p2 = scmp.lt.s32.totalorder %s7019_s11, 3 }
   0x5   : > { %s8241_s12 = smov (%p26_p1, %s24_s12), 0  ;;  %p136_p3 = pnand %p5654_p0, %p135_p2 }
   0x6   : > { %p164_p4 = scmp.lt.s32.totalorder (!%p136_p3), %s7011_s9, 1 }
   0x7   : > { %139 = sbr.rel (%p136_p3) target bundleno = 566 (0x236), region = 28 }
   0xc   : > { %v6791_v0 = vld [vmem:[%s8236_s1 + $0x18] sm:$0xff]   ;;  %v6792_v1 = vld [vmem:[%s8236_s1 + $0x10] sm:$0xff]   ;;  %s8243_s9 = smov (!%p164_p4, %s7011_s9), 1  ;;  %v6793_v2 = vld [vmem:[%s8236_s1 + $0x8] sm:$0xff]   ;;  %vm340_vm0 = vcmask 523264   ;;  %vm1398_vm2 = vcmask 1046528  }
   0xd   : > { %6361 = vmatprep.subr.bf16.mxu0 %v6791_v0  ;;  %6757 = vmatprep.subr.bf16.mxu1 %v6791_v0  ;;  %s6765_s19 = smul.u32 164, %s8243_s9  ;;  %v6794_v3 = vld [vmem:[%s8236_s1] sm:$0xff]   ;;  %v6799_v6 = vld [vmem:[%s8236_s1 + $0x38] sm:$0xff]   ;;  %v6805_v11 = vld [vmem:[%s8236_s1 + $0x30] sm:$0xff]   ;;  %vm747_vm1 = vsmask.f32 7424 }
   0xe   : > { %6362 = vmatpush3.bf16.msra.mxu0 %v6791_v0  ;;  %6761 = vmatpush3.bf16.msra.mxu1 %v6791_v0  ;;  %v6800_v7 = vld [vmem:[%s8236_s1 + $0x58] sm:$0xff]   ;;  %v6806_v13 = vld [vmem:[%s8236_s1 + $0x50] sm:$0xff]   ;;  %v6811_v16 = vld [vmem:[%s8236_s1 + $0x28] sm:$0xff]   ;;  %vm2477_vm3 = vsmask.f32 6400  ;;  %vm3150_vm4 = vcmask 1045504  }
   0xf   : > { %6363 = vmatprep.subr.bf16.mxu0 %v6792_v1  ;;  %6758 = vmatprep.subr.bf16.mxu1 %v6792_v1  ;;  %s7072_s24 = scalar_lea.vmem %s8235_s0, %s6765_s19  ;;  %v6812_v17 = vld [vmem:[%s8236_s1 + $0x48] sm:$0xff]   ;;  %v6817_v20 = vld [vmem:[%s8236_s1 + $0x20] sm:$0xff]   ;;  %v6824_v32 = vld [vmem:[%s8236_s1 + $0x78] sm:$0xff]   ;;  %vm4229_vm5 = vsmask.f32 5376  ;;  %vm4902_vm6 = vcmask 1044480  }
  0x10   : > { %v6795_v4 = vld [vmem:[%s7072_s24] sm:$0xff]   ;;  %v6796_v5 = vld [vmem:[%s7072_s24 + $0x50] sm:$0xff]   ;;  %v6797_v8 = vld [vmem:[%s7072_s24 + $0x8] sm:$0xff]   ;;  %vm5519_vm7 = vcmask 519168  }
  0x11   : > { %6369 = vmatprep.mubr.msk.bf16.mxu0 %vm340_vm0, %v6795_v4  ;;  %6389 = vmatprep.mubr.msk.bf16.mxu1 %vm340_vm0, %v6796_v5  ;;  %v6798_v9 = vld [vmem:[%s7072_s24 + $0x58] sm:$0xff]   ;;  %v6801_v10 = vld [vmem:[%s7072_s24 + $0x10] sm:$0xff]   ;;  %v6802_v12 = vld [vmem:[%s7072_s24 + $0x60] sm:$0xff]  }
  0x12   : > { %6364 = vmatpush3.bf16.msra.mxu0 %v6792_v1  ;;  %6762 = vmatpush3.bf16.msra.mxu1 %v6792_v1  ;;  %v6803_v14 = vld [vmem:[%s7072_s24 + $0x18] sm:$0xff]   ;;  %v6804_v15 = vld [vmem:[%s7072_s24 + $0x68] sm:$0xff]   ;;  %v6807_v18 = vld [vmem:[%s7072_s24 + $0x20] sm:$0xff]  }
  0x13   : > { %6365 = vmatprep.subr.bf16.mxu0 %v6793_v2  ;;  %6759 = vmatprep.subr.bf16.mxu1 %v6793_v2  ;;  %v6808_v19 = vld [vmem:[%s7072_s24 + $0x70] sm:$0xff]   ;;  %v6809_v21 = vld [vmem:[%s7072_s24 + $0x28] sm:$0xff]   ;;  %v6819_v22 = vld [vmem:[%s7072_s24] sm:$0xff]  }
  0x14   : > { %v6820_v23 = vld [vmem:[%s7072_s24 + $0x8] sm:$0xff]   ;;  %v6810_v24 = vld [vmem:[%s7072_s24 + $0x78] sm:$0xff]   ;;  %v6813_v25 = vld [vmem:[%s7072_s24 + $0x30] sm:$0xff]   ;;  %v751_v27 = vshll.u32 %v6819_v22, 16  ;;  %v749_v28 = vshrl.u32 %v6819_v22, 16 }
  0x15   : > { %v6814_v26 = vld [vmem:[%s7072_s24 + $0x80] sm:$0xff]   ;;  %v756_v29 = vshll.u32 %v6820_v23, 16  ;;  %v6822_v33 = vld [vmem:[%s7072_s24 + $0x10] sm:$0xff]   ;;  %v6825_v34 = vld [vmem:[%s7072_s24 + $0x18] sm:$0xff]   ;;  %v760_v41 = vshrl.u32 %v6820_v23, 16 }
  0x16   : > { %6366 = vmatpush3.bf16.msra.mxu0 %v6793_v2  ;;  %6763 = vmatpush3.bf16.msra.mxu1 %v6793_v2  ;;  %v753_v30 = vrot.slane %v751_v27, 1  ;;  %v6823_v31 = vld [vmem:[%s8236_s1 + $0x40] sm:$0xff]   ;;  %v6815_v35 = vld [vmem:[%s7072_s24 + $0x38] sm:$0xff]   ;;  %v6816_v36 = vld [vmem:[%s7072_s24 + $0x88] sm:$0xff]   ;;  %v764_v40 = vshll.u32 %v6822_v33, 16  ;;  %v768_v42 = vshrl.u32 %v6822_v33, 16 }
  0x17   : > { %6367 = vmatprep.subr.bf16.mxu0 %v6794_v3  ;;  %6760 = vmatprep.subr.bf16.mxu1 %v6794_v3  ;;  %v758_v38 = vrot.slane %v756_v29, 1  ;;  %v6818_v39 = vld [vmem:[%s7072_s24 + $0x40] sm:$0xff]   ;;  %v772_v43 = vshll.u32 %v6825_v34, 16  ;;  %v6827_v44 = vld [vmem:[%s7072_s24 + $0x8] sm:$0xff]   ;;  %v6830_v47 = vld [vmem:[%s8236_s1 + $0x98] sm:$0xff]   ;;  %v776_v57 = vshrl.u32 %v6825_v34, 16 }
  0x18   : > { %v754_v37 = vor.u32 %v753_v30, %v749_v28  ;;  %v6826_v46 = vld [vmem:[%s7072_s24] sm:$0xfe]   ;;  %v766_v48 = vrot.slane %v764_v40, 1  ;;  %v6831_v51 = vld [vmem:[%s7072_s24 + $0x28] sm:$0xff]   ;;  %v1400_v56 = vrot.slane %v6827_v44, 1  ;;  %v6829_v60 = vld [vmem:[%s7072_s24 + $0x10] sm:$0xff]  }
  0x19   : > { %v6828_v49 = vld [vmem:[%s7072_s24 + $0x20] sm:$0xff]   ;;  %v762_v50 = vor.u32 %v760_v41, %v758_v38  ;;  %v6821_v52 = vld [vmem:[%s7072_s24 + $0x48] sm:$0xff]   ;;  %v774_v54 = vrot.slane %v772_v43, 1  ;;  %v1399_v55 = vrot.slane %v6826_v46, 1  ;;  %v788_v61 = vshll.u32 %v6831_v51, 16  ;;  %v6835_v0 = vld [vmem:[%s8236_s1 + $0x70] sm:$0xff]  }
  0x1a   : > { %6368 = vmatpush3.bf16.msra.mxu0 %v6794_v3  ;;  %6764 = vmatpush3.bf16.msra.mxu1 %v6794_v3  ;;  %v759_v45 = vsel %vm747_vm1, %v754_v37, %v758_v38  ;;  %v770_v53 = vor.u32 %v768_v42, %v766_v48  ;;  %v780_v58 = vshll.u32 %v6828_v49, 16  ;;  %v784_v63 = vshrl.u32 %v6828_v49, 16  ;;  %v6832_v2 = vld [vmem:[%s7072_s24 + $0x18] sm:$0xff]   ;;  %v6833_v4 = vld [vmem:[%s7072_s24 + $0x30] sm:$0xff]   ;;  %v6845_v22 = vld [vmem:[%s8236_s1 + $0x68] sm:$0xff]  }
  0x1b   : > { %6405 = vmatprep.subr.bf16.mxu1 %v6799_v6  ;;  %6449 = vmatprep.subr.bf16.mxu0 %v6800_v7  ;;  %v767_v59 = vsel %vm747_vm1, %v762_v50, %v766_v48  ;;  %v1401_v1 = vsel %vm1398_vm2, %v1399_v55, %v1400_v56  ;;  %v778_v5 = vor.u32 %v776_v57, %v774_v54  ;;  %v6841_v30 = vld [vmem:[%s7072_s24 + $0x48] sm:$0xff]   ;;  %v6842_v33 = vld [vmem:[%s7072_s24 + $0x38] sm:$0xff]   ;;  %v6843_v44 = vld [vmem:[%s7072_s24 + $0x50] sm:$0xff]  }
  0x1c   : > { %v775_v62 = vsel %vm747_vm1, %v770_v53, %v774_v54  ;;  %v782_v3 = vrot.slane %v780_v58, 1  ;;  %v6850_v37 = vld [vmem:[%s8236_s1 + $0x88] sm:$0xff]   ;;  %v820_v41 = vshll.u32 %v6841_v30, 16  ;;  %v1412_v46 = vrot.slane %v6842_v33, 1  ;;  %v6846_v50 = vld [vmem:[%s7072_s24 + $0x58] sm:$0xff]   ;;  %v6844_v55 = vld [vmem:[%s7072_s24 + $0x40] sm:$0xff]  }
  0x1d   : > { %6370 = vmatmul.mubr.msk.bf16.vlgmr.msra.gmra.mxu0 %vm340_vm0, %v6797_v8  ;;  %6390 = vmatmul.mubr.msk.bf16.vlgmr.msra.gmra.mxu1 %vm340_vm0, %v6798_v9  ;;  %v6836_v8 = vld [vmem:[%s7072_s24 + $0x38] sm:$0xff]  }
  0x1e   : > { %6406 = vmatpush3.bf16.msra.mxu1 %v6799_v6  ;;  %6450 = vmatpush3.bf16.msra.mxu0 %v6800_v7  ;;  %v1402_v6 = vrot.slane %v6829_v60, 1  ;;  %v790_v7 = vrot.slane %v788_v61, 1  ;;  %v786_v9 = vor.u32 %v784_v63, %v782_v3  ;;  %v822_v49 = vrot.slane %v820_v41, 1  ;;  %v6847_v60 = vld [vmem:[%s7072_s24 + $0x48] sm:$0xff]  }
  0x1f   : > { %6373 = vmatprep.mubr.msk.bf16.mxu0 %vm340_vm0, %v6801_v10  ;;  %6393 = vmatprep.mubr.msk.bf16.mxu1 %vm340_vm0, %v6802_v12  ;;  %v1404_v10 = vrot.slane %v6832_v2, 1  ;;  %v6834_v12 = vld [vmem:[%s7072_s24 + $0x20] sm:$0xff]  }
  0x20   : > { %6407 = vmatprep.subr.bf16.mxu1 %v6805_v11  ;;  %6451 = vmatprep.subr.bf16.mxu0 %v6806_v13 }
  0x22   : > { %6408 = vmatpush3.bf16.msra.mxu1 %v6805_v11  ;;  %6452 = vmatpush3.bf16.msra.mxu0 %v6806_v13  ;;  %v796_v11 = vshll.u32 %v6833_v4, 16  ;;  %v783_v13 = vsel %vm747_vm1, %v778_v5, %v782_v3  ;;  %v1416_v3 = vrot.slane %v6847_v60, 1  ;;  %v6849_v5 = vld [vmem:[%s7072_s24 + $0x50] sm:$0xff]  }
  0x23   : > { %6409 = vmatprep.subr.bf16.mxu1 %v6811_v16  ;;  %6453 = vmatprep.subr.bf16.mxu0 %v6812_v17 }
  0x24   : > { %v798_v23 = vrot.slane %v796_v11, 1  ;;  %v6864_v11 = vld [vmem:[%s8236_s1 + $0x80] sm:$0xff]  }
  0x25   : > { %6374 = vmatmul.mubr.msk.bf16.gmra.mxu0 %vm340_vm0, %v6803_v14  ;;  %6394 = vmatmul.mubr.msk.bf16.gmra.mxu1 %vm340_vm0, %v6804_v15  ;;  %v1403_v14 = vsel %vm1398_vm2, %v1400_v56, %v1402_v6  ;;  %v792_v15 = vshrl.u32 %v6831_v51, 16  ;;  %v824_v51 = vshrl.u32 %v6841_v30, 16  ;;  %v832_v56 = vshrl.u32 %v6843_v44, 16 }
  0x26   : > { %6377 = vmatprep.mubr.msk.bf16.mxu0 %vm340_vm0, %v6807_v18  ;;  %6397 = vmatprep.mubr.msk.bf16.mxu1 %vm340_vm0, %v6808_v19  ;;  %v800_v18 = vshrl.u32 %v6833_v4, 16  ;;  %v804_v19 = vshll.u32 %v6836_v8, 16  ;;  %v6851_v4 = vld [vmem:[%s7072_s24 + $0x68] sm:$0xff]  }
  0x27   : > { %6410 = vmatpush3.bf16.msra.mxu1 %v6811_v16  ;;  %6454 = vmatpush3.bf16.msra.mxu0 %v6812_v17  ;;  %v6837_v16 = vld [vmem:[%s7072_s24 + $0x28] sm:$0xff]   ;;  %v791_v17 = vsel %vm747_vm1, %v786_v9, %v790_v7  ;;  %v826_v63 = vor.u32 %v824_v51, %v822_v49 }
  0x28   : > { %6411 = vmatprep.subr.bf16.mxu1 %v6817_v20  ;;  %6455 = vmatprep.subr.bf16.mxu0 %v6823_v31  ;;  %v1408_v27 = vrot.slane %v6837_v16, 1  ;;  %v802_v28 = vor.u32 %v800_v18, %v798_v23  ;;  %v806_v29 = vrot.slane %v804_v19, 1  ;;  %v1418_v19 = vrot.slane %v6849_v5, 1  ;;  %v6872_v5 = vld [vmem:[%s7072_s24 + $0x8] sm:$0xfe]  }
  0x2a   : > { %v807_v38 = vsel %vm747_vm1, %v802_v28, %v806_v29  ;;  %v856_v28 = vshrl.u32 %v6851_v4, 16 }
  0x2b   : > { %6412 = vmatpush3.bf16.msra.mxu1 %v6817_v20  ;;  %6456 = vmatpush3.bf16.msra.mxu0 %v6823_v31  ;;  %v6840_v20 = vld [vmem:[%s8236_s1 + $0x90] sm:$0xff]  }
  0x2c   : > { %6493 = vmatprep.subr.bf16.mxu1 %v6824_v32  ;;  %6537 = vmatprep.subr.bf16.mxu0 %v6830_v47  ;;  %v6839_v31 = vld [vmem:[%s7072_s24 + $0x30] sm:$0xff]  }
  0x2d   : > { %6378 = vmatmul.mubr.msk.bf16.gmra.mxu0 %vm340_vm0, %v6809_v21  ;;  %6398 = vmatmul.mubr.msk.bf16.gmra.mxu1 %vm340_vm0, %v6810_v24  ;;  %v1405_v21 = vsel %vm1398_vm2, %v1402_v6, %v1404_v10  ;;  %v6838_v24 = vld [vmem:[%s7072_s24 + $0x40] sm:$0xff]   ;;  %v1410_v43 = vrot.slane %v6839_v31, 1 }
  0x2e   : > { %6381 = vmatprep.mubr.msk.bf16.mxu0 %vm340_vm0, %v6813_v25  ;;  %6401 = vmatprep.mubr.msk.bf16.mxu1 %vm340_vm0, %v6814_v26  ;;  %v794_v25 = vor.u32 %v792_v15, %v790_v7  ;;  %v1406_v26 = vrot.slane %v6834_v12, 1  ;;  %v816_v40 = vshrl.u32 %v6838_v24, 16  ;;  %v6852_v7 = vld [vmem:[%s7072_s24 + $0x58] sm:$0xff]   ;;  %v852_v15 = vshll.u32 %v6851_v4, 16  ;;  %v6867_v4 = vld [vmem:[%s7072_s24 + $0x10] sm:$0xff]  }
  0x2f   : > { %v1411_v54 = vsel %vm1398_vm2, %v1408_v27, %v1410_v43  ;;  %v1413_v58 = vsel %vm1398_vm2, %v1410_v43, %v1412_v46  ;;  %v7247_v43 = vld [vmem:[%s8236_s1 + $0xd8] sm:$0xff]  }
  0x30   : > { %v799_v34 = vsel %vm747_vm1, %v794_v25, %v798_v23  ;;  %v6856_v23 = vld [vmem:[%s7072_s24 + $0x78] sm:$0xff]  }
  0x31   : > { %v868_v33 = vshll.u32 %v6856_v23, 16 }
  0x35   : > { %6382 = vmatmul.mubr.msk.bf16.gmra.mxu0 %vm340_vm0, %v6815_v35  ;;  %6402 = vmatmul.mubr.msk.bf16.gmra.mxu1 %vm340_vm0, %v6816_v36  ;;  %v1407_v35 = vsel %vm1398_vm2, %v1404_v10, %v1406_v26  ;;  %v808_v36 = vshrl.u32 %v6836_v8, 16  ;;  %v840_v10 = vshrl.u32 %v6846_v50, 16 }
  0x36   : > { %6385 = vmatprep.mubr.msk.bf16.mxu0 %vm340_vm0, %v6818_v39  ;;  %6413 = vmatprep.mubr.msk.bf16.mxu1 %vm340_vm0, %v759_v45  ;;  %v1409_v39 = vsel %vm1398_vm2, %v1406_v26, %v1408_v27  ;;  %v1419_v27 = vsel %vm1398_vm2, %v1416_v3, %v1418_v19 }
  0x37   : > { %v810_v45 = vor.u32 %v808_v36, %v806_v29  ;;  %v6854_v29 = vld [vmem:[%s7072_s24 + $0x60] sm:$0xff]  }
  0x38   : > { %v6858_v36 = vld [vmem:[%s7072_s24 + $0x80] sm:$0xff]  }
  0x3d   : > { %6386 = vmatmul.mubr.msk.bf16.gmra.mxu0 %vm340_vm0, %v6821_v52  ;;  %6414 = vmatmul.mubr.msk.bf16.vlgmr.msra.gmra.mxu1 %vm340_vm0, %v767_v59  ;;  %v828_v52 = vshll.u32 %v6843_v44, 16  ;;  %v836_v59 = vshll.u32 %v6846_v50, 16  ;;  %v872_v44 = vshrl.u32 %v6856_v23, 16  ;;  %v6862_v50 = vld [vmem:[%s7072_s24 + $0x90] ss:$0 sps:$4 sm:$0x11]  }
  0x3e   : > { %6494 = vmatpush3.bf16.msra.mxu1 %v6824_v32  ;;  %6417 = vmatprep.mubr.msk.bf16.mxu1 %vm340_vm0, %v775_v62  ;;  %v812_v32 = vshll.u32 %v6838_v24, 16  ;;  %v6848_v62 = vld [vmem:[%s7072_s24 + $0x60] sm:$0xff]   ;;  %v7229_v24 = vld [vmem:[%s8236_s1 + $0xb8] sm:$0xff]  }
  0x3f   : > { %6457 = vmatprep.mubr.msk.bf16.mxu0 %vm340_vm0, %v1401_v1  ;;  %6495 = vmatprep.subr.bf16.mxu1 %v6835_v0  ;;  %v830_v61 = vrot.slane %v828_v52, 1  ;;  %v838_v2 = vrot.slane %v836_v59, 1  ;;  %v844_v6 = vshll.u32 %v6848_v62, 16 }
  0x40   : > { %v814_v42 = vrot.slane %v812_v32, 1 }
  0x41   : > { %v834_v1 = vor.u32 %v832_v56, %v830_v61  ;;  %v831_v8 = vsel %vm747_vm1, %v826_v63, %v830_v61  ;;  %v846_v16 = vrot.slane %v844_v6, 1  ;;  %v842_v18 = vor.u32 %v840_v10, %v838_v2  ;;  %v6863_v63 = vld [vmem:[%s7072_s24 + $0x80] sm:$0xff]  }
  0x42   : > { %6496 = vmatpush3.bf16.msra.mxu1 %v6835_v0  ;;  %v818_v48 = vor.u32 %v816_v40, %v814_v42  ;;  %v815_v53 = vsel %vm747_vm1, %v810_v45, %v814_v42  ;;  %v1414_v0 = vrot.slane %v6844_v55, 1  ;;  %v870_v40 = vrot.slane %v868_v33, 1  ;;  %v6860_v42 = vld [vmem:[%s7072_s24 + $0x88] sm:$0xff]  }
  0x43   : > { %6497 = vmatprep.subr.bf16.mxu1 %v6845_v22  ;;  %v839_v12 = vsel %vm747_vm1, %v834_v1, %v838_v2  ;;  %v847_v26 = vsel %vm747_vm1, %v842_v18, %v846_v16  ;;  %v876_v45 = vshll.u32 %v6858_v36, 16  ;;  %v888_v61 = vshrl.u32 %v6860_v42, 16  ;;  %v6866_v1 = vld [vmem:[%s7072_s24 + $0x8] sm:$0xfe]  }
  0x44   : > { %v823_v57 = vsel %vm747_vm1, %v818_v48, %v822_v49  ;;  %v1415_v9 = vsel %vm1398_vm2, %v1412_v46, %v1414_v0  ;;  %v6859_v48 = vld [vmem:[%s7072_s24 + $0x70] sm:$0xff]   ;;  %v880_v49 = vshrl.u32 %v6858_v36, 16  ;;  %v874_v56 = vor.u32 %v872_v44, %v870_v40  ;;  %v6880_v44 = vld [vmem:[%s7072_s24 + $0x28] sm:$0xff]  }
  0x45   : > { %6418 = vmatmul.mubr.msk.bf16.gmra.mxu1 %vm340_vm0, %v783_v13  ;;  %6458 = vmatmul.mubr.msk.bf16.vlgmr.msra.gmra.mxu0 %vm340_vm0, %v1403_v14  ;;  %v1417_v13 = vsel %vm1398_vm2, %v1414_v0, %v1416_v3  ;;  %v848_v14 = vshrl.u32 %v6848_v62, 16  ;;  %v878_v55 = vrot.slane %v876_v45, 1  ;;  %v892_v62 = vshll.u32 %v6862_v50, 16  ;;  %v6865_v0 = vld [vmem:[%s7072_s24 + $0x88] sm:$0xff]   ;;  %v6883_v50 = vld [vmem:[%s7072_s24 + $0x30] sm:$0xff]  }
  0x46   : > { %6538 = vmatpush3.bf16.msra.mxu0 %v6830_v47  ;;  %6421 = vmatprep.mubr.msk.bf16.mxu1 %vm340_vm0, %v791_v17  ;;  %v6855_v47 = vld [vmem:[%s8236_s1 + $0x60] sm:$0xff]   ;;  %v6853_v17 = vld [vmem:[%s7072_s24 + $0x70] sm:$0xff]   ;;  %v1430_v10 = vrot.slane %v6863_v63, 1  ;;  %v6891_v63 = vld [vmem:[%s8236_s1 + $0xa8] sm:$0xff]  }
  0x47   : > { %6461 = vmatprep.mubr.msk.bf16.mxu0 %vm340_vm0, %v1405_v21  ;;  %6539 = vmatprep.subr.bf16.mxu0 %v6840_v20  ;;  %v850_v21 = vor.u32 %v848_v14, %v846_v16  ;;  %v860_v25 = vshll.u32 %v6853_v17, 16  ;;  %v864_v32 = vshrl.u32 %v6853_v17, 16  ;;  %v879_v2 = vsel %vm747_vm1, %v874_v56, %v878_v55  ;;  %v6868_v16 = vld [vmem:[%s7072_s24 + $0x90] ss:$0 sps:$4 sm:$0x11]  }
  0x48   : > { %6498 = vmatpush3.bf16.msra.mxu1 %v6845_v22  ;;  %v854_v22 = vrot.slane %v852_v15, 1  ;;  %v1939_v14 = vrot.slane %v6867_v4, 1  ;;  %v2479_v15 = vshrl.u32 %v6872_v5, 16  ;;  %v2482_v17 = vshll.u32 %v6872_v5, 16  ;;  %v6885_v4 = vld [vmem:[%s7072_s24 + $0x38] sm:$0xff]  }
  0x49   : > { %6499 = vmatprep.subr.bf16.mxu1 %v6855_v47  ;;  %v1434_v33 = vrot.slane %v6868_v16, 1  ;;  %v2514_v56 = vshrl.u32 %v6880_v44, 16 }
  0x4a   : > { %6540 = vmatpush3.bf16.msra.mxu0 %v6840_v20  ;;  %v1420_v20 = vrot.slane %v6852_v7, 1  ;;  %v855_v30 = vsel %vm747_vm1, %v850_v21, %v854_v22  ;;  %v6871_v21 = vld [vmem:[%s7072_s24 + $0x20] sm:$0xff]  }
  0x4b   : > { %6541 = vmatprep.subr.bf16.mxu0 %v6850_v37 }
  0x4c   : > { %6500 = vmatpush3.bf16.msra.mxu1 %v6855_v47  ;;  %v1421_v31 = vsel %vm1398_vm2, %v1418_v19, %v1420_v20 }
  0x4d   : > { %6422 = vmatmul.mubr.msk.bf16.gmra.mxu1 %vm340_vm0, %v799_v34  ;;  %6462 = vmatmul.mubr.msk.bf16.gmra.mxu0 %vm340_vm0, %v1407_v35  ;;  %v6857_v34 = vld [vmem:[%s7072_s24 + $0x68] sm:$0xff]   ;;  %v862_v35 = vrot.slane %v860_v25, 1 }
  0x4e   : > { %6425 = vmatprep.mubr.msk.bf16.mxu1 %vm340_vm0, %v807_v38  ;;  %6465 = vmatprep.mubr.msk.bf16.mxu0 %vm340_vm0, %v1409_v39  ;;  %v1422_v38 = vrot.slane %v6854_v29, 1  ;;  %v1424_v41 = vrot.slane %v6857_v34, 1  ;;  %v2484_v29 = vrot.slane %v2482_v17, 2 }
  0x4f   : > { %6542 = vmatpush3.bf16.msra.mxu0 %v6850_v37  ;;  %6581 = vmatprep.subr.bf16.mxu1 %v7229_v24  ;;  %v858_v37 = vor.u32 %v856_v28, %v854_v22  ;;  %v866_v39 = vor.u32 %v864_v32, %v862_v35  ;;  %v2481_v28 = vrot.slane %v2479_v15, 1  ;;  %v6878_v32 = vld [vmem:[%s7072_s24 + $0x20] sm:$0xff]  }
  0x50   : > { %6543 = vmatprep.subr.bf16.mxu0 %v6864_v11  ;;  %v1423_v47 = vsel %vm1398_vm2, %v1420_v20, %v1422_v38  ;;  %v1425_v52 = vsel %vm1398_vm2, %v1422_v38, %v1424_v41  ;;  %v6869_v20 = vld [vmem:[%s7072_s24 + $0x18] sm:$0xff]   ;;  %v6901_v15 = vld [vmem:[%s8236_s1 + $0xa0] sm:$0xff]  }
  0x51   : > { %v863_v46 = vsel %vm747_vm1, %v858_v37, %v862_v35  ;;  %v871_v51 = vsel %vm747_vm1, %v866_v39, %v870_v40  ;;  %v1941_v34 = vrot.slane %v6869_v20, 1  ;;  %v1943_v35 = vrot.slane %v6871_v21, 1  ;;  %v6874_v40 = vld [vmem:[%s7072_s24 + $0x28] sm:$0xff]  }
  0x52   : > { %v2485_v38 = vor.u32 %v2484_v29, %v2481_v28  ;;  %v6884_v20 = vld [vmem:[%s7072_s24 + $0x48] sm:$0xff]   ;;  %v6893_v28 = vld [vmem:[%s7072_s24 + $0x50] sm:$0xff]  }
  0x53   : > { %6544 = vmatpush3.bf16.msra.mxu0 %v6864_v11 }
  0x54   : > { %6625 = vmatprep.subr.bf16.mxu0 %v7247_v43 }
  0x55   : > { %6426 = vmatmul.mubr.msk.bf16.gmra.mxu1 %vm340_vm0, %v815_v53  ;;  %6466 = vmatmul.mubr.msk.bf16.gmra.mxu0 %vm340_vm0, %v1411_v54  ;;  %v884_v53 = vshll.u32 %v6860_v42, 16  ;;  %v6861_v54 = vld [vmem:[%s7072_s24 + $0x78] sm:$0xff]   ;;  %v2508_v42 = vshll.u32 %v6878_v32, 16 }
  0x56   : > { %6429 = vmatprep.mubr.msk.bf16.mxu1 %vm340_vm0, %v823_v57  ;;  %6469 = vmatprep.mubr.msk.bf16.mxu0 %vm340_vm0, %v1413_v58  ;;  %v1426_v57 = vrot.slane %v6859_v48, 1  ;;  %v882_v58 = vor.u32 %v880_v49, %v878_v55  ;;  %v1428_v60 = vrot.slane %v6861_v54, 1  ;;  %v7293_v49 = vld [vmem:[%s7072_s24 + $0x30] sm:$0xff]  }
  0x57   : > { %v886_v59 = vrot.slane %v884_v53, 1  ;;  %v2510_v55 = vrot.slane %v2508_v42, 2 }
  0x58   : > { %v1427_v3 = vsel %vm1398_vm2, %v1424_v41, %v1426_v57  ;;  %v1429_v7 = vsel %vm1398_vm2, %v1426_v57, %v1428_v60  ;;  %v1431_v23 = vsel %vm1398_vm2, %v1428_v60, %v1430_v10  ;;  %v2505_v41 = vshrl.u32 %v6878_v32, 16 }
  0x59   : > { %v887_v6 = vsel %vm747_vm1, %v882_v58, %v886_v59  ;;  %v890_v11 = vor.u32 %v888_v61, %v886_v59  ;;  %v2517_v57 = vshll.u32 %v6880_v44, 16  ;;  %v1945_v58 = vrot.slane %v6874_v40, 1 }
  0x5a   : > { %v2507_v54 = vrot.slane %v2505_v41, 1  ;;  %v2523_v60 = vshrl.u32 %v6883_v50, 16  ;;  %v1947_v61 = vrot.slane %v7293_v49, 1  ;;  %v2559_v41 = vshrl.u32 %v6893_v28, 16 }
  0x5b   : > { %v1946_v5 = vsel %vm1398_vm2, %v1943_v35, %v1945_v58  ;;  %v2562_v44 = vshll.u32 %v6893_v28, 16 }
  0x5d   : > { %6430 = vmatmul.mubr.msk.bf16.gmra.mxu1 %vm340_vm0, %v831_v8  ;;  %6470 = vmatmul.mubr.msk.bf16.gmra.mxu0 %vm340_vm0, %v1415_v9  ;;  %v6873_v8 = vld [vmem:[%s7072_s24 + $0x10] sm:$0xff]   ;;  %v894_v9 = vrot.slane %v892_v62, 1  ;;  %v2526_v62 = vshll.u32 %v6883_v50, 16 }
  0x5e   : > { %6433 = vmatprep.mubr.msk.bf16.mxu1 %vm340_vm0, %v839_v12  ;;  %6473 = vmatprep.mubr.msk.bf16.mxu0 %vm340_vm0, %v1417_v13  ;;  %v1432_v12 = vrot.slane %v6865_v0, 1  ;;  %v1938_v13 = vrot.slane %v6866_v1, 1  ;;  %v2487_v18 = vshrl.u32 %v6873_v8, 16  ;;  %v2490_v19 = vshll.u32 %v6873_v8, 16  ;;  %v6879_v1 = vld [vmem:[%s7072_s24 + $0x38] sm:$0xff]   ;;  %v6886_v8 = vld [vmem:[%s8236_s1 + $0xd0] sm:$0xff]  }
  0x5f   : > { %v895_v22 = vsel %vm747_vm1, %v890_v11, %v894_v9  ;;  %v2511_v0 = vor.u32 %v2510_v55, %v2507_v54  ;;  %v1948_v9 = vsel %vm1398_vm2, %v1945_v58, %v1947_v61  ;;  %v6888_v11 = vld [vmem:[%s7072_s24 + $0x40] sm:$0xff]   ;;  %v1949_v16 = vrot.slane %v6879_v1, 1 }
  0x60   : > { %v1433_v25 = vsel %vm1398_vm2, %v1430_v10, %v1432_v12  ;;  %v1435_v45 = vsel %vm1398_vm2, %v1432_v12, %v1434_v33  ;;  %v2528_v10 = vrot.slane %v2526_v62, 2  ;;  %v2541_v21 = vshrl.u32 %v6888_v11, 16 }
  0x61   : > { %v1950_v29 = vsel %vm1398_vm2, %v1947_v61, %v1949_v16 }
  0x62   : > { %v2543_v33 = vrot.slane %v2541_v21, 1 }
  0x65   : > { %6434 = vmatmul.mubr.msk.bf16.gmra.mxu1 %vm340_vm0, %v847_v26  ;;  %6474 = vmatmul.mubr.msk.bf16.gmra.mxu0 %vm340_vm0, %v1419_v27  ;;  %v6875_v26 = vld [vmem:[%s7072_s24 + $0x18] sm:$0xff]   ;;  %v1940_v27 = vsel %vm1398_vm2, %v1938_v13, %v1939_v14  ;;  %v2532_v13 = vshrl.u32 %v6885_v4, 16 }
  0x66   : > { %6437 = vmatprep.mubr.msk.bf16.mxu1 %vm340_vm0, %v855_v30  ;;  %6477 = vmatprep.mubr.msk.bf16.mxu0 %vm340_vm0, %v1421_v31  ;;  %v2489_v30 = vrot.slane %v2487_v18, 1  ;;  %v2492_v31 = vrot.slane %v2490_v19, 2  ;;  %v2496_v36 = vshrl.u32 %v6875_v26, 16  ;;  %v2499_v37 = vshll.u32 %v6875_v26, 16 }
  0x68   : > { %v2493_v39 = vor.u32 %v2492_v31, %v2489_v30  ;;  %v2501_v48 = vrot.slane %v2499_v37, 2 }
  0x6a   : > { %v2494_v53 = vsel %vm2477_vm3, %v2485_v38, %v2493_v39 }
  0x6d   : > { %6438 = vmatmul.mubr.msk.bf16.gmra.mxu1 %vm340_vm0, %v863_v46  ;;  %6478 = vmatmul.mubr.msk.bf16.gmra.mxu0 %vm340_vm0, %v1423_v47  ;;  %v1942_v46 = vsel %vm1398_vm2, %v1939_v14, %v1941_v34  ;;  %v2498_v47 = vrot.slane %v2496_v36, 1  ;;  %v2535_v14 = vshll.u32 %v6885_v4, 16  ;;  %v1953_v36 = vrot.slane %v6884_v20, 1 }
  0x6e   : > { %6441 = vmatprep.mubr.msk.bf16.mxu1 %vm340_vm0, %v871_v51  ;;  %6481 = vmatprep.mubr.msk.bf16.mxu0 %vm340_vm0, %v1425_v52  ;;  %v1944_v51 = vsel %vm1398_vm2, %v1941_v34, %v1943_v35  ;;  %v6881_v52 = vld [vmem:[%s8236_s1 + $0xb0] sm:$0xff]   ;;  %v6910_v35 = vld [vmem:[%s8236_s1 + $0xc0] sm:$0xff]  }
  0x6f   : > { %v2502_v59 = vor.u32 %v2501_v48, %v2498_v47  ;;  %v2537_v26 = vrot.slane %v2535_v14, 2  ;;  %v6895_v47 = vld [vmem:[%s7072_s24 + $0x58] sm:$0xff]  }
  0x70   : > { %v2568_v58 = vshrl.u32 %v6895_v47, 16 }
  0x71   : > { %v2512_v12 = vsel %vm2477_vm3, %v2502_v59, %v2511_v0 }
  0x75   : > { %6442 = vmatmul.mubr.msk.bf16.gmra.mxu1 %vm340_vm0, %v879_v2  ;;  %6482 = vmatmul.mubr.msk.bf16.gmra.mxu0 %vm340_vm0, %v1427_v3  ;;  %v2516_v2 = vrot.slane %v2514_v56, 1  ;;  %v7312_v3 = vld [vmem:[%s7072_s24 + $0x40] sm:$0xff]   ;;  %v2561_v56 = vrot.slane %v2559_v41, 1 }
  0x76   : > { %6445 = vmatprep.mubr.msk.bf16.mxu1 %vm340_vm0, %v887_v6  ;;  %6485 = vmatprep.mubr.msk.bf16.mxu0 %vm340_vm0, %v1429_v7  ;;  %v2503_v6 = vsel %vm2477_vm3, %v2493_v39, %v2502_v59  ;;  %v2525_v7 = vrot.slane %v2523_v60, 1  ;;  %v1951_v18 = vrot.slane %v7312_v3, 1  ;;  %v2571_v59 = vshll.u32 %v6895_v47, 16  ;;  %v7372_v60 = vld [vmem:[%s8236_s1 + $0x118] sm:$0xff]   ;;  %v6906_v47 = vld [vmem:[%s7072_s24 + $0x90] sm:$0xff]  }
  0x77   : > { %v2570_v3 = vrot.slane %v2568_v58, 1 }
  0x78   : > { %v2529_v19 = vor.u32 %v2528_v10, %v2525_v7  ;;  %v1952_v31 = vsel %vm1398_vm2, %v1949_v16, %v1951_v18  ;;  %v1954_v48 = vsel %vm1398_vm2, %v1951_v18, %v1953_v36  ;;  %v2573_v4 = vrot.slane %v2571_v59, 2 }
  0x7a   : > { %v2574_v16 = vor.u32 %v2573_v4, %v2570_v3  ;;  %v6913_v4 = vld [vmem:[%s7072_s24 + $0x10] sm:$0xff]  }
  0x7d   : > { %6446 = vmatmul.mubr.msk.bf16.gmra.mxu1 %vm340_vm0, %v895_v22  ;;  %6486 = vmatmul.mubr.msk.bf16.gmra.mxu0 %vm340_vm0, %v1431_v23  ;;  %v2544_v22 = vshll.u32 %v6888_v11, 16  ;;  %v6896_v23 = vld [vmem:[%s8236_s1 + $0xc8] sm:$0xff]  }
  0x7e   : > { %6489 = vmatprep.mubr.msk.bf16.mxu0 %vm340_vm0, %v1433_v25  ;;  %6501 = vmatprep.mubr.msk.bf16.mxu1 %vm340_vm0, %v1940_v27  ;;  %v2534_v25 = vrot.slane %v2532_v13, 1  ;;  %v6890_v27 = vld [vmem:[%s7072_s24 + $0x48] sm:$0xff]   ;;  %v6903_v13 = vld [vmem:[%s7072_s24 + $0x70] sm:$0xff]  }
  0x7f   : > { %v2546_v34 = vrot.slane %v2544_v22, 2  ;;  %v2550_v38 = vshrl.u32 %v6890_v27, 16  ;;  %v2553_v40 = vshll.u32 %v6890_v27, 16  ;;  %v2595_v20 = vshrl.u32 %v6903_v13, 16  ;;  %v6899_v22 = vld [vmem:[%s7072_s24 + $0x78] sm:$0xff]  }
  0x80   : > { %v2538_v39 = vor.u32 %v2537_v26, %v2534_v25  ;;  %v2598_v21 = vshll.u32 %v6903_v13, 16  ;;  %v6905_v25 = vld [vmem:[%s7072_s24 + $0x78] sm:$0xff]  }
  0x81   : > { %v2547_v42 = vor.u32 %v2546_v34, %v2543_v33  ;;  %v2552_v50 = vrot.slane %v2550_v38, 1  ;;  %v1965_v34 = vrot.slane %v6899_v22, 1 }
  0x82   : > { %v2539_v49 = vsel %vm2477_vm3, %v2529_v19, %v2538_v39  ;;  %v2600_v33 = vrot.slane %v2598_v21, 2 }
  0x83   : > { %v2548_v55 = vsel %vm2477_vm3, %v2538_v39, %v2547_v42 }
  0x85   : > { %6490 = vmatmul.mubr.msk.bf16.gmra.mxu0 %vm340_vm0, %v1435_v45  ;;  %6502 = vmatmul.mubr.msk.bf16.vlgmr.msra.gmra.mxu1 %vm340_vm0, %v1942_v46  ;;  %v7356_v45 = vld [vmem:[%s8236_s1 + $0xf8] sm:$0xff]  }
  0x86   : > { %6582 = vmatpush3.bf16.msra.mxu1 %v7229_v24  ;;  %6505 = vmatprep.mubr.msk.bf16.mxu1 %vm340_vm0, %v1944_v51  ;;  %v2519_v24 = vrot.slane %v2517_v57, 2  ;;  %v6889_v46 = vld [vmem:[%s7072_s24 + $0x58] sm:$0xff]   ;;  %v2555_v51 = vrot.slane %v2553_v40, 2  ;;  %v2564_v57 = vrot.slane %v2562_v44, 2  ;;  %v6909_v44 = vld [vmem:[%s7072_s24 + $0x88] sm:$0xff]  }
  0x87   : > { %6545 = vmatprep.mubr.msk.bf16.mxu0 %vm340_vm0, %v2494_v53  ;;  %6583 = vmatprep.subr.bf16.mxu1 %v6881_v52  ;;  %v6898_v53 = vld [vmem:[%s7072_s24 + $0x60] sm:$0xff]   ;;  %v1957_v61 = vrot.slane %v6889_v46, 1 }
  0x88   : > { %v2520_v17 = vor.u32 %v2519_v24, %v2516_v2  ;;  %v2556_v62 = vor.u32 %v2555_v51, %v2552_v50  ;;  %v2565_v1 = vor.u32 %v2564_v57, %v2561_v56  ;;  %v2580_v2 = vshll.u32 %v6898_v53, 16  ;;  %v6894_v24 = vld [vmem:[%s7072_s24 + $0x68] sm:$0xff]  }
  0x89   : > { %v1961_v14 = vrot.slane %v6894_v24, 1  ;;  %v2622_v56 = vshrl.u32 %v6909_v44, 16  ;;  %v2625_v57 = vshll.u32 %v6909_v44, 16  ;;  %v6914_v24 = vld [vmem:[%s7072_s24 + $0x98] ss:$0 sps:$4 sm:$0x33]  }
  0x8a   : > { %6584 = vmatpush3.bf16.msra.mxu1 %v6881_v52  ;;  %v2521_v30 = vsel %vm2477_vm3, %v2511_v0, %v2520_v17  ;;  %v2530_v32 = vsel %vm2477_vm3, %v2520_v17, %v2529_v19  ;;  %v6892_v52 = vld [vmem:[%s7072_s24 + $0x60] sm:$0xff]   ;;  %v2557_v7 = vsel %vm2477_vm3, %v2547_v42, %v2556_v62  ;;  %v2566_v11 = vsel %vm2477_vm3, %v2556_v62, %v2565_v1  ;;  %v6904_v42 = vld [vmem:[%s7072_s24 + $0x88] sm:$0xff]  }
  0x8b   : > { %6585 = vmatprep.subr.bf16.mxu1 %v6891_v63  ;;  %v1959_v0 = vrot.slane %v6892_v52, 1  ;;  %v2575_v27 = vsel %vm2477_vm3, %v2565_v1, %v2574_v16  ;;  %v1969_v58 = vrot.slane %v6904_v42, 1  ;;  %v2627_v3 = vrot.slane %v2625_v57, 2  ;;  %v6924_v42 = vld [vmem:[%s7072_s24 + $0x28] sm:$0xff]  }
  0x8d   : > { %6506 = vmatmul.mubr.msk.bf16.gmra.mxu1 %vm340_vm0, %v1946_v5  ;;  %6546 = vmatmul.mubr.msk.bf16.vlgmr.msra.gmra.mxu0 %vm340_vm0, %v2503_v6  ;;  %v6900_v5 = vld [vmem:[%s7072_s24 + $0x68] sm:$0xff]   ;;  %v1960_v10 = vsel %vm1398_vm2, %v1957_v61, %v1959_v0  ;;  %v1962_v26 = vsel %vm1398_vm2, %v1959_v0, %v1961_v14 }
  0x8e   : > { %6626 = vmatpush3.bf16.msra.mxu0 %v7247_v43  ;;  %6509 = vmatprep.mubr.msk.bf16.mxu1 %vm340_vm0, %v1948_v9  ;;  %v7337_v43 = vld [vmem:[%s7072_s24 + $0x50] sm:$0xff]   ;;  %v2589_v18 = vshll.u32 %v6900_v5, 16 }
  0x8f   : > { %6549 = vmatprep.mubr.msk.bf16.mxu0 %vm340_vm0, %v2512_v12  ;;  %6627 = vmatprep.subr.bf16.mxu0 %v6886_v8  ;;  %v1955_v37 = vrot.slane %v7337_v43, 1  ;;  %v2582_v12 = vrot.slane %v2580_v2, 2  ;;  %v6902_v43 = vld [vmem:[%s7072_s24 + $0x80] sm:$0xff]   ;;  %v2624_v2 = vrot.slane %v2622_v56, 1  ;;  %v6932_v56 = vld [vmem:[%s8236_s1 + $0x110] sm:$0xff]  }
  0x90   : > { %6586 = vmatpush3.bf16.msra.mxu1 %v6891_v63  ;;  %v2577_v63 = vshrl.u32 %v6898_v53, 16  ;;  %v2591_v28 = vrot.slane %v2589_v18, 2  ;;  %v1967_v39 = vrot.slane %v6902_v43, 1  ;;  %v3152_v18 = vrot.slane %v6913_v4, 2  ;;  %v6917_v43 = vld [vmem:[%s7072_s24 + $0x20] sm:$0xff]  }
  0x91   : > { %6587 = vmatprep.subr.bf16.mxu1 %v6901_v15  ;;  %v1956_v54 = vsel %vm1398_vm2, %v1953_v36, %v1955_v37  ;;  %v1958_v6 = vsel %vm1398_vm2, %v1955_v37, %v1957_v61  ;;  %v2607_v37 = vshll.u32 %v6905_v25, 16  ;;  %v1971_v61 = vrot.slane %v6906_v47, 1 }
  0x92   : > { %6628 = vmatpush3.bf16.msra.mxu0 %v6886_v8  ;;  %v6897_v8 = vld [vmem:[%s7072_s24 + $0x70] sm:$0xff]   ;;  %v2579_v9 = vrot.slane %v2577_v63, 1  ;;  %v1968_v52 = vsel %vm1398_vm2, %v1965_v34, %v1967_v39  ;;  %v6908_v63 = vld [vmem:[%s7072_s24 + $0x98] ss:$0 sps:$4 sm:$0x11]   ;;  %v2628_v13 = vor.u32 %v2627_v3, %v2624_v2 }
  0x93   : > { %6629 = vmatprep.subr.bf16.mxu0 %v6896_v23  ;;  %v1963_v17 = vrot.slane %v6897_v8, 1  ;;  %v2609_v50 = vrot.slane %v2607_v37, 2  ;;  %v1972_v8 = vsel %vm1398_vm2, %v1969_v58, %v1971_v61  ;;  %v7483_v3 = vld [vmem:[%s7072_s24 + $0x50] sm:$0xff]  }
  0x94   : > { %6588 = vmatpush3.bf16.msra.mxu1 %v6901_v15  ;;  %v2586_v15 = vshrl.u32 %v6900_v5, 16  ;;  %v2583_v19 = vor.u32 %v2582_v12, %v2579_v9  ;;  %v1970_v5 = vsel %vm1398_vm2, %v1967_v39, %v1969_v58  ;;  %v1973_v12 = vrot.slane %v6908_v63, 1 }
  0x95   : > { %6510 = vmatmul.mubr.msk.bf16.gmra.mxu1 %vm340_vm0, %v1950_v29  ;;  %6550 = vmatmul.mubr.msk.bf16.gmra.mxu0 %vm340_vm0, %v2521_v30  ;;  %v6907_v29 = vld [vmem:[%s7072_s24 + $0x80] sm:$0xff]   ;;  %v1964_v30 = vsel %vm1398_vm2, %v1961_v14, %v1963_v17  ;;  %v2640_v14 = vshrl.u32 %v6914_v24, 16 }
  0x96   : > { %6513 = vmatprep.mubr.msk.bf16.mxu1 %vm340_vm0, %v1952_v31  ;;  %6553 = vmatprep.mubr.msk.bf16.mxu0 %vm340_vm0, %v2530_v32  ;;  %v2584_v31 = vsel %vm2477_vm3, %v2574_v16, %v2583_v19  ;;  %v2597_v32 = vrot.slane %v2595_v20, 1  ;;  %v2613_v38 = vshrl.u32 %v6907_v29, 16  ;;  %v2616_v41 = vshll.u32 %v6907_v29, 16 }
  0x97   : > { %6630 = vmatpush3.bf16.msra.mxu0 %v6896_v23  ;;  %6669 = vmatprep.subr.bf16.mxu1 %v7356_v45  ;;  %v2588_v23 = vrot.slane %v2586_v15, 1  ;;  %v2643_v15 = vshll.u32 %v6914_v24, 16  ;;  %v1974_v20 = vsel %vm1398_vm2, %v1971_v61, %v1973_v12  ;;  %v2642_v22 = vrot.slane %v2640_v14, 1  ;;  %v6931_v24 = vld [vmem:[%s7072_s24 + $0x40] sm:$0xff]  }
  0x98   : > { %6631 = vmatprep.subr.bf16.mxu0 %v6910_v35  ;;  %v2601_v40 = vor.u32 %v2600_v33, %v2597_v32  ;;  %v2615_v51 = vrot.slane %v2613_v38, 1  ;;  %v6923_v38 = vld [vmem:[%s7072_s24 + $0x30] sm:$0xff]   ;;  %v3168_v14 = vrot.slane %v7483_v3, 2  ;;  %v7558_v3 = vld [vmem:[%s7072_s24 + $0x78] sm:$0xff]  }
  0x99   : > { %v2592_v36 = vor.u32 %v2591_v28, %v2588_v23  ;;  %v2645_v23 = vrot.slane %v2643_v15, 2  ;;  %v6918_v28 = vld [vmem:[%s7072_s24 + $0x10] sm:$0xfc]   ;;  %v3160_v47 = vrot.slane %v6923_v38, 2  ;;  %v6940_v38 = vld [vmem:[%s7072_s24 + $0x68] sm:$0xff]  }
  0x9a   : > { %v3690_v32 = vrot.slane %v6918_v28, 2 }
  0x9b   : > { %6632 = vmatpush3.bf16.msra.mxu0 %v6910_v35  ;;  %v2604_v35 = vshrl.u32 %v6905_v25, 16  ;;  %v2602_v53 = vsel %vm2477_vm3, %v2592_v36, %v2601_v40  ;;  %v6919_v25 = vld [vmem:[%s7072_s24 + $0x18] sm:$0xff]   ;;  %v2646_v29 = vor.u32 %v2645_v23, %v2642_v22  ;;  %v7510_v22 = vld [vmem:[%s7072_s24 + $0x60] sm:$0xff]  }
  0x9c   : > { %6713 = vmatprep.subr.bf16.mxu0 %v7372_v60  ;;  %v3691_v33 = vrot.slane %v6919_v25, 2 }
  0x9d   : > { %6514 = vmatmul.mubr.msk.bf16.gmra.mxu1 %vm340_vm0, %v1954_v48  ;;  %6554 = vmatmul.mubr.msk.bf16.gmra.mxu0 %vm340_vm0, %v2539_v49  ;;  %v2606_v46 = vrot.slane %v2604_v35, 1  ;;  %v1966_v48 = vsel %vm1398_vm2, %v1963_v17, %v1965_v34  ;;  %v2593_v49 = vsel %vm2477_vm3, %v2583_v19, %v2592_v36  ;;  %v6915_v19 = vld [vmem:[%s7072_s24 + $0x18] sm:$0xff]   ;;  %v6920_v34 = vld [vmem:[%s7072_s24 + $0x28] sm:$0xff]   ;;  %v6921_v35 = vld [vmem:[%s7072_s24 + $0x20] sm:$0xff]  }
  0x9e   : > { %6517 = vmatprep.mubr.msk.bf16.mxu1 %vm340_vm0, %v1956_v54  ;;  %6557 = vmatprep.mubr.msk.bf16.mxu0 %vm340_vm0, %v2548_v55  ;;  %v2618_v54 = vrot.slane %v2616_v41, 2  ;;  %v6911_v55 = vld [vmem:[%s7072_s24 + $0x90] sm:$0xff]   ;;  %v3692_v41 = vsel %vm3150_vm4, %v3690_v32, %v3691_v33  ;;  %v3158_v44 = vrot.slane %v6920_v34, 2  ;;  %v3172_v34 = vrot.slane %v7510_v22, 2 }
  0x9f   : > { %v2610_v59 = vor.u32 %v2609_v50, %v2606_v46  ;;  %v2631_v0 = vshrl.u32 %v6911_v55, 16  ;;  %v2634_v1 = vshll.u32 %v6911_v55, 16  ;;  %v3693_v46 = vrot.slane %v6921_v35, 2  ;;  %v6925_v50 = vld [vmem:[%s7072_s24 + $0x38] sm:$0xff]  }
  0xa0   : > { %v2619_v62 = vor.u32 %v2618_v54, %v2615_v51  ;;  %v6926_v51 = vld [vmem:[%s7072_s24 + $0x30] sm:$0xff]   ;;  %v3161_v54 = vsel %vm3150_vm4, %v3158_v44, %v3160_v47  ;;  %v6929_v55 = vld [vmem:[%s7072_s24 + $0x38] sm:$0xff]   ;;  %v3162_v58 = vrot.slane %v6925_v50, 2 }
  0xa1   : > { %v3697_v61 = vrot.slane %v6926_v51, 2  ;;  %v3699_v63 = vrot.slane %v6929_v55, 2 }
  0xa2   : > { %v2620_v9 = vsel %vm2477_vm3, %v2610_v59, %v2619_v62  ;;  %v2629_v21 = vsel %vm2477_vm3, %v2619_v62, %v2628_v13  ;;  %v3163_v2 = vsel %vm3150_vm4, %v3160_v47, %v3162_v58 }
  0xa5   : > { %6518 = vmatmul.mubr.msk.bf16.gmra.mxu1 %vm340_vm0, %v1958_v6  ;;  %6558 = vmatmul.mubr.msk.bf16.gmra.mxu0 %vm340_vm0, %v2557_v7  ;;  %v2611_v6 = vsel %vm2477_vm3, %v2601_v40, %v2610_v59  ;;  %v6912_v7 = vld [vmem:[%s7072_s24 + $0x8] sm:$0xfc]   ;;  %v6927_v40 = vld [vmem:[%s8236_s1 + $0xf0] sm:$0xff]   ;;  %v6947_v59 = vld [vmem:[%s8236_s1 + $0xe0] sm:$0xff]  }
  0xa6   : > { %6521 = vmatprep.mubr.msk.bf16.mxu1 %vm340_vm0, %v1960_v10  ;;  %6561 = vmatprep.mubr.msk.bf16.mxu0 %vm340_vm0, %v2566_v11  ;;  %v2633_v10 = vrot.slane %v2631_v0, 1  ;;  %v2636_v11 = vrot.slane %v2634_v1, 2  ;;  %v3151_v17 = vrot.slane %v6912_v7, 2  ;;  %v6942_v0 = vld [vmem:[%s8236_s1 + $0x108] sm:$0xff]   ;;  %v6956_v7 = vld [vmem:[%s8236_s1 + $0x100] sm:$0xff]  }
  0xa7   : > { %v6930_v1 = vld [vmem:[%s7072_s24 + $0x48] sm:$0xff]  }
  0xa8   : > { %v2637_v16 = vor.u32 %v2636_v11, %v2633_v10  ;;  %v3166_v10 = vrot.slane %v6930_v1, 2  ;;  %v3701_v11 = vrot.slane %v6931_v24, 2  ;;  %v7555_v24 = vld [vmem:[%s7072_s24 + $0x80] sm:$0xff]  }
  0xaa   : > { %v2647_v36 = vsel %vm2477_vm3, %v2637_v16, %v2646_v29  ;;  %v3169_v25 = vsel %vm3150_vm4, %v3166_v10, %v3168_v14 }
  0xad   : > { %6522 = vmatmul.mubr.msk.bf16.gmra.mxu1 %vm340_vm0, %v1962_v26  ;;  %6562 = vmatmul.mubr.msk.bf16.gmra.mxu0 %vm340_vm0, %v2575_v27  ;;  %v2638_v26 = vsel %vm2477_vm3, %v2628_v13, %v2637_v16  ;;  %v3153_v27 = vsel %vm3150_vm4, %v3151_v17, %v3152_v18 }
  0xae   : > { %6525 = vmatprep.mubr.msk.bf16.mxu1 %vm340_vm0, %v1964_v30  ;;  %6565 = vmatprep.mubr.msk.bf16.mxu0 %vm340_vm0, %v2584_v31  ;;  %v3154_v30 = vrot.slane %v6915_v19, 2  ;;  %v3156_v31 = vrot.slane %v6917_v43, 2 }
  0xb0   : > { %v3155_v37 = vsel %vm3150_vm4, %v3152_v18, %v3154_v30  ;;  %v3157_v39 = vsel %vm3150_vm4, %v3154_v30, %v3156_v31  ;;  %v6935_v18 = vld [vmem:[%s7072_s24 + $0x58] sm:$0xff]  }
  0xb1   : > { %v3170_v30 = vrot.slane %v6935_v18, 2  ;;  %v7579_v18 = vld [vmem:[%s7072_s24 + $0x90] sm:$0xff]  }
  0xb5   : > { %6526 = vmatmul.mubr.msk.bf16.gmra.mxu1 %vm340_vm0, %v1966_v48  ;;  %6566 = vmatmul.mubr.msk.bf16.gmra.mxu0 %vm340_vm0, %v2593_v49  ;;  %v6937_v48 = vld [vmem:[%s8236_s1 + $0xe8] sm:$0xff]   ;;  %v3695_v49 = vrot.slane %v6924_v42, 2 }
  0xb6   : > { %6529 = vmatprep.mubr.msk.bf16.mxu1 %vm340_vm0, %v1968_v52  ;;  %6569 = vmatprep.mubr.msk.bf16.mxu0 %vm340_vm0, %v2602_v53  ;;  %v3159_v52 = vsel %vm3150_vm4, %v3156_v31, %v3158_v44  ;;  %v6928_v53 = vld [vmem:[%s7072_s24 + $0x40] sm:$0xff]  }
  0xb7   : > { %v3696_v57 = vsel %vm3150_vm4, %v3693_v46, %v3695_v49  ;;  %v3164_v62 = vrot.slane %v6928_v53, 2 }
  0xb9   : > { %v3165_v4 = vsel %vm3150_vm4, %v3162_v58, %v3164_v62  ;;  %v3167_v19 = vsel %vm3150_vm4, %v3164_v62, %v3166_v10  ;;  %v6945_v62 = vld [vmem:[%s7072_s24 + $0x78] sm:$0xff]   ;;  %v3180_v10 = vrot.slane %v7555_v24, 2 }
  0xbd   : > { %6530 = vmatmul.mubr.msk.bf16.gmra.mxu1 %vm340_vm0, %v1970_v5  ;;  %6570 = vmatmul.mubr.msk.bf16.gmra.mxu0 %vm340_vm0, %v2611_v6  ;;  %v3700_v5 = vsel %vm3150_vm4, %v3697_v61, %v3699_v63  ;;  %v7488_v6 = vld [vmem:[%s7072_s24 + $0x48] sm:$0xff]  }
  0xbe   : > { %6533 = vmatprep.mubr.msk.bf16.mxu1 %vm340_vm0, %v1972_v8  ;;  %6573 = vmatprep.mubr.msk.bf16.mxu0 %vm340_vm0, %v2620_v9  ;;  %v3703_v15 = vrot.slane %v7488_v6, 2  ;;  %v3178_v6 = vrot.slane %v6945_v62, 2 }
  0xc0   : > { %v3181_v22 = vsel %vm3150_vm4, %v3178_v6, %v3180_v10 }
  0xc5   : > { %6534 = vmatmul.mubr.msk.bf16.gmra.mxu1 %vm340_vm0, %v1974_v20  ;;  %6574 = vmatmul.mubr.msk.bf16.gmra.mxu0 %vm340_vm0, %v2629_v21  ;;  %v3702_v20 = vsel %vm3150_vm4, %v3699_v63, %v3701_v11  ;;  %v6936_v21 = vld [vmem:[%s7072_s24 + $0x50] sm:$0xff]  }
  0xc6   : > { %6577 = vmatprep.mubr.msk.bf16.mxu0 %vm340_vm0, %v2638_v26  ;;  %6589 = vmatprep.mubr.msk.bf16.mxu1 %vm340_vm0, %v3153_v27  ;;  %v3704_v26 = vsel %vm3150_vm4, %v3701_v11, %v3703_v15  ;;  %v6939_v27 = vld [vmem:[%s7072_s24 + $0x58] sm:$0xff]   ;;  %v3705_v31 = vrot.slane %v6936_v21, 2  ;;  %v6946_v63 = vld [vmem:[%s7072_s24 + $0x70] sm:$0xff]   ;;  %v3715_v11 = vrot.slane %v7558_v3, 2 }
  0xc7   : > { %v3707_v35 = vrot.slane %v6939_v27, 2 }
  0xc9   : > { %v3708_v47 = vsel %vm3150_vm4, %v3705_v31, %v3707_v35 }
  0xcd   : > { %6578 = vmatmul.mubr.msk.bf16.gmra.mxu0 %vm340_vm0, %v2647_v36  ;;  %6590 = vmatmul.mubr.msk.bf16.vlgmr.msra.gmra.mxu1 %vm340_vm0, %v3155_v37 }
  0xce   : > { %6670 = vmatpush3.bf16.msra.mxu1 %v7356_v45  ;;  %6593 = vmatprep.mubr.msk.bf16.mxu1 %vm340_vm0, %v3157_v39  ;;  %v3694_v45 = vsel %vm3150_vm4, %v3691_v33, %v3693_v46  ;;  %v3171_v39 = vsel %vm3150_vm4, %v3168_v14, %v3170_v30  ;;  %v3173_v46 = vsel %vm3150_vm4, %v3170_v30, %v3172_v34  ;;  %v6950_v14 = vld [vmem:[%s7072_s24 + $0x88] sm:$0xff]  }
  0xcf   : > { %6633 = vmatprep.mubr.msk.bf16.mxu0 %vm340_vm0, %v3692_v41  ;;  %6671 = vmatprep.subr.bf16.mxu1 %v6927_v40  ;;  %v6941_v41 = vld [vmem:[%s7072_s24 + $0x60] sm:$0xff]  }
  0xd2   : > { %6672 = vmatpush3.bf16.msra.mxu1 %v6927_v40  ;;  %v3706_v40 = vsel %vm3150_vm4, %v3703_v15, %v3705_v31 }
  0xd3   : > { %6673 = vmatprep.subr.bf16.mxu1 %v6937_v48 }
  0xd5   : > { %6594 = vmatmul.mubr.msk.bf16.gmra.mxu1 %vm340_vm0, %v3159_v52  ;;  %6634 = vmatmul.mubr.msk.bf16.vlgmr.msra.gmra.mxu0 %vm340_vm0, %v3694_v45  ;;  %v3174_v52 = vrot.slane %v6940_v38, 2  ;;  %v3709_v45 = vrot.slane %v6941_v41, 2 }
  0xd6   : > { %6714 = vmatpush3.bf16.msra.mxu0 %v7372_v60  ;;  %6597 = vmatprep.mubr.msk.bf16.mxu1 %vm340_vm0, %v3161_v54  ;;  %v3698_v60 = vsel %vm3150_vm4, %v3695_v49, %v3697_v61  ;;  %v6944_v49 = vld [vmem:[%s7072_s24 + $0x68] sm:$0xff]  }
  0xd7   : > { %6637 = vmatprep.mubr.msk.bf16.mxu0 %vm340_vm0, %v3696_v57  ;;  %6715 = vmatprep.subr.bf16.mxu0 %v6932_v56  ;;  %v3710_v61 = vsel %vm3150_vm4, %v3707_v35, %v3709_v45 }
  0xd8   : > { %6674 = vmatpush3.bf16.msra.mxu1 %v6937_v48  ;;  %v6943_v48 = vld [vmem:[%s7072_s24 + $0x70] sm:$0xff]  }
  0xd9   : > { %6675 = vmatprep.subr.bf16.mxu1 %v6947_v59  ;;  %v3176_v55 = vrot.slane %v6943_v48, 2  ;;  %v6954_v48 = vld [vmem:[%s7072_s24 + $0x98] ss:$0 sps:$4 sm:$0x33]  }
  0xda   : > { %6716 = vmatpush3.bf16.msra.mxu0 %v6932_v56  ;;  %v3711_v56 = vrot.slane %v6944_v49, 2  ;;  %v7602_v49 = vld [vmem:[%s7072_s24 + $0x90] sm:$0xff]   ;;  %v3186_v24 = vrot.slane %v6954_v48, 2 }
  0xdb   : > { %6717 = vmatprep.subr.bf16.mxu0 %v6942_v0  ;;  %v3179_v15 = vsel %vm3150_vm4, %v3176_v55, %v3178_v6  ;;  %v3721_v3 = vrot.slane %v7602_v49, 2 }
  0xdc   : > { %6676 = vmatpush3.bf16.msra.mxu1 %v6947_v59  ;;  %v3175_v59 = vsel %vm3150_vm4, %v3172_v34, %v3174_v52 }
  0xdd   : > { %v6371_v8 = vpop.f32.mrf.mxu0  ;;  %v6391_v9 = vpop.f32.mrf.mxu1  ;;  %6598 = vmatmul.mubr.msk.bf16.gmra.mxu1 %vm340_vm0, %v3163_v2  ;;  %6638 = vmatmul.mubr.msk.bf16.gmra.mxu0 %vm340_vm0, %v3698_v60  ;;  %v3177_v2 = vsel %vm3150_vm4, %v3174_v52, %v3176_v55  ;;  %v3712_v60 = vsel %vm3150_vm4, %v3709_v45, %v3711_v56 }
  0xde   : > { %574 = vst.msk [vmem:[#allocation2 + $0x10] sm:$0xff] %vm340_vm0, %v6371_v8  ;;  %594 = vst.msk [vmem:[#allocation2 + $0xb0] sm:$0xff] %vm340_vm0, %v6391_v9  ;;  %6601 = vmatprep.mubr.msk.bf16.mxu1 %vm340_vm0, %v3165_v4  ;;  %6641 = vmatprep.mubr.msk.bf16.mxu0 %vm340_vm0, %v3700_v5 }
  0xdf   : > { %v429_v12 = vpop.f32.mrf.mxu0  ;;  %v509_v13 = vpop.f32.mrf.mxu1  ;;  %6718 = vmatpush3.bf16.msra.mxu0 %v6942_v0 }
  0xe0   : > { %572 = vst.msk [vmem:[#allocation2] sm:$0xff] %vm340_vm0, %v429_v12  ;;  %592 = vst.msk [vmem:[#allocation2 + $0xa0] sm:$0xff] %vm340_vm0, %v509_v13  ;;  %6719 = vmatprep.subr.bf16.mxu0 %v6956_v7 }
  0xe1   : > { %v6372_v16 = vpop.f32.mrf.mxu0  ;;  %v6392_v17 = vpop.f32.mrf.mxu1 }
  0xe2   : > { %575 = vst.msk [vmem:[#allocation2 + $0x18] sm:$0xff] %vm340_vm0, %v6372_v16  ;;  %595 = vst.msk [vmem:[#allocation2 + $0xb8] sm:$0xff] %vm340_vm0, %v6392_v17  ;;  %v6951_v17 = vld [vmem:[%s7072_s24 + $0x80] sm:$0xff]  }
  0xe3   : > { %v432_v23 = vpop.f32.mrf.mxu0  ;;  %v512_v43 = vpop.f32.mrf.mxu1  ;;  %6720 = vmatpush3.bf16.msra.mxu0 %v6956_v7  ;;  %v3713_v7 = vrot.slane %v6946_v63, 2  ;;  %v3717_v31 = vrot.slane %v6951_v17, 2  ;;  %v6962_v63 = vld [vmem:[%s7072_s24 + $0x28] sm:$0xff]  }
  0xe4   : > { %573 = vst.msk [vmem:[#allocation2 + $0x8] sm:$0xff] %vm340_vm0, %v432_v23  ;;  %593 = vst.msk [vmem:[#allocation2 + $0xa8] sm:$0xff] %vm340_vm0, %v512_v43  ;;  %v6958_v43 = vld [vmem:[%s7072_s24 + $0x10] sm:$0xfc]  }
  0xe5   : > { %v6375_v28 = vpop.f32.mrf.mxu0  ;;  %v6395_v29 = vpop.f32.mrf.mxu1  ;;  %6602 = vmatmul.mubr.msk.bf16.gmra.mxu1 %vm340_vm0, %v3167_v19  ;;  %6642 = vmatmul.mubr.msk.bf16.gmra.mxu0 %vm340_vm0, %v3702_v20  ;;  %v3714_v16 = vsel %vm3150_vm4, %v3711_v56, %v3713_v7  ;;  %v7582_v19 = vld [vmem:[%s7072_s24 + $0x88] sm:$0xff]   ;;  %v3716_v23 = vsel %vm3150_vm4, %v3713_v7, %v3715_v11  ;;  %v4234_v38 = vshll.u32 %v6958_v43, 16 }
  0xe6   : > { %578 = vst.msk [vmem:[#allocation2 + $0x30] sm:$0xff] %vm340_vm0, %v6375_v28  ;;  %598 = vst.msk [vmem:[#allocation2 + $0xd0] sm:$0xff] %vm340_vm0, %v6395_v29  ;;  %6605 = vmatprep.mubr.msk.bf16.mxu1 %vm340_vm0, %v3169_v25  ;;  %6645 = vmatprep.mubr.msk.bf16.mxu0 %vm340_vm0, %v3704_v26  ;;  %v6959_v25 = vld [vmem:[%s7072_s24 + $0x18] sm:$0xff]   ;;  %v1153_v28 = vld [vmem:[#allocation2 + $0x10] sm:$0xff]  ;;  %v3182_v29 = vrot.slane %v6950_v14, 2  ;;  %v4257_v14 = vshrl.u32 %v6962_v63, 16 }
  0xe7   : > { %v445_v32 = vpop.f32.mrf.mxu0  ;;  %v525_v33 = vpop.f32.mrf.mxu1 }
  0xe8   : > { %576 = vst.msk [vmem:[#allocation2 + $0x20] sm:$0xff] %vm340_vm0, %v445_v32  ;;  %596 = vst.msk [vmem:[#allocation2 + $0xc0] sm:$0xff] %vm340_vm0, %v525_v33  ;;  %v3184_v32 = vrot.slane %v7579_v18, 2  ;;  %v3719_v33 = vrot.slane %v7582_v19, 2 }
  0xe9   : > { %v6376_v36 = vpop.f32.mrf.mxu0  ;;  %v6396_v37 = vpop.f32.mrf.mxu1 }
  0xea   : > { %579 = vst.msk [vmem:[#allocation2 + $0x38] sm:$0xff] %vm340_vm0, %v6376_v36  ;;  %599 = vst.msk [vmem:[#allocation2 + $0xd8] sm:$0xff] %vm340_vm0, %v6396_v37  ;;  %v1151_v36 = vld [vmem:[#allocation2] sm:$0xff]  ;;  %v4231_v37 = vshrl.u32 %v6958_v43, 16  ;;  %v3185_v52 = vsel %vm3150_vm4, %v3182_v29, %v3184_v32  ;;  %v3720_v45 = vsel %vm3150_vm4, %v3717_v31, %v3719_v33 }
  0xeb   : > { %v448_v42 = vpop.f32.mrf.mxu0  ;;  %v528_v44 = vpop.f32.mrf.mxu1 }
  0xec   : > { %577 = vst.msk [vmem:[#allocation2 + $0x28] sm:$0xff] %vm340_vm0, %v448_v42  ;;  %597 = vst.msk [vmem:[#allocation2 + $0xc8] sm:$0xff] %vm340_vm0, %v528_v44 }
  0xed   : > { %v6379_v50 = vpop.f32.mrf.mxu0  ;;  %v6399_v51 = vpop.f32.mrf.mxu1  ;;  %6606 = vmatmul.mubr.msk.bf16.gmra.mxu1 %vm340_vm0, %v3171_v39  ;;  %6646 = vmatmul.mubr.msk.bf16.gmra.mxu0 %vm340_vm0, %v3706_v40  ;;  %v4239_v39 = vshrl.u32 %v6959_v25, 16  ;;  %v4242_v40 = vshll.u32 %v6959_v25, 16  ;;  %v3187_v25 = vsel %vm3150_vm4, %v3184_v32, %v3186_v24 }
  0xee   : > { %582 = vst.msk [vmem:[#allocation2 + $0x50] sm:$0xff] %vm340_vm0, %v6379_v50  ;;  %602 = vst.msk [vmem:[#allocation2 + $0xf0] sm:$0xff] %vm340_vm0, %v6399_v51  ;;  %6609 = vmatprep.mubr.msk.bf16.mxu1 %vm340_vm0, %v3173_v46  ;;  %6649 = vmatprep.mubr.msk.bf16.mxu0 %vm340_vm0, %v3708_v47  ;;  %v1154_v46 = vld [vmem:[#allocation2 + $0x18] sm:$0xff]  ;;  %v3183_v47 = vsel %vm3150_vm4, %v3180_v10, %v3182_v29  ;;  %v3718_v51 = vsel %vm3150_vm4, %v3715_v11, %v3717_v31 }
  0xef   : > { %v461_v53 = vpop.f32.mrf.mxu0  ;;  %v541_v54 = vpop.f32.mrf.mxu1  ;;  %v4244_v62 = vrot.slane %v4242_v40, 3  ;;  %v1155_v10 = vld [vmem:[#allocation2 + $0x20] sm:$0xff]  ;;  %v6967_v40 = vld [vmem:[%s7072_s24 + $0x38] sm:$0xff]  }
  0xf0   : > { %580 = vst.msk [vmem:[#allocation2 + $0x40] sm:$0xff] %vm340_vm0, %v461_v53  ;;  %600 = vst.msk [vmem:[#allocation2 + $0xe0] sm:$0xff] %vm340_vm0, %v541_v54  ;;  %v7614_v53 = vld [vmem:[%s7072_s24 + $0x98] sm:$0xff]   ;;  %v6961_v54 = vld [vmem:[%s7072_s24 + $0x20] sm:$0xff]  }
  0xf1   : > { %v6380_v57 = vpop.f32.mrf.mxu0  ;;  %v6400_v58 = vpop.f32.mrf.mxu1  ;;  %v4248_v6 = vshrl.u32 %v6961_v54, 16  ;;  %v4251_v7 = vshll.u32 %v6961_v54, 16 }
  0xf2   : > { %583 = vst.msk [vmem:[#allocation2 + $0x58] sm:$0xff] %vm340_vm0, %v6380_v57  ;;  %603 = vst.msk [vmem:[#allocation2 + $0xf8] sm:$0xff] %vm340_vm0, %v6400_v58  ;;  %v1152_v57 = vld [vmem:[#allocation2 + $0x8] sm:$0xff]  ;;  %v4233_v58 = vrot.slane %v4231_v37, 2 }
  0xf3   : > { %v464_v0 = vpop.f32.mrf.mxu0  ;;  %v544_v1 = vpop.f32.mrf.mxu1  ;;  %v4253_v31 = vrot.slane %v4251_v7, 3 }
  0xf4   : > { %581 = vst.msk [vmem:[#allocation2 + $0x48] sm:$0xff] %vm340_vm0, %v464_v0  ;;  %601 = vst.msk [vmem:[#allocation2 + $0xe8] sm:$0xff] %vm340_vm0, %v544_v1 }
  0xf5   : > { %v6383_v4 = vpop.f32.mrf.mxu0  ;;  %v6403_v5 = vpop.f32.mrf.mxu1  ;;  %6610 = vmatmul.mubr.msk.bf16.gmra.mxu1 %vm340_vm0, %v3175_v59  ;;  %6650 = vmatmul.mubr.msk.bf16.gmra.mxu0 %vm340_vm0, %v3710_v61  ;;  %v4236_v59 = vrot.slane %v4234_v38, 3  ;;  %v4241_v61 = vrot.slane %v4239_v39, 2  ;;  %v4259_v38 = vrot.slane %v4257_v14, 2  ;;  %v7680_v14 = vld [vmem:[%s7072_s24 + $0x28] sm:$0xff]  }
  0xf6   : > { %586 = vst.msk [vmem:[#allocation2 + $0x70] sm:$0xff] %vm340_vm0, %v6383_v4  ;;  %606 = vst.msk [vmem:[#allocation2 + $0x110] sm:$0xff] %vm340_vm0, %v6403_v5  ;;  %6613 = vmatprep.mubr.msk.bf16.mxu1 %vm340_vm0, %v3177_v2  ;;  %6653 = vmatprep.mubr.msk.bf16.mxu0 %vm340_vm0, %v3712_v60  ;;  %v1157_v2 = vld [vmem:[#allocation2 + $0x30] sm:$0xff]  ;;  %v3723_v5 = vrot.slane %v7614_v53, 2 }
  0xf7   : > { %v477_v8 = vpop.f32.mrf.mxu0  ;;  %v557_v9 = vpop.f32.mrf.mxu1 }
  0xf8   : > { %584 = vst.msk [vmem:[#allocation2 + $0x60] sm:$0xff] %vm340_vm0, %v477_v8  ;;  %604 = vst.msk [vmem:[#allocation2 + $0x100] sm:$0xff] %vm340_vm0, %v557_v9 }
  0xf9   : > { %v6384_v12 = vpop.f32.mrf.mxu0  ;;  %v6404_v13 = vpop.f32.mrf.mxu1 }
  0xfa   : > { %587 = vst.msk [vmem:[#allocation2 + $0x78] sm:$0xff] %vm340_vm0, %v6384_v12  ;;  %607 = vst.msk [vmem:[#allocation2 + $0x118] sm:$0xff] %vm340_vm0, %v6404_v13  ;;  %v4237_v12 = vor.u32 %v4236_v59, %v4233_v58  ;;  %v7627_v13 = vor.u32 %v4244_v62, %v4241_v61  ;;  %v1159_v58 = vld [vmem:[#allocation2 + $0x40] sm:$0xff] }
  0xfb   : > { %v480_v20 = vpop.f32.mrf.mxu0  ;;  %v560_v21 = vpop.f32.mrf.mxu1 }
  0xfc   : > { %585 = vst.msk [vmem:[#allocation2 + $0x68] sm:$0xff] %vm340_vm0, %v480_v20  ;;  %605 = vst.msk [vmem:[#allocation2 + $0x108] sm:$0xff] %vm340_vm0, %v560_v21  ;;  %v7631_v20 = vld [vmem:[%s7072_s24 + $0xa0] ss:$0 sps:$4 sm:$0x33]   ;;  %v4246_v37 = vsel %vm4229_vm5, %v4237_v12, %v7627_v13 }
  0xfd   : > { %v6387_v26 = vpop.f32.mrf.mxu0  ;;  %v6415_v27 = vpop.f32.mrf.mxu1  ;;  %6614 = vmatmul.mubr.msk.bf16.gmra.mxu1 %vm340_vm0, %v3179_v15  ;;  %6654 = vmatmul.mubr.msk.bf16.gmra.mxu0 %vm340_vm0, %v3714_v16  ;;  %v4260_v15 = vshll.u32 %v6962_v63, 16  ;;  %v3725_v49 = vrot.slane %v7631_v20, 2  ;;  %v4275_v63 = vshrl.u32 %v6967_v40, 16  ;;  %v1160_v20 = vld [vmem:[#allocation2 + $0x48] sm:$0xff] }
  0xfe   : > { %590 = vst.msk [vmem:[#allocation2 + $0x90] sm:$0xff] %vm340_vm0, %v6387_v26  ;;  %v1189_v30 = vadd.f32 %v6415_v27, %v1153_v28  ;;  %6617 = vmatprep.mubr.msk.bf16.mxu1 %vm340_vm0, %v3181_v22  ;;  %6657 = vmatprep.mubr.msk.bf16.mxu0 %vm340_vm0, %v3716_v23  ;;  %v1158_v23 = vld [vmem:[#allocation2 + $0x38] sm:$0xff]  ;;  %v3722_v26 = vsel %vm3150_vm4, %v3719_v33, %v3721_v3  ;;  %v6965_v27 = vld [vmem:[%s7072_s24 + $0x30] sm:$0xff]  }
  0xff   : > { %v493_v34 = vpop.f32.mrf.mxu0  ;;  %v1008_v35 = vpop.f32.mrf.mxu1  ;;  %v3724_v33 = vsel %vm3150_vm4, %v3721_v3, %v3723_v5  ;;  %v4262_v39 = vrot.slane %v4260_v15, 3  ;;  %v1162_v3 = vld [vmem:[#allocation2 + $0x58] sm:$0xff]  ;;  %v6969_v15 = vld [vmem:[%s7072_s24 + $0x40] sm:$0xff]   ;;  %v4277_v53 = vrot.slane %v4275_v63, 2 }
 0x100   : > { %1225 = vst.msk [vmem:[#allocation2 + $0x10] sm:$0xff] %vm340_vm0, %v1189_v30  ;;  %588 = vst.msk [vmem:[#allocation2 + $0x80] sm:$0xff] %vm340_vm0, %v493_v34  ;;  %v1187_v41 = vadd.f32 %v1151_v36, %v1008_v35  ;;  %v4250_v30 = vrot.slane %v4248_v6, 2  ;;  %v7643_v34 = vld [vmem:[%s7072_s24 + $0x10] sm:$0xf8]   ;;  %v7646_v35 = vld [vmem:[%s7072_s24 + $0x18] sm:$0xff]  }
 0x101   : > { %v6388_v42 = vpop.f32.mrf.mxu0  ;;  %v6416_v44 = vpop.f32.mrf.mxu1  ;;  %v1156_v36 = vld [vmem:[#allocation2 + $0x28] sm:$0xff]  ;;  %v7664_v61 = vor.u32 %v4262_v39, %v4259_v38  ;;  %v4904_v62 = vrot.slane %v7646_v35, 3 }
 0x102   : > { %1223 = vst.msk [vmem:[#allocation2] sm:$0xff] %vm340_vm0, %v1187_v41  ;;  %591 = vst.msk [vmem:[#allocation2 + $0x98] sm:$0xff] %vm340_vm0, %v6388_v42  ;;  %v1190_v50 = vadd.f32 %v6416_v44, %v1154_v46  ;;  %v4254_v54 = vor.u32 %v4253_v31, %v4250_v30 }
 0x103   : > { %v496_v55 = vpop.f32.mrf.mxu0  ;;  %v1011_v56 = vpop.f32.mrf.mxu1 }
 0x104   : > { %1226 = vst.msk [vmem:[#allocation2 + $0x18] sm:$0xff] %vm340_vm0, %v1190_v50  ;;  %589 = vst.msk [vmem:[#allocation2 + $0x88] sm:$0xff] %vm340_vm0, %v496_v55  ;;  %v1188_v0 = vadd.f32 %v1152_v57, %v1011_v56  ;;  %v4266_v50 = vshrl.u32 %v6965_v27, 16  ;;  %v4903_v55 = vrot.slane %v7643_v34, 3  ;;  %v4255_v12 = vsel %vm4229_vm5, %v7627_v13, %v4254_v54 }
 0x105   : > { %v6419_v1 = vpop.f32.mrf.mxu1  ;;  %v6459_v60 = vpop.f32.mrf.mxu0  ;;  %6618 = vmatmul.mubr.msk.bf16.gmra.mxu1 %vm340_vm0, %v3183_v47  ;;  %6658 = vmatmul.mubr.msk.bf16.gmra.mxu0 %vm340_vm0, %v3718_v51  ;;  %v1161_v47 = vld [vmem:[#allocation2 + $0x50] sm:$0xff]  ;;  %v4269_v51 = vshll.u32 %v6965_v27, 16 }
 0x106   : > { %1224 = vst.msk [vmem:[#allocation2 + $0x8] sm:$0xff] %vm340_vm0, %v1188_v0  ;;  %v1193_v4 = vadd.f32 %v6419_v1, %v1157_v2  ;;  %6621 = vmatprep.mubr.msk.bf16.mxu1 %vm340_vm0, %v3185_v52  ;;  %6661 = vmatprep.mubr.msk.bf16.mxu0 %vm340_vm0, %v3720_v45  ;;  %v4278_v0 = vshll.u32 %v6967_v40, 16  ;;  %v4268_v6 = vrot.slane %v4266_v50, 2  ;;  %v4908_v40 = vrot.slane %v7680_v14, 3 }
 0x107   : > { %v1693_v8 = vld [vmem:[#allocation2 + $0x10] sm:$0xff]  ;;  %v1024_v9 = vpop.f32.mrf.mxu1  ;;  %v1548_v11 = vpop.f32.mrf.mxu0  ;;  %v4271_v7 = vrot.slane %v4269_v51, 3 }
 0x108   : > { %1229 = vst.msk [vmem:[#allocation2 + $0x30] sm:$0xff] %vm340_vm0, %v1193_v4  ;;  %v1729_v16 = vadd.f32 %v6459_v60, %v1693_v8  ;;  %v1191_v17 = vadd.f32 %v1155_v10, %v1024_v9  ;;  %v7670_v8 = vld [vmem:[%s7072_s24 + $0x20] sm:$0xff]  }
 0x109   : > { %v1691_v21 = vld [vmem:[#allocation2] sm:$0xff]  ;;  %v6420_v22 = vpop.f32.mrf.mxu1  ;;  %v6460_v43 = vpop.f32.mrf.mxu0  ;;  %v4272_v30 = vor.u32 %v4271_v7, %v4268_v6  ;;  %v4906_v31 = vrot.slane %v7670_v8, 3  ;;  %v1169_v8 = vld [vmem:[#allocation2 + $0x90] sm:$0xff] }
 0x10a   : > { %1765 = vst.msk [vmem:[#allocation2 + $0x10] sm:$0xff] %vm340_vm0, %v1729_v16  ;;  %1227 = vst.msk [vmem:[#allocation2 + $0x20] sm:$0xff] %vm340_vm0, %v1191_v17  ;;  %v1727_v28 = vadd.f32 %v1691_v21, %v1548_v11  ;;  %v1194_v29 = vadd.f32 %v6420_v22, %v1158_v23  ;;  %v3726_v11 = vsel %vm3150_vm4, %v3723_v5, %v3725_v49  ;;  %v6971_v5 = vld [vmem:[%s7072_s24 + $0x48] sm:$0xff]   ;;  %v1166_v49 = vld [vmem:[#allocation2 + $0x78] sm:$0xff] }
 0x10b   : > { %v1694_v18 = vld [vmem:[#allocation2 + $0x18] sm:$0xff]  ;;  %v1027_v32 = vpop.f32.mrf.mxu1  ;;  %v1551_v19 = vpop.f32.mrf.mxu0  ;;  %v4264_v22 = vsel %vm4229_vm5, %v4254_v54, %v7664_v61  ;;  %v4905_v23 = vsel %vm4902_vm6, %v4903_v55, %v4904_v62  ;;  %v4273_v51 = vsel %vm4229_vm5, %v7664_v61, %v4272_v30 }
 0x10c   : > { %1763 = vst.msk [vmem:[#allocation2] sm:$0xff] %vm340_vm0, %v1727_v28  ;;  %1230 = vst.msk [vmem:[#allocation2 + $0x38] sm:$0xff] %vm340_vm0, %v1194_v29  ;;  %v1730_v41 = vadd.f32 %v6460_v43, %v1694_v18  ;;  %v1192_v42 = vadd.f32 %v1156_v36, %v1027_v32  ;;  %v4280_v43 = vrot.slane %v4278_v0, 3  ;;  %v1165_v28 = vld [vmem:[#allocation2 + $0x70] sm:$0xff]  ;;  %v4284_v32 = vshrl.u32 %v6969_v15, 16  ;;  %v1164_v0 = vld [vmem:[#allocation2 + $0x68] sm:$0xff] }
 0x10d   : > { %v1692_v44 = vld [vmem:[#allocation2 + $0x8] sm:$0xff]  ;;  %v6423_v46 = vpop.f32.mrf.mxu1  ;;  %v6463_v48 = vpop.f32.mrf.mxu0  ;;  %6622 = vmatmul.mubr.msk.bf16.gmra.mxu1 %vm340_vm0, %v3187_v25  ;;  %6662 = vmatmul.mubr.msk.bf16.gmra.mxu0 %vm340_vm0, %v3722_v26  ;;  %v4287_v36 = vshll.u32 %v6969_v15, 16 }
 0x10e   : > { %1766 = vst.msk [vmem:[#allocation2 + $0x18] sm:$0xff] %vm340_vm0, %v1730_v41  ;;  %1228 = vst.msk [vmem:[#allocation2 + $0x28] sm:$0xff] %vm340_vm0, %v1192_v42  ;;  %v1728_v52 = vadd.f32 %v1692_v44, %v1551_v19  ;;  %v1197_v45 = vadd.f32 %v6423_v46, %v1161_v47  ;;  %6665 = vmatprep.mubr.msk.bf16.mxu0 %vm340_vm0, %v3724_v33  ;;  %6677 = vmatprep.mubr.msk.bf16.mxu1 %vm340_vm0, %v4246_v37  ;;  %v1163_v37 = vld [vmem:[#allocation2 + $0x60] sm:$0xff]  ;;  %v4293_v41 = vshrl.u32 %v6971_v5, 16 }
 0x10f   : > { %v1697_v56 = vld [vmem:[#allocation2 + $0x30] sm:$0xff]  ;;  %v1040_v57 = vpop.f32.mrf.mxu1  ;;  %v1564_v59 = vpop.f32.mrf.mxu0  ;;  %v7698_v39 = vor.u32 %v4280_v43, %v4277_v53  ;;  %v4296_v42 = vshll.u32 %v6971_v5, 16 }
 0x110   : > { %1764 = vst.msk [vmem:[#allocation2 + $0x8] sm:$0xff] %vm340_vm0, %v1728_v52  ;;  %1233 = vst.msk [vmem:[#allocation2 + $0x50] sm:$0xff] %vm340_vm0, %v1197_v45  ;;  %v1733_v1 = vadd.f32 %v6463_v48, %v1697_v56  ;;  %v1195_v2 = vadd.f32 %v1159_v58, %v1040_v57  ;;  %v4907_v52 = vsel %vm4902_vm6, %v4904_v62, %v4906_v31  ;;  %v6973_v45 = vld [vmem:[%s7072_s24 + $0x50] sm:$0xff]   ;;  %v4286_v56 = vrot.slane %v4284_v32, 2 }
 0x111   : > { %v1695_v60 = vld [vmem:[#allocation2 + $0x20] sm:$0xff]  ;;  %v6424_v24 = vpop.f32.mrf.mxu1  ;;  %v6464_v4 = vpop.f32.mrf.mxu0  ;;  %v4289_v57 = vrot.slane %v4287_v36, 3  ;;  %v7712_v58 = vld [vmem:[%s7072_s24 + $0x30] sm:$0xff]   ;;  %v4282_v62 = vsel %vm4229_vm5, %v4272_v30, %v7698_v39 }
 0x112   : > { %1769 = vst.msk [vmem:[#allocation2 + $0x30] sm:$0xff] %vm340_vm0, %v1733_v1  ;;  %1231 = vst.msk [vmem:[#allocation2 + $0x40] sm:$0xff] %vm340_vm0, %v1195_v2  ;;  %v1731_v9 = vadd.f32 %v1695_v60, %v1564_v59  ;;  %v1198_v10 = vadd.f32 %v6424_v24, %v1162_v3  ;;  %v7715_v59 = vld [vmem:[%s7072_s24 + $0x38] sm:$0xff]   ;;  %v4909_v1 = vsel %vm4902_vm6, %v4906_v31, %v4908_v40  ;;  %v4295_v2 = vrot.slane %v4293_v41, 2 }
 0x113   : > { %v1698_v16 = vld [vmem:[#allocation2 + $0x38] sm:$0xff]  ;;  %v1043_v17 = vpop.f32.mrf.mxu1  ;;  %v1567_v21 = vpop.f32.mrf.mxu0  ;;  %v4298_v60 = vrot.slane %v4296_v42, 3  ;;  %v4912_v43 = vrot.slane %v7715_v59, 3 }
 0x114   : > { %1767 = vst.msk [vmem:[#allocation2 + $0x20] sm:$0xff] %vm340_vm0, %v1731_v9  ;;  %1234 = vst.msk [vmem:[#allocation2 + $0x58] sm:$0xff] %vm340_vm0, %v1198_v10  ;;  %v1734_v13 = vadd.f32 %v6464_v4, %v1698_v16  ;;  %v1196_v25 = vadd.f32 %v1160_v20, %v1043_v17  ;;  %v6975_v24 = vld [vmem:[%s7072_s24 + $0x58] sm:$0xff]   ;;  %v4302_v10 = vshrl.u32 %v6973_v45, 16  ;;  %v4290_v16 = vor.u32 %v4289_v57, %v4286_v56 }
 0x115   : > { %v1696_v26 = vld [vmem:[#allocation2 + $0x28] sm:$0xff]  ;;  %v6427_v27 = vpop.f32.mrf.mxu1  ;;  %v6467_v29 = vpop.f32.mrf.mxu0  ;;  %6666 = vmatmul.mubr.msk.bf16.gmra.mxu0 %vm340_vm0, %v3726_v11  ;;  %6678 = vmatmul.mubr.msk.bf16.vlgmr.msra.gmra.mxu1 %vm340_vm0, %v4255_v12  ;;  %v4305_v11 = vshll.u32 %v6973_v45, 16  ;;  %v4910_v17 = vrot.slane %v7712_v58, 3  ;;  %v7732_v53 = vor.u32 %v4298_v60, %v4295_v2  ;;  %v4311_v5 = vshrl.u32 %v6975_v24, 16  ;;  %v1173_v45 = vld [vmem:[#allocation2 + $0xb0] sm:$0xff] }
 0x116   : > { %1770 = vst.msk [vmem:[#allocation2 + $0x38] sm:$0xff] %vm340_vm0, %v1734_v13  ;;  %1232 = vst.msk [vmem:[#allocation2 + $0x48] sm:$0xff] %vm340_vm0, %v1196_v25  ;;  %v1732_v34 = vadd.f32 %v1696_v26, %v1567_v21  ;;  %v1201_v18 = vadd.f32 %v6427_v27, %v1165_v28  ;;  %6681 = vmatprep.mubr.msk.bf16.mxu1 %vm340_vm0, %v4264_v22  ;;  %6721 = vmatprep.mubr.msk.bf16.mxu0 %vm340_vm0, %v4905_v23  ;;  %v1167_v22 = vld [vmem:[#allocation2 + $0x80] sm:$0xff]  ;;  %v4314_v13 = vshll.u32 %v6975_v24, 16 }
 0x117   : > { %v1701_v19 = vld [vmem:[#allocation2 + $0x50] sm:$0xff]  ;;  %v1056_v33 = vpop.f32.mrf.mxu1  ;;  %v1580_v38 = vpop.f32.mrf.mxu0  ;;  %v4304_v31 = vrot.slane %v4302_v10, 2 }
 0x118   : > { %1768 = vst.msk [vmem:[#allocation2 + $0x28] sm:$0xff] %vm340_vm0, %v1732_v34  ;;  %1237 = vst.msk [vmem:[#allocation2 + $0x70] sm:$0xff] %vm340_vm0, %v1201_v18  ;;  %v1737_v44 = vadd.f32 %v6467_v29, %v1701_v19  ;;  %v1199_v46 = vadd.f32 %v1163_v37, %v1056_v33  ;;  %v1170_v29 = vld [vmem:[#allocation2 + $0x98] sm:$0xff]  ;;  %v4307_v34 = vrot.slane %v4305_v11, 3  ;;  %v7738_v18 = vld [vmem:[%s7072_s24 + $0x40] sm:$0xff]   ;;  %v4291_v19 = vsel %vm4229_vm5, %v7698_v39, %v4290_v16 }
 0x119   : > { %v1699_v47 = vld [vmem:[#allocation2 + $0x40] sm:$0xff]  ;;  %v6428_v48 = vpop.f32.mrf.mxu1  ;;  %v6468_v50 = vpop.f32.mrf.mxu0  ;;  %v4911_v33 = vsel %vm4902_vm6, %v4908_v40, %v4910_v17  ;;  %v7748_v37 = vld [vmem:[%s7072_s24 + $0x48] sm:$0xff]   ;;  %v4316_v39 = vrot.slane %v4314_v13, 3  ;;  %v4914_v56 = vrot.slane %v7738_v18, 3  ;;  %v1177_v18 = vld [vmem:[#allocation2 + $0xd0] sm:$0xff] }
 0x11a   : > { %1773 = vst.msk [vmem:[#allocation2 + $0x50] sm:$0xff] %vm340_vm0, %v1737_v44  ;;  %1235 = vst.msk [vmem:[#allocation2 + $0x60] sm:$0xff] %vm340_vm0, %v1199_v46  ;;  %v1735_v54 = vadd.f32 %v1699_v47, %v1580_v38  ;;  %v1202_v55 = vadd.f32 %v6428_v48, %v1166_v49  ;;  %v6977_v38 = vld [vmem:[%s7072_s24 + $0x60] sm:$0xff]   ;;  %v1168_v44 = vld [vmem:[#allocation2 + $0x88] sm:$0xff]  ;;  %v4300_v47 = vsel %vm4229_vm5, %v4290_v16, %v7732_v53  ;;  %v4313_v49 = vrot.slane %v4311_v5, 2 }
 0x11b   : > { %v1702_v63 = vld [vmem:[#allocation2 + $0x58] sm:$0xff]  ;;  %v1059_v61 = vpop.f32.mrf.mxu1  ;;  %v1583_v35 = vpop.f32.mrf.mxu0  ;;  %v4913_v48 = vsel %vm4902_vm6, %v4910_v17, %v4912_v43  ;;  %v4916_v60 = vrot.slane %v7748_v37, 3  ;;  %v1172_v13 = vld [vmem:[#allocation2 + $0xa8] sm:$0xff] }
 0x11c   : > { %1771 = vst.msk [vmem:[#allocation2 + $0x40] sm:$0xff] %vm340_vm0, %v1735_v54  ;;  %1238 = vst.msk [vmem:[#allocation2 + $0x78] sm:$0xff] %vm340_vm0, %v1202_v55  ;;  %v1738_v3 = vadd.f32 %v6468_v50, %v1702_v63  ;;  %v1200_v4 = vadd.f32 %v1164_v0, %v1059_v61  ;;  %v6979_v50 = vld [vmem:[%s7072_s24 + $0x68] sm:$0xff]   ;;  %v4308_v55 = vor.u32 %v4307_v34, %v4304_v31  ;;  %v4320_v63 = vshrl.u32 %v6977_v38, 16 }
 0x11d   : > { %v1700_v6 = vld [vmem:[#allocation2 + $0x48] sm:$0xff]  ;;  %v6431_v7 = vpop.f32.mrf.mxu1  ;;  %v6471_v9 = vpop.f32.mrf.mxu0  ;;  %6682 = vmatmul.mubr.msk.bf16.gmra.mxu1 %vm340_vm0, %v4273_v51  ;;  %6722 = vmatmul.mubr.msk.bf16.vlgmr.msra.gmra.mxu0 %vm340_vm0, %v4907_v52  ;;  %v4323_v61 = vshll.u32 %v6977_v38, 16  ;;  %v7766_v2 = vor.u32 %v4316_v39, %v4313_v49  ;;  %v4329_v24 = vshrl.u32 %v6979_v50, 16 }
 0x11e   : > { %1774 = vst.msk [vmem:[#allocation2 + $0x58] sm:$0xff] %vm340_vm0, %v1738_v3  ;;  %1236 = vst.msk [vmem:[#allocation2 + $0x68] sm:$0xff] %vm340_vm0, %v1200_v4  ;;  %v1736_v12 = vadd.f32 %v1700_v6, %v1583_v35  ;;  %v1205_v15 = vadd.f32 %v6431_v7, %v1169_v8  ;;  %6685 = vmatprep.mubr.msk.bf16.mxu1 %vm340_vm0, %v4282_v62  ;;  %6725 = vmatprep.mubr.msk.bf16.mxu0 %vm340_vm0, %v4909_v1  ;;  %v1171_v62 = vld [vmem:[#allocation2 + $0xa0] sm:$0xff]  ;;  %v4332_v3 = vshll.u32 %v6979_v50, 16 }
 0x11f   : > { %v1705_v20 = vld [vmem:[#allocation2 + $0x70] sm:$0xff]  ;;  %v1072_v21 = vpop.f32.mrf.mxu1  ;;  %v1596_v23 = vpop.f32.mrf.mxu0  ;;  %v4309_v11 = vsel %vm4229_vm5, %v7732_v53, %v4308_v55 }
 0x120   : > { %1772 = vst.msk [vmem:[#allocation2 + $0x48] sm:$0xff] %vm340_vm0, %v1736_v12  ;;  %1241 = vst.msk [vmem:[#allocation2 + $0x90] sm:$0xff] %vm340_vm0, %v1205_v15  ;;  %v1741_v25 = vadd.f32 %v6471_v9, %v1705_v20  ;;  %v1203_v26 = vadd.f32 %v1167_v22, %v1072_v21  ;;  %v1174_v9 = vld [vmem:[#allocation2 + $0xb8] sm:$0xff]  ;;  %v4915_v12 = vsel %vm4902_vm6, %v4912_v43, %v4914_v56  ;;  %v6981_v15 = vld [vmem:[%s7072_s24 + $0x70] sm:$0xff]   ;;  %v4322_v20 = vrot.slane %v4320_v63, 2 }
 0x121   : > { %v1703_v27 = vld [vmem:[#allocation2 + $0x60] sm:$0xff]  ;;  %v6432_v28 = vpop.f32.mrf.mxu1  ;;  %v6472_v30 = vpop.f32.mrf.mxu0  ;;  %v4325_v21 = vrot.slane %v4323_v61, 3  ;;  %v7780_v22 = vld [vmem:[%s7072_s24 + $0x50] sm:$0xff]   ;;  %v4318_v43 = vsel %vm4229_vm5, %v4308_v55, %v7766_v2 }
 0x122   : > { %1777 = vst.msk [vmem:[#allocation2 + $0x70] sm:$0xff] %vm340_vm0, %v1741_v25  ;;  %1239 = vst.msk [vmem:[#allocation2 + $0x80] sm:$0xff] %vm340_vm0, %v1203_v26  ;;  %v1739_v32 = vadd.f32 %v1703_v27, %v1596_v23  ;;  %v1206_v36 = vadd.f32 %v6432_v28, %v1170_v29  ;;  %v7783_v23 = vld [vmem:[%s7072_s24 + $0x58] sm:$0xff]   ;;  %v4917_v25 = vsel %vm4902_vm6, %v4914_v56, %v4916_v60  ;;  %v4331_v26 = vrot.slane %v4329_v24, 2 }
 0x123   : > { %v1706_v41 = vld [vmem:[#allocation2 + $0x78] sm:$0xff]  ;;  %v1075_v42 = vpop.f32.mrf.mxu1  ;;  %v1599_v46 = vpop.f32.mrf.mxu0  ;;  %v4334_v27 = vrot.slane %v4332_v3, 3  ;;  %v4920_v39 = vrot.slane %v7783_v23, 3 }
 0x124   : > { %1775 = vst.msk [vmem:[#allocation2 + $0x60] sm:$0xff] %vm340_vm0, %v1739_v32  ;;  %1242 = vst.msk [vmem:[#allocation2 + $0x98] sm:$0xff] %vm340_vm0, %v1206_v36  ;;  %v1742_v14 = vadd.f32 %v6472_v30, %v1706_v41  ;;  %v1204_v40 = vadd.f32 %v1168_v44, %v1075_v42  ;;  %v6983_v28 = vld [vmem:[%s7072_s24 + $0x78] sm:$0xff]   ;;  %v4338_v36 = vshrl.u32 %v6981_v15, 16  ;;  %v4326_v41 = vor.u32 %v4325_v21, %v4322_v20 }
 0x125   : > { %v1704_v51 = vld [vmem:[#allocation2 + $0x68] sm:$0xff]  ;;  %v6435_v52 = vpop.f32.mrf.mxu1  ;;  %v6475_v54 = vpop.f32.mrf.mxu0  ;;  %6686 = vmatmul.mubr.msk.bf16.gmra.mxu1 %vm340_vm0, %v4291_v19  ;;  %6726 = vmatmul.mubr.msk.bf16.gmra.mxu0 %vm340_vm0, %v4911_v33  ;;  %v4341_v19 = vshll.u32 %v6981_v15, 16  ;;  %v4918_v42 = vrot.slane %v7780_v22, 3  ;;  %v7800_v49 = vor.u32 %v4334_v27, %v4331_v26  ;;  %v4347_v50 = vshrl.u32 %v6983_v28, 16  ;;  %v1181_v15 = vld [vmem:[#allocation2 + $0xf0] sm:$0xff] }
 0x126   : > { %1778 = vst.msk [vmem:[#allocation2 + $0x78] sm:$0xff] %vm340_vm0, %v1742_v14  ;;  %1240 = vst.msk [vmem:[#allocation2 + $0x88] sm:$0xff] %vm340_vm0, %v1204_v40  ;;  %v1740_v57 = vadd.f32 %v1704_v51, %v1599_v46  ;;  %v1209_v58 = vadd.f32 %v6435_v52, %v1173_v45  ;;  %6689 = vmatprep.mubr.msk.bf16.mxu1 %vm340_vm0, %v4300_v47  ;;  %6729 = vmatprep.mubr.msk.bf16.mxu0 %vm340_vm0, %v4913_v48  ;;  %v1175_v47 = vld [vmem:[#allocation2 + $0xc0] sm:$0xff]  ;;  %v4350_v14 = vshll.u32 %v6983_v28, 16 }
 0x127   : > { %v1709_v0 = vld [vmem:[#allocation2 + $0x90] sm:$0xff]  ;;  %v1088_v35 = vpop.f32.mrf.mxu1  ;;  %v1612_v1 = vpop.f32.mrf.mxu0  ;;  %v4340_v56 = vrot.slane %v4338_v36, 2 }
 0x128   : > { %1776 = vst.msk [vmem:[#allocation2 + $0x68] sm:$0xff] %vm340_vm0, %v1740_v57  ;;  %1245 = vst.msk [vmem:[#allocation2 + $0xb0] sm:$0xff] %vm340_vm0, %v1209_v58  ;;  %v1745_v4 = vadd.f32 %v6475_v54, %v1709_v0  ;;  %v1207_v6 = vadd.f32 %v1171_v62, %v1088_v35  ;;  %v1178_v54 = vld [vmem:[#allocation2 + $0xd8] sm:$0xff]  ;;  %v4343_v57 = vrot.slane %v4341_v19, 3  ;;  %v7806_v58 = vld [vmem:[%s7072_s24 + $0x60] sm:$0xff]   ;;  %v4327_v0 = vsel %vm4229_vm5, %v7766_v2, %v4326_v41 }
 0x129   : > { %v1707_v7 = vld [vmem:[#allocation2 + $0x80] sm:$0xff]  ;;  %v6436_v8 = vpop.f32.mrf.mxu1  ;;  %v6476_v10 = vpop.f32.mrf.mxu0  ;;  %v4919_v35 = vsel %vm4902_vm6, %v4916_v60, %v4918_v42  ;;  %v7816_v62 = vld [vmem:[%s7072_s24 + $0x68] sm:$0xff]   ;;  %v4352_v2 = vrot.slane %v4350_v14, 3  ;;  %v4922_v20 = vrot.slane %v7806_v58, 3  ;;  %v1185_v58 = vld [vmem:[#allocation2 + $0x110] sm:$0xff] }
 0x12a   : > { %1781 = vst.msk [vmem:[#allocation2 + $0x90] sm:$0xff] %vm340_vm0, %v1745_v4  ;;  %1243 = vst.msk [vmem:[#allocation2 + $0xa0] sm:$0xff] %vm340_vm0, %v1207_v6  ;;  %v1743_v16 = vadd.f32 %v1707_v7, %v1612_v1  ;;  %v1210_v17 = vadd.f32 %v6436_v8, %v1174_v9  ;;  %v6985_v1 = vld [vmem:[%s7072_s24 + $0x80] sm:$0xff]   ;;  %v1176_v4 = vld [vmem:[#allocation2 + $0xc8] sm:$0xff]  ;;  %v4336_v7 = vsel %vm4229_vm5, %v4326_v41, %v7800_v49  ;;  %v4349_v9 = vrot.slane %v4347_v50, 2 }
 0x12b   : > { %v1710_v5 = vld [vmem:[#allocation2 + $0x98] sm:$0xff]  ;;  %v1091_v53 = vpop.f32.mrf.mxu1  ;;  %v1615_v59 = vpop.f32.mrf.mxu0  ;;  %v4921_v8 = vsel %vm4902_vm6, %v4918_v42, %v4920_v39  ;;  %v4924_v27 = vrot.slane %v7816_v62, 3  ;;  %v1180_v14 = vld [vmem:[#allocation2 + $0xe8] sm:$0xff] }
 0x12c   : > { %1779 = vst.msk [vmem:[#allocation2 + $0x80] sm:$0xff] %vm340_vm0, %v1743_v16  ;;  %1246 = vst.msk [vmem:[#allocation2 + $0xb8] sm:$0xff] %vm340_vm0, %v1210_v17  ;;  %v1746_v29 = vadd.f32 %v6476_v10, %v1710_v5  ;;  %v1208_v30 = vadd.f32 %v1172_v13, %v1091_v53  ;;  %v6987_v10 = vld [vmem:[%s7072_s24 + $0x88] sm:$0xff]   ;;  %v4344_v17 = vor.u32 %v4343_v57, %v4340_v56  ;;  %v4356_v5 = vshrl.u32 %v6985_v1, 16 }
 0x12d   : > { %v1708_v31 = vld [vmem:[#allocation2 + $0x88] sm:$0xff]  ;;  %v6439_v34 = vpop.f32.mrf.mxu1  ;;  %v6479_v32 = vpop.f32.mrf.mxu0  ;;  %6690 = vmatmul.mubr.msk.bf16.gmra.mxu1 %vm340_vm0, %v4309_v11  ;;  %6730 = vmatmul.mubr.msk.bf16.gmra.mxu0 %vm340_vm0, %v4915_v12  ;;  %v4359_v53 = vshll.u32 %v6985_v1, 16  ;;  %v7834_v26 = vor.u32 %v4352_v2, %v4349_v9  ;;  %v4365_v28 = vshrl.u32 %v6987_v10, 16 }
 0x12e   : > { %1782 = vst.msk [vmem:[#allocation2 + $0x98] sm:$0xff] %vm340_vm0, %v1746_v29  ;;  %1244 = vst.msk [vmem:[#allocation2 + $0xa8] sm:$0xff] %vm340_vm0, %v1208_v30  ;;  %v1744_v33 = vadd.f32 %v1708_v31, %v1615_v59  ;;  %v1213_v38 = vadd.f32 %v6439_v34, %v1177_v18  ;;  %6693 = vmatprep.mubr.msk.bf16.mxu1 %vm340_vm0, %v4318_v43  ;;  %6733 = vmatprep.mubr.msk.bf16.mxu0 %vm340_vm0, %v4917_v25  ;;  %v1179_v43 = vld [vmem:[#allocation2 + $0xe0] sm:$0xff]  ;;  %v4368_v29 = vshll.u32 %v6987_v10, 16 }
 0x12f   : > { %v1713_v44 = vld [vmem:[#allocation2 + $0xb0] sm:$0xff]  ;;  %v1104_v46 = vpop.f32.mrf.mxu1  ;;  %v1628_v48 = vpop.f32.mrf.mxu0  ;;  %v4345_v19 = vsel %vm4229_vm5, %v7800_v49, %v4344_v17 }
 0x130   : > { %1780 = vst.msk [vmem:[#allocation2 + $0x88] sm:$0xff] %vm340_vm0, %v1744_v33  ;;  %1249 = vst.msk [vmem:[#allocation2 + $0xd0] sm:$0xff] %vm340_vm0, %v1213_v38  ;;  %v1749_v40 = vadd.f32 %v6479_v32, %v1713_v44  ;;  %v1211_v51 = vadd.f32 %v1175_v47, %v1104_v46  ;;  %v1182_v32 = vld [vmem:[#allocation2 + $0xf8] sm:$0xff]  ;;  %v4923_v33 = vsel %vm4902_vm6, %v4920_v39, %v4922_v20  ;;  %v6989_v38 = vld [vmem:[%s7072_s24 + $0x90] sm:$0xff]   ;;  %v4358_v44 = vrot.slane %v4356_v5, 2 }
 0x131   : > { %v1711_v52 = vld [vmem:[#allocation2 + $0xa0] sm:$0xff]  ;;  %v6440_v45 = vpop.f32.mrf.mxu1  ;;  %v6480_v55 = vpop.f32.mrf.mxu0  ;;  %v4361_v46 = vrot.slane %v4359_v53, 3  ;;  %v7848_v47 = vld [vmem:[%s7072_s24 + $0x70] sm:$0xff]   ;;  %v4354_v39 = vsel %vm4229_vm5, %v4344_v17, %v7834_v26 }
 0x132   : > { %1785 = vst.msk [vmem:[#allocation2 + $0xb0] sm:$0xff] %vm340_vm0, %v1749_v40  ;;  %1247 = vst.msk [vmem:[#allocation2 + $0xc0] sm:$0xff] %vm340_vm0, %v1211_v51  ;;  %v1747_v63 = vadd.f32 %v1711_v52, %v1628_v48  ;;  %v1214_v61 = vadd.f32 %v6440_v45, %v1178_v54  ;;  %v7851_v48 = vld [vmem:[%s7072_s24 + $0x78] sm:$0xff]   ;;  %v4925_v40 = vsel %vm4902_vm6, %v4922_v20, %v4924_v27  ;;  %v4367_v51 = vrot.slane %v4365_v28, 2 }
 0x133   : > { %v1714_v24 = vld [vmem:[#allocation2 + $0xb8] sm:$0xff]  ;;  %v1107_v3 = vpop.f32.mrf.mxu1  ;;  %v1631_v6 = vpop.f32.mrf.mxu0  ;;  %v4370_v52 = vrot.slane %v4368_v29, 3  ;;  %v4928_v2 = vrot.slane %v7851_v48, 3  ;;  %v1184_v29 = vld [vmem:[#allocation2 + $0x108] sm:$0xff] }
 0x134   : > { %1783 = vst.msk [vmem:[#allocation2 + $0xa0] sm:$0xff] %vm340_vm0, %v1747_v63  ;;  %1250 = vst.msk [vmem:[#allocation2 + $0xd8] sm:$0xff] %vm340_vm0, %v1214_v61  ;;  %v1750_v37 = vadd.f32 %v6480_v55, %v1714_v24  ;;  %v1212_v60 = vadd.f32 %v1176_v4, %v1107_v3  ;;  %v6991_v45 = vld [vmem:[%s7072_s24 + $0x98] sm:$0xff]   ;;  %v4374_v61 = vshrl.u32 %v6989_v38, 16  ;;  %v4362_v24 = vor.u32 %v4361_v46, %v4358_v44 }
 0x135   : > { %v1712_v11 = vld [vmem:[#allocation2 + $0xa8] sm:$0xff]  ;;  %v6443_v12 = vpop.f32.mrf.mxu1  ;;  %v6483_v16 = vpop.f32.mrf.mxu0  ;;  %6694 = vmatmul.mubr.msk.bf16.gmra.mxu1 %vm340_vm0, %v4327_v0  ;;  %6734 = vmatmul.mubr.msk.bf16.gmra.mxu0 %vm340_vm0, %v4919_v35  ;;  %v4377_v0 = vshll.u32 %v6989_v38, 16  ;;  %v4926_v3 = vrot.slane %v7848_v47, 3  ;;  %v7868_v9 = vor.u32 %v4370_v52, %v4367_v51  ;;  %v4383_v10 = vshrl.u32 %v6991_v45, 16  ;;  %v2232_v38 = vld [vmem:[#allocation2 + $0x10] sm:$0xff]  ;;  %v7915_v48 = vld [vmem:[%s7072_s24 + $0x98] sm:$0xff]  }
 0x136   : > { %1786 = vst.msk [vmem:[#allocation2 + $0xb8] sm:$0xff] %vm340_vm0, %v1750_v37  ;;  %1248 = vst.msk [vmem:[#allocation2 + $0xc8] sm:$0xff] %vm340_vm0, %v1212_v60  ;;  %v1748_v21 = vadd.f32 %v1712_v11, %v1631_v6  ;;  %v1217_v22 = vadd.f32 %v6443_v12, %v1181_v15  ;;  %6697 = vmatprep.mubr.msk.bf16.mxu1 %vm340_vm0, %v4336_v7  ;;  %6737 = vmatprep.mubr.msk.bf16.mxu0 %vm340_vm0, %v4921_v8  ;;  %v1183_v7 = vld [vmem:[#allocation2 + $0x100] sm:$0xff]  ;;  %v4386_v37 = vshll.u32 %v6991_v45, 16 }
 0x137   : > { %v1717_v13 = vld [vmem:[#allocation2 + $0xd0] sm:$0xff]  ;;  %v1120_v59 = vpop.f32.mrf.mxu1  ;;  %v1644_v25 = vpop.f32.mrf.mxu0  ;;  %v4376_v20 = vrot.slane %v4374_v61, 2 }
 0x138   : > { %1784 = vst.msk [vmem:[#allocation2 + $0xa8] sm:$0xff] %vm340_vm0, %v1748_v21  ;;  %1253 = vst.msk [vmem:[#allocation2 + $0xf0] sm:$0xff] %vm340_vm0, %v1217_v22  ;;  %v1753_v30 = vadd.f32 %v6483_v16, %v1717_v13  ;;  %v1215_v31 = vadd.f32 %v1179_v43, %v1120_v59  ;;  %v1186_v16 = vld [vmem:[#allocation2 + $0x118] sm:$0xff]  ;;  %v4379_v21 = vrot.slane %v4377_v0, 3  ;;  %v7874_v22 = vld [vmem:[%s7072_s24 + $0x80] sm:$0xff]   ;;  %v4363_v13 = vsel %vm4229_vm5, %v7834_v26, %v4362_v24 }
 0x139   : > { %v1715_v34 = vld [vmem:[#allocation2 + $0xc0] sm:$0xff]  ;;  %v6444_v18 = vpop.f32.mrf.mxu1  ;;  %v6484_v36 = vpop.f32.mrf.mxu0  ;;  %v4927_v59 = vsel %vm4902_vm6, %v4924_v27, %v4926_v3 }
 0x13a   : > { %1789 = vst.msk [vmem:[#allocation2 + $0xd0] sm:$0xff] %vm340_vm0, %v1753_v30  ;;  %1251 = vst.msk [vmem:[#allocation2 + $0xe0] sm:$0xff] %vm340_vm0, %v1215_v31  ;;  %v1751_v41 = vadd.f32 %v1715_v34, %v1644_v25  ;;  %v1218_v42 = vadd.f32 %v6444_v18, %v1182_v32  ;;  %v6993_v43 = vld [vmem:[%s7072_s24 + $0xa0] ss:$0 sps:$4 sm:$0x77]   ;;  %v4372_v31 = vsel %vm4229_vm5, %v4362_v24, %v7868_v9  ;;  %v4385_v18 = vrot.slane %v4383_v10, 2 }
 0x13b   : > { %v1718_v50 = vld [vmem:[#allocation2 + $0xd8] sm:$0xff]  ;;  %v1123_v49 = vpop.f32.mrf.mxu1  ;;  %v1647_v23 = vpop.f32.mrf.mxu0  ;;  %v4929_v34 = vsel %vm4902_vm6, %v4926_v3, %v4928_v2  ;;  %v4388_v32 = vrot.slane %v4386_v37, 3  ;;  %v4392_v47 = vshrl.u32 %v6993_v43, 16  ;;  %v6994_v24 = vld [vmem:[%s7072_s24 + $0x90] sm:$0xff]  }
 0x13c   : > { %1787 = vst.msk [vmem:[#allocation2 + $0xc0] sm:$0xff] %vm340_vm0, %v1751_v41  ;;  %1254 = vst.msk [vmem:[#allocation2 + $0xf8] sm:$0xff] %vm340_vm0, %v1218_v42  ;;  %v1754_v54 = vadd.f32 %v6484_v36, %v1718_v50  ;;  %v1216_v55 = vadd.f32 %v1180_v14, %v1123_v49  ;;  %v7890_v36 = vld [vmem:[%s7072_s24 + $0x88] sm:$0xff]   ;;  %v4380_v41 = vor.u32 %v4379_v21, %v4376_v20  ;;  %v4930_v42 = vrot.slane %v7874_v22, 3 }
 0x13d   : > { %v1716_v56 = vld [vmem:[#allocation2 + $0xc8] sm:$0xff]  ;;  %v6447_v57 = vpop.f32.mrf.mxu1  ;;  %v6487_v63 = vpop.f32.mrf.mxu0  ;;  %6698 = vmatmul.mubr.msk.bf16.gmra.mxu1 %vm340_vm0, %v4345_v19  ;;  %6738 = vmatmul.mubr.msk.bf16.gmra.mxu0 %vm340_vm0, %v4923_v33  ;;  %v4395_v50 = vshll.u32 %v6993_v43, 16  ;;  %v4932_v51 = vrot.slane %v7890_v36, 3  ;;  %v4934_v20 = vrot.slane %v6994_v24, 3 }
 0x13e   : > { %1790 = vst.msk [vmem:[#allocation2 + $0xd8] sm:$0xff] %vm340_vm0, %v1754_v54  ;;  %1252 = vst.msk [vmem:[#allocation2 + $0xe8] sm:$0xff] %vm340_vm0, %v1216_v55  ;;  %v1752_v35 = vadd.f32 %v1716_v56, %v1647_v23  ;;  %v1221_v1 = vadd.f32 %v6447_v57, %v1185_v58  ;;  %6701 = vmatprep.mubr.msk.bf16.mxu1 %vm340_vm0, %v4354_v39  ;;  %6741 = vmatprep.mubr.msk.bf16.mxu0 %vm340_vm0, %v4925_v40  ;;  %v2230_v39 = vld [vmem:[#allocation2] sm:$0xff]  ;;  %v2233_v57 = vld [vmem:[#allocation2 + $0x18] sm:$0xff] }
 0x13f   : > { %v1721_v4 = vld [vmem:[#allocation2 + $0xf0] sm:$0xff]  ;;  %v1136_v6 = vpop.f32.mrf.mxu1  ;;  %v1660_v8 = vpop.f32.mrf.mxu0  ;;  %v4389_v40 = vor.u32 %v4388_v32, %v4385_v18  ;;  %v4381_v58 = vsel %vm4229_vm5, %v7868_v9, %v4380_v41  ;;  %v4933_v9 = vsel %vm4902_vm6, %v4930_v42, %v4932_v51  ;;  %v4935_v32 = vsel %vm4902_vm6, %v4932_v51, %v4934_v20  ;;  %v6996_v36 = vld [vmem:[%s7072_s24 + $0xa0] ss:$0 sps:$4 sm:$0x77]   ;;  %s6766_s24 = smul.u32 144, %s8243_s9 }
 0x140   : > { %1788 = vst.msk [vmem:[#allocation2 + $0xc8] sm:$0xff] %vm340_vm0, %v1752_v35  ;;  %1257 = vst.msk [vmem:[#allocation2 + $0x110] sm:$0xff] %vm340_vm0, %v1221_v1  ;;  %v1757_v60 = vadd.f32 %v6487_v63, %v1721_v4  ;;  %v1219_v11 = vadd.f32 %v1183_v7, %v1136_v6  ;;  %v4931_v63 = vsel %vm4902_vm6, %v4928_v2, %v4930_v42  ;;  %v4394_v35 = vrot.slane %v4392_v47, 2  ;;  %v2231_v7 = vld [vmem:[#allocation2 + $0x8] sm:$0xff] }
 0x141   : > { %v1719_v12 = vld [vmem:[#allocation2 + $0xe0] sm:$0xff]  ;;  %v6448_v15 = vpop.f32.mrf.mxu1  ;;  %v6488_v17 = vpop.f32.mrf.mxu0  ;;  %v4397_v1 = vrot.slane %v4395_v50, 3  ;;  %s8095_s20 = scalar_lea.vmem %s8237_s2, %s6766_s24 }
 0x142   : > { %1793 = vst.msk [vmem:[#allocation2 + $0xf0] sm:$0xff] %vm340_vm0, %v1757_v60  ;;  %1255 = vst.msk [vmem:[#allocation2 + $0x100] sm:$0xff] %vm340_vm0, %v1219_v11  ;;  %v1755_v5 = vadd.f32 %v1719_v12, %v1660_v8  ;;  %v1222_v53 = vadd.f32 %v6448_v15, %v1186_v16  ;;  %v4390_v8 = vsel %vm4229_vm5, %v4380_v41, %v4389_v40  ;;  %v2236_v11 = vld [vmem:[#allocation2 + $0x30] sm:$0xff] }
 0x143   : > { %v1722_v25 = vld [vmem:[#allocation2 + $0xf8] sm:$0xff]  ;;  %v1139_v28 = vpop.f32.mrf.mxu1  ;;  %v1663_v30 = vpop.f32.mrf.mxu0 }
 0x144   : > { %1791 = vst.msk [vmem:[#allocation2 + $0xe0] sm:$0xff] %vm340_vm0, %v1755_v5  ;;  %1258 = vst.msk [vmem:[#allocation2 + $0x118] sm:$0xff] %vm340_vm0, %v1222_v53  ;;  %v1758_v62 = vadd.f32 %v6488_v17, %v1722_v25  ;;  %v1220_v26 = vadd.f32 %v1184_v29, %v1139_v28  ;;  %v4398_v17 = vor.u32 %v4397_v1, %v4394_v35  ;;  %v2234_v5 = vld [vmem:[#allocation2 + $0x20] sm:$0xff]  ;;  %v2237_v29 = vld [vmem:[#allocation2 + $0x38] sm:$0xff] }
 0x145   : > { %v1720_v27 = vld [vmem:[#allocation2 + $0xe8] sm:$0xff]  ;;  %v6491_v19 = vpop.f32.mrf.mxu0  ;;  %v6503_v33 = vpop.f32.mrf.mxu1  ;;  %6702 = vmatmul.mubr.msk.bf16.gmra.mxu1 %vm340_vm0, %v4363_v13  ;;  %6742 = vmatmul.mubr.msk.bf16.gmra.mxu0 %vm340_vm0, %v4927_v59  ;;  %v4936_v13 = vrot.slane %v7915_v48, 3 }
 0x146   : > { %1794 = vst.msk [vmem:[#allocation2 + $0xf8] sm:$0xff] %vm340_vm0, %v1758_v62  ;;  %1256 = vst.msk [vmem:[#allocation2 + $0x108] sm:$0xff] %vm340_vm0, %v1220_v26  ;;  %v1756_v44 = vadd.f32 %v1720_v27, %v1663_v30  ;;  %v2268_v46 = vadd.f32 %v6503_v33, %v2232_v38  ;;  %6705 = vmatprep.mubr.msk.bf16.mxu1 %vm340_vm0, %v4372_v31  ;;  %6745 = vmatprep.mubr.msk.bf16.mxu0 %vm340_vm0, %v4929_v34  ;;  %v2235_v27 = vld [vmem:[#allocation2 + $0x28] sm:$0xff] }
 0x147   : > { %v1725_v49 = vld [vmem:[#allocation2 + $0x110] sm:$0xff]  ;;  %v1676_v14 = vpop.f32.mrf.mxu0  ;;  %v2087_v23 = vpop.f32.mrf.mxu1  ;;  %v4399_v18 = vsel %vm4229_vm5, %v4389_v40, %v4398_v17  ;;  %v4937_v33 = vsel %vm4902_vm6, %v4934_v20, %v4936_v13  ;;  %v2238_v40 = vld [vmem:[#allocation2 + $0x40] sm:$0xff]  ;;  %v2239_v1 = vld [vmem:[#allocation2 + $0x48] sm:$0xff] }
 0x148   : > { %1792 = vst.msk [vmem:[#allocation2 + $0xe8] sm:$0xff] %vm340_vm0, %v1756_v44  ;;  %v1761_v52 = vadd.f32 %v6491_v19, %v1725_v49  ;;  %2304 = vst.msk [vmem:[#allocation2 + $0x10] sm:$0xff] %vm340_vm0, %v2268_v46  ;;  %v2266_v45 = vadd.f32 %v2230_v39, %v2087_v23  ;;  %v2240_v46 = vld [vmem:[#allocation2 + $0x50] sm:$0xff]  ;;  %v2245_v20 = vld [vmem:[#allocation2 + $0x78] sm:$0xff] }
 0x149   : > { %v1723_v54 = vld [vmem:[#allocation2 + $0x100] sm:$0xff]  ;;  %v6492_v55 = vpop.f32.mrf.mxu0  ;;  %v6504_v56 = vpop.f32.mrf.mxu1 }
 0x14a   : > { %1797 = vst.msk [vmem:[#allocation2 + $0x110] sm:$0xff] %vm340_vm0, %v1761_v52  ;;  %v1759_v61 = vadd.f32 %v1723_v54, %v1676_v14  ;;  %2302 = vst.msk [vmem:[#allocation2] sm:$0xff] %vm340_vm0, %v2266_v45  ;;  %v2269_v0 = vadd.f32 %v6504_v56, %v2233_v57  ;;  %v4938_v14 = vrot.slane %v6996_v36, 3  ;;  %v2241_v56 = vld [vmem:[#allocation2 + $0x58] sm:$0xff] }
 0x14b   : > { %v1726_v3 = vld [vmem:[#allocation2 + $0x118] sm:$0xff]  ;;  %v1679_v4 = vpop.f32.mrf.mxu0  ;;  %v2090_v6 = vpop.f32.mrf.mxu1 }
 0x14c   : > { %1795 = vst.msk [vmem:[#allocation2 + $0x100] sm:$0xff] %vm340_vm0, %v1759_v61  ;;  %v1762_v2 = vadd.f32 %v6492_v55, %v1726_v3  ;;  %2305 = vst.msk [vmem:[#allocation2 + $0x18] sm:$0xff] %vm340_vm0, %v2269_v0  ;;  %v2267_v10 = vadd.f32 %v2231_v7, %v2090_v6  ;;  %v4939_v61 = vsel %vm4902_vm6, %v4936_v13, %v4938_v14  ;;  %v2247_v14 = vld [vmem:[#allocation2 + $0x88] sm:$0xff] }
 0x14d   : > { %v1724_v37 = vld [vmem:[#allocation2 + $0x108] sm:$0xff]  ;;  %v6507_v60 = vpop.f32.mrf.mxu1  ;;  %v6547_v12 = vpop.f32.mrf.mxu0  ;;  %6706 = vmatmul.mubr.msk.bf16.gmra.mxu1 %vm340_vm0, %v4381_v58  ;;  %6746 = vmatmul.mubr.msk.bf16.gmra.mxu0 %vm340_vm0, %v4931_v63 }
 0x14e   : > { %1798 = vst.msk [vmem:[#allocation2 + $0x118] sm:$0xff] %vm340_vm0, %v1762_v2  ;;  %v1760_v15 = vadd.f32 %v1724_v37, %v1679_v4  ;;  %2303 = vst.msk [vmem:[#allocation2 + $0x8] sm:$0xff] %vm340_vm0, %v2267_v10  ;;  %v2272_v16 = vadd.f32 %v6507_v60, %v2236_v11  ;;  %6709 = vmatprep.mubr.msk.bf16.mxu1 %vm340_vm0, %v4390_v8  ;;  %6749 = vmatprep.mubr.msk.bf16.mxu0 %vm340_vm0, %v4933_v9  ;;  %v2244_v8 = vld [vmem:[#allocation2 + $0x70] sm:$0xff]  ;;  %v2242_v60 = vld [vmem:[#allocation2 + $0x60] sm:$0xff] }
 0x14f   : > { %v2905_v21 = vld [vmem:[#allocation2 + $0x10] sm:$0xff]  ;;  %v2103_v22 = vpop.f32.mrf.mxu1  ;;  %v2760_v53 = vpop.f32.mrf.mxu0 }
 0x150   : > { %1796 = vst.msk [vmem:[#allocation2 + $0x108] sm:$0xff] %vm340_vm0, %v1760_v15  ;;  %2308 = vst.msk [vmem:[#allocation2 + $0x30] sm:$0xff] %vm340_vm0, %v2272_v16  ;;  %v2941_v59 = vadd.f32 %v6547_v12, %v2905_v21  ;;  %v2270_v43 = vadd.f32 %v2234_v5, %v2103_v22 }
 0x151   : > { %v2903_v25 = vld [vmem:[#allocation2] sm:$0xff]  ;;  %v6508_v28 = vpop.f32.mrf.mxu1  ;;  %v6548_v30 = vpop.f32.mrf.mxu0 }
 0x152   : > { %2977 = vst.msk [vmem:[#allocation2 + $0x10] sm:$0xff] %vm340_vm0, %v2941_v59  ;;  %2306 = vst.msk [vmem:[#allocation2 + $0x20] sm:$0xff] %vm340_vm0, %v2270_v43  ;;  %v2939_v31 = vadd.f32 %v2903_v25, %v2760_v53  ;;  %v2273_v34 = vadd.f32 %v6508_v28, %v2237_v29  ;;  %v2243_v59 = vld [vmem:[#allocation2 + $0x68] sm:$0xff] }
 0x153   : > { %v2906_v62 = vld [vmem:[#allocation2 + $0x18] sm:$0xff]  ;;  %v2106_v26 = vpop.f32.mrf.mxu1  ;;  %v2763_v19 = vpop.f32.mrf.mxu0 }
 0x154   : > { %2975 = vst.msk [vmem:[#allocation2] sm:$0xff] %vm340_vm0, %v2939_v31  ;;  %2309 = vst.msk [vmem:[#allocation2 + $0x38] sm:$0xff] %vm340_vm0, %v2273_v34  ;;  %v2942_v38 = vadd.f32 %v6548_v30, %v2906_v62  ;;  %v2271_v41 = vadd.f32 %v2235_v27, %v2106_v26  ;;  %v2248_v31 = vld [vmem:[#allocation2 + $0x90] sm:$0xff]  ;;  %v2246_v26 = vld [vmem:[#allocation2 + $0x80] sm:$0xff] }
 0x155   : > { %v2904_v42 = vld [vmem:[#allocation2 + $0x8] sm:$0xff]  ;;  %v6511_v44 = vpop.f32.mrf.mxu1  ;;  %v6551_v47 = vpop.f32.mrf.mxu0  ;;  %6710 = vmatmul.mubr.msk.bf16.gmra.mxu1 %vm340_vm0, %v4399_v18  ;;  %6750 = vmatmul.mubr.msk.bf16.gmra.mxu0 %vm340_vm0, %v4935_v32 }
 0x156   : > { %2978 = vst.msk [vmem:[#allocation2 + $0x18] sm:$0xff] %vm340_vm0, %v2942_v38  ;;  %2307 = vst.msk [vmem:[#allocation2 + $0x28] sm:$0xff] %vm340_vm0, %v2271_v41  ;;  %v2940_v50 = vadd.f32 %v2904_v42, %v2763_v19  ;;  %v2276_v49 = vadd.f32 %v6511_v44, %v2240_v46  ;;  %6753 = vmatprep.mubr.msk.bf16.mxu0 %vm340_vm0, %v4937_v33  ;;  %v2249_v42 = vld [vmem:[#allocation2 + $0x98] sm:$0xff] }
 0x157   : > { %v2909_v23 = vld [vmem:[#allocation2 + $0x30] sm:$0xff]  ;;  %v2119_v39 = vpop.f32.mrf.mxu1  ;;  %v2776_v51 = vpop.f32.mrf.mxu0 }
 0x158   : > { %2976 = vst.msk [vmem:[#allocation2 + $0x8] sm:$0xff] %vm340_vm0, %v2940_v50  ;;  %2312 = vst.msk [vmem:[#allocation2 + $0x50] sm:$0xff] %vm340_vm0, %v2276_v49  ;;  %v2945_v52 = vadd.f32 %v6551_v47, %v2909_v23  ;;  %v2274_v45 = vadd.f32 %v2238_v40, %v2119_v39 }
 0x159   : > { %v2907_v54 = vld [vmem:[#allocation2 + $0x20] sm:$0xff]  ;;  %v6512_v55 = vpop.f32.mrf.mxu1  ;;  %v6552_v57 = vpop.f32.mrf.mxu0 }
 0x15a   : > { %2981 = vst.msk [vmem:[#allocation2 + $0x30] sm:$0xff] %vm340_vm0, %v2945_v52  ;;  %2310 = vst.msk [vmem:[#allocation2 + $0x40] sm:$0xff] %vm340_vm0, %v2274_v45  ;;  %v2943_v58 = vadd.f32 %v2907_v54, %v2776_v51  ;;  %v2277_v63 = vadd.f32 %v6512_v55, %v2241_v56  ;;  %v2252_v45 = vld [vmem:[#allocation2 + $0xb0] sm:$0xff] }
 0x15b   : > { %v2910_v0 = vld [vmem:[#allocation2 + $0x38] sm:$0xff]  ;;  %v2122_v35 = vpop.f32.mrf.mxu1  ;;  %v2779_v24 = vpop.f32.mrf.mxu0 }
 0x15c   : > { %2979 = vst.msk [vmem:[#allocation2 + $0x20] sm:$0xff] %vm340_vm0, %v2943_v58  ;;  %2313 = vst.msk [vmem:[#allocation2 + $0x58] sm:$0xff] %vm340_vm0, %v2277_v63  ;;  %v2946_v3 = vadd.f32 %v6552_v57, %v2910_v0  ;;  %v2275_v4 = vadd.f32 %v2239_v1, %v2122_v35  ;;  %v2250_v63 = vld [vmem:[#allocation2 + $0xa0] sm:$0xff] }
 0x15d   : > { %v2908_v6 = vld [vmem:[#allocation2 + $0x28] sm:$0xff]  ;;  %v6515_v7 = vpop.f32.mrf.mxu1  ;;  %v6555_v9 = vpop.f32.mrf.mxu0  ;;  %6754 = vmatmul.mubr.msk.bf16.gmra.mxu0 %vm340_vm0, %v4939_v61 }
 0x15e   : > { %2982 = vst.msk [vmem:[#allocation2 + $0x38] sm:$0xff] %vm340_vm0, %v2946_v3  ;;  %2311 = vst.msk [vmem:[#allocation2 + $0x48] sm:$0xff] %vm340_vm0, %v2275_v4  ;;  %v2944_v48 = vadd.f32 %v2908_v6, %v2779_v24  ;;  %v2280_v2 = vadd.f32 %v6515_v7, %v2244_v8  ;;  %v2253_v3 = vld [vmem:[#allocation2 + $0xb8] sm:$0xff] }
 0x15f   : > { %v2913_v10 = vld [vmem:[#allocation2 + $0x50] sm:$0xff]  ;;  %v2135_v37 = vpop.f32.mrf.mxu1  ;;  %v2792_v11 = vpop.f32.mrf.mxu0 }
 0x160   : > { %2980 = vst.msk [vmem:[#allocation2 + $0x28] sm:$0xff] %vm340_vm0, %v2944_v48  ;;  %2316 = vst.msk [vmem:[#allocation2 + $0x70] sm:$0xff] %vm340_vm0, %v2280_v2  ;;  %v2949_v12 = vadd.f32 %v6555_v9, %v2913_v10  ;;  %v2278_v15 = vadd.f32 %v2242_v60, %v2135_v37  ;;  %v2251_v48 = vld [vmem:[#allocation2 + $0xa8] sm:$0xff] }
 0x161   : > { %v2911_v16 = vld [vmem:[#allocation2 + $0x40] sm:$0xff]  ;;  %v6516_v17 = vpop.f32.mrf.mxu1  ;;  %v6556_v21 = vpop.f32.mrf.mxu0 }
 0x162   : > { %2985 = vst.msk [vmem:[#allocation2 + $0x50] sm:$0xff] %vm340_vm0, %v2949_v12  ;;  %2314 = vst.msk [vmem:[#allocation2 + $0x60] sm:$0xff] %vm340_vm0, %v2278_v15  ;;  %v2947_v22 = vadd.f32 %v2911_v16, %v2792_v11  ;;  %v2281_v5 = vadd.f32 %v6516_v17, %v2245_v20  ;;  %v2256_v12 = vld [vmem:[#allocation2 + $0xd0] sm:$0xff] }
 0x163   : > { %v2914_v53 = vld [vmem:[#allocation2 + $0x58] sm:$0xff]  ;;  %v2138_v13 = vpop.f32.mrf.mxu1  ;;  %v2795_v43 = vpop.f32.mrf.mxu0 }
 0x164   : > { %2983 = vst.msk [vmem:[#allocation2 + $0x40] sm:$0xff] %vm340_vm0, %v2947_v22  ;;  %2317 = vst.msk [vmem:[#allocation2 + $0x78] sm:$0xff] %vm340_vm0, %v2281_v5  ;;  %v2950_v25 = vadd.f32 %v6556_v21, %v2914_v53  ;;  %v2279_v28 = vadd.f32 %v2243_v59, %v2138_v13  ;;  %v2254_v22 = vld [vmem:[#allocation2 + $0xc0] sm:$0xff] }
 0x165   : > { %v2912_v29 = vld [vmem:[#allocation2 + $0x48] sm:$0xff]  ;;  %v6519_v30 = vpop.f32.mrf.mxu1  ;;  %v6559_v34 = vpop.f32.mrf.mxu0 }
 0x166   : > { %2986 = vst.msk [vmem:[#allocation2 + $0x58] sm:$0xff] %vm340_vm0, %v2950_v25  ;;  %2315 = vst.msk [vmem:[#allocation2 + $0x68] sm:$0xff] %vm340_vm0, %v2279_v28  ;;  %v2948_v18 = vadd.f32 %v2912_v29, %v2795_v43  ;;  %v2284_v32 = vadd.f32 %v6519_v30, %v2248_v31  ;;  %v2257_v25 = vld [vmem:[#allocation2 + $0xd8] sm:$0xff] }
 0x167   : > { %v2917_v36 = vld [vmem:[#allocation2 + $0x70] sm:$0xff]  ;;  %v2151_v62 = vpop.f32.mrf.mxu1  ;;  %v2808_v27 = vpop.f32.mrf.mxu0 }
 0x168   : > { %2984 = vst.msk [vmem:[#allocation2 + $0x48] sm:$0xff] %vm340_vm0, %v2948_v18  ;;  %2320 = vst.msk [vmem:[#allocation2 + $0x90] sm:$0xff] %vm340_vm0, %v2284_v32  ;;  %v2953_v19 = vadd.f32 %v6559_v34, %v2917_v36  ;;  %v2282_v33 = vadd.f32 %v2246_v26, %v2151_v62  ;;  %v2255_v18 = vld [vmem:[#allocation2 + $0xc8] sm:$0xff] }
 0x169   : > { %v2915_v38 = vld [vmem:[#allocation2 + $0x60] sm:$0xff]  ;;  %v6520_v41 = vpop.f32.mrf.mxu1  ;;  %v6560_v44 = vpop.f32.mrf.mxu0 }
 0x16a   : > { %2989 = vst.msk [vmem:[#allocation2 + $0x70] sm:$0xff] %vm340_vm0, %v2953_v19  ;;  %2318 = vst.msk [vmem:[#allocation2 + $0x80] sm:$0xff] %vm340_vm0, %v2282_v33  ;;  %v2951_v46 = vadd.f32 %v2915_v38, %v2808_v27  ;;  %v2285_v47 = vadd.f32 %v6520_v41, %v2249_v42  ;;  %v2260_v19 = vld [vmem:[#allocation2 + $0xf0] sm:$0xff] }
 0x16b   : > { %v2918_v50 = vld [vmem:[#allocation2 + $0x78] sm:$0xff]  ;;  %v2154_v49 = vpop.f32.mrf.mxu1  ;;  %v2811_v23 = vpop.f32.mrf.mxu0 }
 0x16c   : > { %2987 = vst.msk [vmem:[#allocation2 + $0x60] sm:$0xff] %vm340_vm0, %v2951_v46  ;;  %2321 = vst.msk [vmem:[#allocation2 + $0x98] sm:$0xff] %vm340_vm0, %v2285_v47  ;;  %v2954_v39 = vadd.f32 %v6560_v44, %v2918_v50  ;;  %v2283_v40 = vadd.f32 %v2247_v14, %v2154_v49  ;;  %v2258_v46 = vld [vmem:[#allocation2 + $0xe0] sm:$0xff] }
 0x16d   : > { %v2916_v51 = vld [vmem:[#allocation2 + $0x68] sm:$0xff]  ;;  %v6523_v52 = vpop.f32.mrf.mxu1  ;;  %v6563_v54 = vpop.f32.mrf.mxu0 }
 0x16e   : > { %2990 = vst.msk [vmem:[#allocation2 + $0x78] sm:$0xff] %vm340_vm0, %v2954_v39  ;;  %2319 = vst.msk [vmem:[#allocation2 + $0x88] sm:$0xff] %vm340_vm0, %v2283_v40  ;;  %v2952_v55 = vadd.f32 %v2916_v51, %v2811_v23  ;;  %v2288_v56 = vadd.f32 %v6523_v52, %v2252_v45  ;;  %v2261_v39 = vld [vmem:[#allocation2 + $0xf8] sm:$0xff] }
 0x16f   : > { %v2921_v57 = vld [vmem:[#allocation2 + $0x90] sm:$0xff]  ;;  %v2167_v58 = vpop.f32.mrf.mxu1  ;;  %v2824_v61 = vpop.f32.mrf.mxu0 }
 0x170   : > { %2988 = vst.msk [vmem:[#allocation2 + $0x68] sm:$0xff] %vm340_vm0, %v2952_v55  ;;  %2324 = vst.msk [vmem:[#allocation2 + $0xb0] sm:$0xff] %vm340_vm0, %v2288_v56  ;;  %v2957_v0 = vadd.f32 %v6563_v54, %v2921_v57  ;;  %v2286_v35 = vadd.f32 %v2250_v63, %v2167_v58  ;;  %v2259_v55 = vld [vmem:[#allocation2 + $0xe8] sm:$0xff] }
 0x171   : > { %v2919_v1 = vld [vmem:[#allocation2 + $0x80] sm:$0xff]  ;;  %v6524_v24 = vpop.f32.mrf.mxu1  ;;  %v6564_v4 = vpop.f32.mrf.mxu0 }
 0x172   : > { %2993 = vst.msk [vmem:[#allocation2 + $0x90] sm:$0xff] %vm340_vm0, %v2957_v0  ;;  %2322 = vst.msk [vmem:[#allocation2 + $0xa0] sm:$0xff] %vm340_vm0, %v2286_v35  ;;  %v2955_v6 = vadd.f32 %v2919_v1, %v2824_v61  ;;  %v2289_v7 = vadd.f32 %v6524_v24, %v2253_v3  ;;  %v2264_v0 = vld [vmem:[#allocation2 + $0x110] sm:$0xff] }
 0x173   : > { %v2922_v8 = vld [vmem:[#allocation2 + $0x98] sm:$0xff]  ;;  %v2170_v9 = vpop.f32.mrf.mxu1  ;;  %v2827_v2 = vpop.f32.mrf.mxu0 }
 0x174   : > { %2991 = vst.msk [vmem:[#allocation2 + $0x80] sm:$0xff] %vm340_vm0, %v2955_v6  ;;  %2325 = vst.msk [vmem:[#allocation2 + $0xb8] sm:$0xff] %vm340_vm0, %v2289_v7  ;;  %v2958_v10 = vadd.f32 %v6564_v4, %v2922_v8  ;;  %v2287_v37 = vadd.f32 %v2251_v48, %v2170_v9  ;;  %v2262_v6 = vld [vmem:[#allocation2 + $0x100] sm:$0xff] }
 0x175   : > { %v2920_v60 = vld [vmem:[#allocation2 + $0x88] sm:$0xff]  ;;  %v6527_v11 = vpop.f32.mrf.mxu1  ;;  %v6567_v15 = vpop.f32.mrf.mxu0 }
 0x176   : > { %2994 = vst.msk [vmem:[#allocation2 + $0x98] sm:$0xff] %vm340_vm0, %v2958_v10  ;;  %2323 = vst.msk [vmem:[#allocation2 + $0xa8] sm:$0xff] %vm340_vm0, %v2287_v37  ;;  %v2956_v16 = vadd.f32 %v2920_v60, %v2827_v2  ;;  %v2292_v17 = vadd.f32 %v6527_v11, %v2256_v12  ;;  %v2265_v10 = vld [vmem:[#allocation2 + $0x118] sm:$0xff] }
 0x177   : > { %v2925_v20 = vld [vmem:[#allocation2 + $0xb0] sm:$0xff]  ;;  %v2183_v21 = vpop.f32.mrf.mxu1  ;;  %v2840_v5 = vpop.f32.mrf.mxu0 }
 0x178   : > { %2992 = vst.msk [vmem:[#allocation2 + $0x88] sm:$0xff] %vm340_vm0, %v2956_v16  ;;  %2328 = vst.msk [vmem:[#allocation2 + $0xd0] sm:$0xff] %vm340_vm0, %v2292_v17  ;;  %v2961_v53 = vadd.f32 %v6567_v15, %v2925_v20  ;;  %v2290_v13 = vadd.f32 %v2254_v22, %v2183_v21  ;;  %v2263_v16 = vld [vmem:[#allocation2 + $0x108] sm:$0xff] }
 0x179   : > { %v2923_v59 = vld [vmem:[#allocation2 + $0xa0] sm:$0xff]  ;;  %v6528_v43 = vpop.f32.mrf.mxu1  ;;  %v6568_v28 = vpop.f32.mrf.mxu0 }
 0x17a   : > { %2997 = vst.msk [vmem:[#allocation2 + $0xb0] sm:$0xff] %vm340_vm0, %v2961_v53  ;;  %2326 = vst.msk [vmem:[#allocation2 + $0xc0] sm:$0xff] %vm340_vm0, %v2290_v13  ;;  %v2959_v29 = vadd.f32 %v2923_v59, %v2840_v5  ;;  %v2293_v30 = vadd.f32 %v6528_v43, %v2257_v25  ;;  %v3445_v13 = vld [vmem:[#allocation2 + $0x10] sm:$0xff] }
 0x17b   : > { %v2926_v31 = vld [vmem:[#allocation2 + $0xb8] sm:$0xff]  ;;  %v2186_v34 = vpop.f32.mrf.mxu1  ;;  %v2843_v32 = vpop.f32.mrf.mxu0 }
 0x17c   : > { %2995 = vst.msk [vmem:[#allocation2 + $0xa0] sm:$0xff] %vm340_vm0, %v2959_v29  ;;  %2329 = vst.msk [vmem:[#allocation2 + $0xd8] sm:$0xff] %vm340_vm0, %v2293_v30  ;;  %v2962_v36 = vadd.f32 %v6568_v28, %v2926_v31  ;;  %v2291_v62 = vadd.f32 %v2255_v18, %v2186_v34  ;;  %v3443_v30 = vld [vmem:[#allocation2] sm:$0xff] }
 0x17d   : > { %v2924_v26 = vld [vmem:[#allocation2 + $0xa8] sm:$0xff]  ;;  %v6531_v27 = vpop.f32.mrf.mxu1  ;;  %v6571_v33 = vpop.f32.mrf.mxu0 }
 0x17e   : > { %2998 = vst.msk [vmem:[#allocation2 + $0xb8] sm:$0xff] %vm340_vm0, %v2962_v36  ;;  %2327 = vst.msk [vmem:[#allocation2 + $0xc8] sm:$0xff] %vm340_vm0, %v2291_v62  ;;  %v2960_v38 = vadd.f32 %v2924_v26, %v2843_v32  ;;  %v2296_v41 = vadd.f32 %v6531_v27, %v2260_v19  ;;  %v3446_v62 = vld [vmem:[#allocation2 + $0x18] sm:$0xff] }
 0x17f   : > { %v2929_v42 = vld [vmem:[#allocation2 + $0xd0] sm:$0xff]  ;;  %v2199_v44 = vpop.f32.mrf.mxu1  ;;  %v2856_v47 = vpop.f32.mrf.mxu0 }
 0x180   : > { %2996 = vst.msk [vmem:[#allocation2 + $0xa8] sm:$0xff] %vm340_vm0, %v2960_v38  ;;  %2332 = vst.msk [vmem:[#allocation2 + $0xf0] sm:$0xff] %vm340_vm0, %v2296_v41  ;;  %v2965_v50 = vadd.f32 %v6571_v33, %v2929_v42  ;;  %v2294_v49 = vadd.f32 %v2258_v46, %v2199_v44  ;;  %v3444_v41 = vld [vmem:[#allocation2 + $0x8] sm:$0xff] }
 0x181   : > { %v2927_v14 = vld [vmem:[#allocation2 + $0xc0] sm:$0xff]  ;;  %v6532_v23 = vpop.f32.mrf.mxu1  ;;  %v6572_v40 = vpop.f32.mrf.mxu0 }
 0x182   : > { %3001 = vst.msk [vmem:[#allocation2 + $0xd0] sm:$0xff] %vm340_vm0, %v2965_v50  ;;  %2330 = vst.msk [vmem:[#allocation2 + $0xe0] sm:$0xff] %vm340_vm0, %v2294_v49  ;;  %v2963_v51 = vadd.f32 %v2927_v14, %v2856_v47  ;;  %v2297_v52 = vadd.f32 %v6532_v23, %v2261_v39  ;;  %v3449_v50 = vld [vmem:[#allocation2 + $0x30] sm:$0xff] }
 0x183   : > { %v2930_v45 = vld [vmem:[#allocation2 + $0xd8] sm:$0xff]  ;;  %v2202_v54 = vpop.f32.mrf.mxu1  ;;  %v2859_v56 = vpop.f32.mrf.mxu0 }
 0x184   : > { %2999 = vst.msk [vmem:[#allocation2 + $0xc0] sm:$0xff] %vm340_vm0, %v2963_v51  ;;  %2333 = vst.msk [vmem:[#allocation2 + $0xf8] sm:$0xff] %vm340_vm0, %v2297_v52  ;;  %v2966_v57 = vadd.f32 %v6572_v40, %v2930_v45  ;;  %v2295_v58 = vadd.f32 %v2259_v55, %v2202_v54  ;;  %v3447_v51 = vld [vmem:[#allocation2 + $0x20] sm:$0xff] }
 0x185   : > { %v2928_v63 = vld [vmem:[#allocation2 + $0xc8] sm:$0xff]  ;;  %v6535_v61 = vpop.f32.mrf.mxu1  ;;  %v6575_v35 = vpop.f32.mrf.mxu0 }
 0x186   : > { %3002 = vst.msk [vmem:[#allocation2 + $0xd8] sm:$0xff] %vm340_vm0, %v2966_v57  ;;  %2331 = vst.msk [vmem:[#allocation2 + $0xe8] sm:$0xff] %vm340_vm0, %v2295_v58  ;;  %v2964_v1 = vadd.f32 %v2928_v63, %v2859_v56  ;;  %v2300_v24 = vadd.f32 %v6535_v61, %v2264_v0  ;;  %v3450_v57 = vld [vmem:[#allocation2 + $0x38] sm:$0xff] }
 0x187   : > { %v2933_v3 = vld [vmem:[#allocation2 + $0xf0] sm:$0xff]  ;;  %v2215_v4 = vpop.f32.mrf.mxu1  ;;  %v2872_v7 = vpop.f32.mrf.mxu0 }
 0x188   : > { %3000 = vst.msk [vmem:[#allocation2 + $0xc8] sm:$0xff] %vm340_vm0, %v2964_v1  ;;  %2336 = vst.msk [vmem:[#allocation2 + $0x110] sm:$0xff] %vm340_vm0, %v2300_v24  ;;  %v2969_v8 = vadd.f32 %v6575_v35, %v2933_v3  ;;  %v2298_v9 = vadd.f32 %v2262_v6, %v2215_v4  ;;  %v3448_v1 = vld [vmem:[#allocation2 + $0x28] sm:$0xff] }
 0x189   : > { %v2931_v48 = vld [vmem:[#allocation2 + $0xe0] sm:$0xff]  ;;  %v6536_v2 = vpop.f32.mrf.mxu1  ;;  %v6576_v37 = vpop.f32.mrf.mxu0 }
 0x18a   : > { %3005 = vst.msk [vmem:[#allocation2 + $0xf0] sm:$0xff] %vm340_vm0, %v2969_v8  ;;  %2334 = vst.msk [vmem:[#allocation2 + $0x100] sm:$0xff] %vm340_vm0, %v2298_v9  ;;  %v2967_v60 = vadd.f32 %v2931_v48, %v2872_v7  ;;  %v2301_v11 = vadd.f32 %v6536_v2, %v2265_v10  ;;  %v3453_v8 = vld [vmem:[#allocation2 + $0x50] sm:$0xff] }
 0x18b   : > { %v2934_v12 = vld [vmem:[#allocation2 + $0xf8] sm:$0xff]  ;;  %v2218_v15 = vpop.f32.mrf.mxu1  ;;  %v2875_v17 = vpop.f32.mrf.mxu0 }
 0x18c   : > { %3003 = vst.msk [vmem:[#allocation2 + $0xe0] sm:$0xff] %vm340_vm0, %v2967_v60  ;;  %2337 = vst.msk [vmem:[#allocation2 + $0x118] sm:$0xff] %vm340_vm0, %v2301_v11  ;;  %v2970_v20 = vadd.f32 %v6576_v37, %v2934_v12  ;;  %v2299_v21 = vadd.f32 %v2263_v16, %v2218_v15  ;;  %v3451_v60 = vld [vmem:[#allocation2 + $0x40] sm:$0xff] }
 0x18d   : > { %v2932_v22 = vld [vmem:[#allocation2 + $0xe8] sm:$0xff]  ;;  %v6579_v5 = vpop.f32.mrf.mxu0  ;;  %v6591_v53 = vpop.f32.mrf.mxu1 }
 0x18e   : > { %3006 = vst.msk [vmem:[#allocation2 + $0xf8] sm:$0xff] %vm340_vm0, %v2970_v20  ;;  %2335 = vst.msk [vmem:[#allocation2 + $0x108] sm:$0xff] %vm340_vm0, %v2299_v21  ;;  %v2968_v59 = vadd.f32 %v2932_v22, %v2875_v17  ;;  %v3481_v43 = vadd.f32 %v6591_v53, %v3445_v13  ;;  %v3454_v20 = vld [vmem:[#allocation2 + $0x58] sm:$0xff] }
 0x18f   : > { %v2937_v25 = vld [vmem:[#allocation2 + $0x110] sm:$0xff]  ;;  %v2888_v28 = vpop.f32.mrf.mxu0  ;;  %v3300_v29 = vpop.f32.mrf.mxu1 }
 0x190   : > { %3004 = vst.msk [vmem:[#allocation2 + $0xe8] sm:$0xff] %vm340_vm0, %v2968_v59  ;;  %v2973_v31 = vadd.f32 %v6579_v5, %v2937_v25  ;;  %3517 = vst.msk [vmem:[#allocation2 + $0x10] sm:$0xff] %vm340_vm0, %v3481_v43  ;;  %v3479_v34 = vadd.f32 %v3443_v30, %v3300_v29  ;;  %v3452_v59 = vld [vmem:[#allocation2 + $0x48] sm:$0xff] }
 0x191   : > { %v2935_v18 = vld [vmem:[#allocation2 + $0x100] sm:$0xff]  ;;  %v6580_v32 = vpop.f32.mrf.mxu0  ;;  %v6592_v36 = vpop.f32.mrf.mxu1 }
 0x192   : > { %3009 = vst.msk [vmem:[#allocation2 + $0x110] sm:$0xff] %vm340_vm0, %v2973_v31  ;;  %v2971_v26 = vadd.f32 %v2935_v18, %v2888_v28  ;;  %3515 = vst.msk [vmem:[#allocation2] sm:$0xff] %vm340_vm0, %v3479_v34  ;;  %v3482_v27 = vadd.f32 %v6592_v36, %v3446_v62  ;;  %v3457_v31 = vld [vmem:[#allocation2 + $0x70] sm:$0xff] }
 0x193   : > { %v2938_v19 = vld [vmem:[#allocation2 + $0x118] sm:$0xff]  ;;  %v2891_v33 = vpop.f32.mrf.mxu0  ;;  %v3303_v38 = vpop.f32.mrf.mxu1 }
 0x194   : > { %3007 = vst.msk [vmem:[#allocation2 + $0x100] sm:$0xff] %vm340_vm0, %v2971_v26  ;;  %v2974_v42 = vadd.f32 %v6580_v32, %v2938_v19  ;;  %3518 = vst.msk [vmem:[#allocation2 + $0x18] sm:$0xff] %vm340_vm0, %v3482_v27  ;;  %v3480_v44 = vadd.f32 %v3444_v41, %v3303_v38  ;;  %v3455_v26 = vld [vmem:[#allocation2 + $0x60] sm:$0xff] }
 0x195   : > { %v2936_v46 = vld [vmem:[#allocation2 + $0x108] sm:$0xff]  ;;  %v6595_v47 = vpop.f32.mrf.mxu1  ;;  %v6635_v49 = vpop.f32.mrf.mxu0 }
 0x196   : > { %3010 = vst.msk [vmem:[#allocation2 + $0x118] sm:$0xff] %vm340_vm0, %v2974_v42  ;;  %v2972_v14 = vadd.f32 %v2936_v46, %v2891_v33  ;;  %3516 = vst.msk [vmem:[#allocation2 + $0x8] sm:$0xff] %vm340_vm0, %v3480_v44  ;;  %v3485_v23 = vadd.f32 %v6595_v47, %v3449_v50  ;;  %v3458_v42 = vld [vmem:[#allocation2 + $0x78] sm:$0xff] }
 0x197   : > { %v3984_v39 = vld [vmem:[#allocation2 + $0x10] sm:$0xff]  ;;  %v3316_v40 = vpop.f32.mrf.mxu1  ;;  %v3839_v52 = vpop.f32.mrf.mxu0 }
 0x198   : > { %3008 = vst.msk [vmem:[#allocation2 + $0x108] sm:$0xff] %vm340_vm0, %v2972_v14  ;;  %3521 = vst.msk [vmem:[#allocation2 + $0x30] sm:$0xff] %vm340_vm0, %v3485_v23  ;;  %v4020_v45 = vadd.f32 %v6635_v49, %v3984_v39  ;;  %v3483_v54 = vadd.f32 %v3447_v51, %v3316_v40  ;;  %v3456_v14 = vld [vmem:[#allocation2 + $0x68] sm:$0xff] }
 0x199   : > { %v3982_v55 = vld [vmem:[#allocation2] sm:$0xff]  ;;  %v6596_v56 = vpop.f32.mrf.mxu1  ;;  %v6636_v58 = vpop.f32.mrf.mxu0 }
 0x19a   : > { %4056 = vst.msk [vmem:[#allocation2 + $0x10] sm:$0xff] %vm340_vm0, %v4020_v45  ;;  %3519 = vst.msk [vmem:[#allocation2 + $0x20] sm:$0xff] %vm340_vm0, %v3483_v54  ;;  %v4018_v63 = vadd.f32 %v3982_v55, %v3839_v52  ;;  %v3486_v61 = vadd.f32 %v6596_v56, %v3450_v57  ;;  %v3461_v45 = vld [vmem:[#allocation2 + $0x90] sm:$0xff] }
 0x19b   : > { %v3985_v0 = vld [vmem:[#allocation2 + $0x18] sm:$0xff]  ;;  %v3319_v35 = vpop.f32.mrf.mxu1  ;;  %v3842_v24 = vpop.f32.mrf.mxu0 }
 0x19c   : > { %4054 = vst.msk [vmem:[#allocation2] sm:$0xff] %vm340_vm0, %v4018_v63  ;;  %3522 = vst.msk [vmem:[#allocation2 + $0x38] sm:$0xff] %vm340_vm0, %v3486_v61  ;;  %v4021_v3 = vadd.f32 %v6636_v58, %v3985_v0  ;;  %v3484_v4 = vadd.f32 %v3448_v1, %v3319_v35  ;;  %v3459_v63 = vld [vmem:[#allocation2 + $0x80] sm:$0xff] }
 0x19d   : > { %v3983_v6 = vld [vmem:[#allocation2 + $0x8] sm:$0xff]  ;;  %v6599_v7 = vpop.f32.mrf.mxu1  ;;  %v6639_v9 = vpop.f32.mrf.mxu0 }
 0x19e   : > { %4057 = vst.msk [vmem:[#allocation2 + $0x18] sm:$0xff] %vm340_vm0, %v4021_v3  ;;  %3520 = vst.msk [vmem:[#allocation2 + $0x28] sm:$0xff] %vm340_vm0, %v3484_v4  ;;  %v4019_v48 = vadd.f32 %v3983_v6, %v3842_v24  ;;  %v3489_v2 = vadd.f32 %v6599_v7, %v3453_v8  ;;  %v3462_v3 = vld [vmem:[#allocation2 + $0x98] sm:$0xff] }
 0x19f   : > { %v3988_v10 = vld [vmem:[#allocation2 + $0x30] sm:$0xff]  ;;  %v3332_v37 = vpop.f32.mrf.mxu1  ;;  %v3855_v11 = vpop.f32.mrf.mxu0 }
 0x1a0   : > { %4055 = vst.msk [vmem:[#allocation2 + $0x8] sm:$0xff] %vm340_vm0, %v4019_v48  ;;  %3525 = vst.msk [vmem:[#allocation2 + $0x50] sm:$0xff] %vm340_vm0, %v3489_v2  ;;  %v4024_v12 = vadd.f32 %v6639_v9, %v3988_v10  ;;  %v3487_v15 = vadd.f32 %v3451_v60, %v3332_v37  ;;  %v3460_v48 = vld [vmem:[#allocation2 + $0x88] sm:$0xff] }
 0x1a1   : > { %v3986_v16 = vld [vmem:[#allocation2 + $0x20] sm:$0xff]  ;;  %v6600_v17 = vpop.f32.mrf.mxu1  ;;  %v6640_v21 = vpop.f32.mrf.mxu0 }
 0x1a2   : > { %4060 = vst.msk [vmem:[#allocation2 + $0x30] sm:$0xff] %vm340_vm0, %v4024_v12  ;;  %3523 = vst.msk [vmem:[#allocation2 + $0x40] sm:$0xff] %vm340_vm0, %v3487_v15  ;;  %v4022_v22 = vadd.f32 %v3986_v16, %v3855_v11  ;;  %v3490_v5 = vadd.f32 %v6600_v17, %v3454_v20  ;;  %v3465_v12 = vld [vmem:[#allocation2 + $0xb0] sm:$0xff] }
 0x1a3   : > { %v3989_v53 = vld [vmem:[#allocation2 + $0x38] sm:$0xff]  ;;  %v3335_v13 = vpop.f32.mrf.mxu1  ;;  %v3858_v43 = vpop.f32.mrf.mxu0 }
 0x1a4   : > { %4058 = vst.msk [vmem:[#allocation2 + $0x20] sm:$0xff] %vm340_vm0, %v4022_v22  ;;  %3526 = vst.msk [vmem:[#allocation2 + $0x58] sm:$0xff] %vm340_vm0, %v3490_v5  ;;  %v4025_v25 = vadd.f32 %v6640_v21, %v3989_v53  ;;  %v3488_v28 = vadd.f32 %v3452_v59, %v3335_v13  ;;  %v3463_v22 = vld [vmem:[#allocation2 + $0xa0] sm:$0xff] }
 0x1a5   : > { %v3987_v29 = vld [vmem:[#allocation2 + $0x28] sm:$0xff]  ;;  %v6603_v30 = vpop.f32.mrf.mxu1  ;;  %v6643_v34 = vpop.f32.mrf.mxu0 }
 0x1a6   : > { %4061 = vst.msk [vmem:[#allocation2 + $0x38] sm:$0xff] %vm340_vm0, %v4025_v25  ;;  %3524 = vst.msk [vmem:[#allocation2 + $0x48] sm:$0xff] %vm340_vm0, %v3488_v28  ;;  %v4023_v18 = vadd.f32 %v3987_v29, %v3858_v43  ;;  %v3493_v32 = vadd.f32 %v6603_v30, %v3457_v31  ;;  %v3466_v25 = vld [vmem:[#allocation2 + $0xb8] sm:$0xff] }
 0x1a7   : > { %v3992_v36 = vld [vmem:[#allocation2 + $0x50] sm:$0xff]  ;;  %v3348_v62 = vpop.f32.mrf.mxu1  ;;  %v3871_v27 = vpop.f32.mrf.mxu0 }
 0x1a8   : > { %4059 = vst.msk [vmem:[#allocation2 + $0x28] sm:$0xff] %vm340_vm0, %v4023_v18  ;;  %3529 = vst.msk [vmem:[#allocation2 + $0x70] sm:$0xff] %vm340_vm0, %v3493_v32  ;;  %v4028_v19 = vadd.f32 %v6643_v34, %v3992_v36  ;;  %v3491_v33 = vadd.f32 %v3455_v26, %v3348_v62  ;;  %v3464_v18 = vld [vmem:[#allocation2 + $0xa8] sm:$0xff] }
 0x1a9   : > { %v3990_v38 = vld [vmem:[#allocation2 + $0x40] sm:$0xff]  ;;  %v6604_v41 = vpop.f32.mrf.mxu1  ;;  %v6644_v44 = vpop.f32.mrf.mxu0 }
 0x1aa   : > { %4064 = vst.msk [vmem:[#allocation2 + $0x50] sm:$0xff] %vm340_vm0, %v4028_v19  ;;  %3527 = vst.msk [vmem:[#allocation2 + $0x60] sm:$0xff] %vm340_vm0, %v3491_v33  ;;  %v4026_v46 = vadd.f32 %v3990_v38, %v3871_v27  ;;  %v3494_v47 = vadd.f32 %v6604_v41, %v3458_v42  ;;  %v3469_v19 = vld [vmem:[#allocation2 + $0xd0] sm:$0xff] }
 0x1ab   : > { %v3993_v50 = vld [vmem:[#allocation2 + $0x58] sm:$0xff]  ;;  %v3351_v49 = vpop.f32.mrf.mxu1  ;;  %v3874_v23 = vpop.f32.mrf.mxu0 }
 0x1ac   : > { %4062 = vst.msk [vmem:[#allocation2 + $0x40] sm:$0xff] %vm340_vm0, %v4026_v46  ;;  %3530 = vst.msk [vmem:[#allocation2 + $0x78] sm:$0xff] %vm340_vm0, %v3494_v47  ;;  %v4029_v39 = vadd.f32 %v6644_v44, %v3993_v50  ;;  %v3492_v40 = vadd.f32 %v3456_v14, %v3351_v49  ;;  %v3467_v46 = vld [vmem:[#allocation2 + $0xc0] sm:$0xff] }
 0x1ad   : > { %v3991_v51 = vld [vmem:[#allocation2 + $0x48] sm:$0xff]  ;;  %v6607_v52 = vpop.f32.mrf.mxu1  ;;  %v6647_v54 = vpop.f32.mrf.mxu0 }
 0x1ae   : > { %4065 = vst.msk [vmem:[#allocation2 + $0x58] sm:$0xff] %vm340_vm0, %v4029_v39  ;;  %3528 = vst.msk [vmem:[#allocation2 + $0x68] sm:$0xff] %vm340_vm0, %v3492_v40  ;;  %v4027_v55 = vadd.f32 %v3991_v51, %v3874_v23  ;;  %v3497_v56 = vadd.f32 %v6607_v52, %v3461_v45  ;;  %v3470_v39 = vld [vmem:[#allocation2 + $0xd8] sm:$0xff] }
 0x1af   : > { %v3996_v57 = vld [vmem:[#allocation2 + $0x70] sm:$0xff]  ;;  %v3364_v58 = vpop.f32.mrf.mxu1  ;;  %v3887_v61 = vpop.f32.mrf.mxu0 }
 0x1b0   : > { %4063 = vst.msk [vmem:[#allocation2 + $0x48] sm:$0xff] %vm340_vm0, %v4027_v55  ;;  %3533 = vst.msk [vmem:[#allocation2 + $0x90] sm:$0xff] %vm340_vm0, %v3497_v56  ;;  %v4032_v0 = vadd.f32 %v6647_v54, %v3996_v57  ;;  %v3495_v35 = vadd.f32 %v3459_v63, %v3364_v58  ;;  %v3468_v55 = vld [vmem:[#allocation2 + $0xc8] sm:$0xff] }
 0x1b1   : > { %v3994_v1 = vld [vmem:[#allocation2 + $0x60] sm:$0xff]  ;;  %v6608_v24 = vpop.f32.mrf.mxu1  ;;  %v6648_v4 = vpop.f32.mrf.mxu0 }
 0x1b2   : > { %4068 = vst.msk [vmem:[#allocation2 + $0x70] sm:$0xff] %vm340_vm0, %v4032_v0  ;;  %3531 = vst.msk [vmem:[#allocation2 + $0x80] sm:$0xff] %vm340_vm0, %v3495_v35  ;;  %v4030_v6 = vadd.f32 %v3994_v1, %v3887_v61  ;;  %v3498_v7 = vadd.f32 %v6608_v24, %v3462_v3  ;;  %v3473_v0 = vld [vmem:[#allocation2 + $0xf0] sm:$0xff] }
 0x1b3   : > { %v3997_v8 = vld [vmem:[#allocation2 + $0x78] sm:$0xff]  ;;  %v3367_v9 = vpop.f32.mrf.mxu1  ;;  %v3890_v2 = vpop.f32.mrf.mxu0 }
 0x1b4   : > { %4066 = vst.msk [vmem:[#allocation2 + $0x60] sm:$0xff] %vm340_vm0, %v4030_v6  ;;  %3534 = vst.msk [vmem:[#allocation2 + $0x98] sm:$0xff] %vm340_vm0, %v3498_v7  ;;  %v4033_v10 = vadd.f32 %v6648_v4, %v3997_v8  ;;  %v3496_v37 = vadd.f32 %v3460_v48, %v3367_v9  ;;  %v3471_v6 = vld [vmem:[#allocation2 + $0xe0] sm:$0xff] }
 0x1b5   : > { %v3995_v60 = vld [vmem:[#allocation2 + $0x68] sm:$0xff]  ;;  %v6611_v11 = vpop.f32.mrf.mxu1  ;;  %v6651_v15 = vpop.f32.mrf.mxu0 }
 0x1b6   : > { %4069 = vst.msk [vmem:[#allocation2 + $0x78] sm:$0xff] %vm340_vm0, %v4033_v10  ;;  %3532 = vst.msk [vmem:[#allocation2 + $0x88] sm:$0xff] %vm340_vm0, %v3496_v37  ;;  %v4031_v16 = vadd.f32 %v3995_v60, %v3890_v2  ;;  %v3501_v17 = vadd.f32 %v6611_v11, %v3465_v12  ;;  %v3474_v10 = vld [vmem:[#allocation2 + $0xf8] sm:$0xff] }
 0x1b7   : > { %v4000_v20 = vld [vmem:[#allocation2 + $0x90] sm:$0xff]  ;;  %v3380_v21 = vpop.f32.mrf.mxu1  ;;  %v3903_v5 = vpop.f32.mrf.mxu0 }
 0x1b8   : > { %4067 = vst.msk [vmem:[#allocation2 + $0x68] sm:$0xff] %vm340_vm0, %v4031_v16  ;;  %3537 = vst.msk [vmem:[#allocation2 + $0xb0] sm:$0xff] %vm340_vm0, %v3501_v17  ;;  %v4036_v53 = vadd.f32 %v6651_v15, %v4000_v20  ;;  %v3499_v13 = vadd.f32 %v3463_v22, %v3380_v21  ;;  %v3472_v16 = vld [vmem:[#allocation2 + $0xe8] sm:$0xff] }
 0x1b9   : > { %v3998_v59 = vld [vmem:[#allocation2 + $0x80] sm:$0xff]  ;;  %v6612_v43 = vpop.f32.mrf.mxu1  ;;  %v6652_v28 = vpop.f32.mrf.mxu0 }
 0x1ba   : > { %4072 = vst.msk [vmem:[#allocation2 + $0x90] sm:$0xff] %vm340_vm0, %v4036_v53  ;;  %3535 = vst.msk [vmem:[#allocation2 + $0xa0] sm:$0xff] %vm340_vm0, %v3499_v13  ;;  %v4034_v29 = vadd.f32 %v3998_v59, %v3903_v5  ;;  %v3502_v30 = vadd.f32 %v6612_v43, %v3466_v25  ;;  %v3477_v53 = vld [vmem:[#allocation2 + $0x110] sm:$0xff] }
 0x1bb   : > { %v4001_v31 = vld [vmem:[#allocation2 + $0x98] sm:$0xff]  ;;  %v3383_v34 = vpop.f32.mrf.mxu1  ;;  %v3906_v32 = vpop.f32.mrf.mxu0 }
 0x1bc   : > { %4070 = vst.msk [vmem:[#allocation2 + $0x80] sm:$0xff] %vm340_vm0, %v4034_v29  ;;  %3538 = vst.msk [vmem:[#allocation2 + $0xb8] sm:$0xff] %vm340_vm0, %v3502_v30  ;;  %v4037_v36 = vadd.f32 %v6652_v28, %v4001_v31  ;;  %v3500_v62 = vadd.f32 %v3464_v18, %v3383_v34  ;;  %v3475_v29 = vld [vmem:[#allocation2 + $0x100] sm:$0xff] }
 0x1bd   : > { %v3999_v26 = vld [vmem:[#allocation2 + $0x88] sm:$0xff]  ;;  %v6615_v27 = vpop.f32.mrf.mxu1  ;;  %v6655_v33 = vpop.f32.mrf.mxu0 }
 0x1be   : > { %4073 = vst.msk [vmem:[#allocation2 + $0x98] sm:$0xff] %vm340_vm0, %v4037_v36  ;;  %3536 = vst.msk [vmem:[#allocation2 + $0xa8] sm:$0xff] %vm340_vm0, %v3500_v62  ;;  %v4035_v38 = vadd.f32 %v3999_v26, %v3906_v32  ;;  %v3505_v41 = vadd.f32 %v6615_v27, %v3469_v19  ;;  %v3478_v36 = vld [vmem:[#allocation2 + $0x118] sm:$0xff] }
 0x1bf   : > { %v4004_v42 = vld [vmem:[#allocation2 + $0xb0] sm:$0xff]  ;;  %v3396_v44 = vpop.f32.mrf.mxu1  ;;  %v3919_v47 = vpop.f32.mrf.mxu0 }
 0x1c0   : > { %4071 = vst.msk [vmem:[#allocation2 + $0x88] sm:$0xff] %vm340_vm0, %v4035_v38  ;;  %3541 = vst.msk [vmem:[#allocation2 + $0xd0] sm:$0xff] %vm340_vm0, %v3505_v41  ;;  %v4040_v50 = vadd.f32 %v6655_v33, %v4004_v42  ;;  %v3503_v49 = vadd.f32 %v3467_v46, %v3396_v44  ;;  %v3476_v38 = vld [vmem:[#allocation2 + $0x108] sm:$0xff] }
 0x1c1   : > { %v4002_v14 = vld [vmem:[#allocation2 + $0xa0] sm:$0xff]  ;;  %v6616_v23 = vpop.f32.mrf.mxu1  ;;  %v6656_v40 = vpop.f32.mrf.mxu0 }
 0x1c2   : > { %4076 = vst.msk [vmem:[#allocation2 + $0xb0] sm:$0xff] %vm340_vm0, %v4040_v50  ;;  %3539 = vst.msk [vmem:[#allocation2 + $0xc0] sm:$0xff] %vm340_vm0, %v3503_v49  ;;  %v4038_v51 = vadd.f32 %v4002_v14, %v3919_v47  ;;  %v3506_v52 = vadd.f32 %v6616_v23, %v3470_v39  ;;  %v4657_v49 = vld [vmem:[#allocation2 + $0x10] sm:$0xff] }
 0x1c3   : > { %v4005_v45 = vld [vmem:[#allocation2 + $0xb8] sm:$0xff]  ;;  %v3399_v54 = vpop.f32.mrf.mxu1  ;;  %v3922_v56 = vpop.f32.mrf.mxu0 }
 0x1c4   : > { %4074 = vst.msk [vmem:[#allocation2 + $0xa0] sm:$0xff] %vm340_vm0, %v4038_v51  ;;  %3542 = vst.msk [vmem:[#allocation2 + $0xd8] sm:$0xff] %vm340_vm0, %v3506_v52  ;;  %v4041_v57 = vadd.f32 %v6656_v40, %v4005_v45  ;;  %v3504_v58 = vadd.f32 %v3468_v55, %v3399_v54  ;;  %v4655_v52 = vld [vmem:[#allocation2] sm:$0xff] }
 0x1c5   : > { %v4003_v63 = vld [vmem:[#allocation2 + $0xa8] sm:$0xff]  ;;  %v6619_v61 = vpop.f32.mrf.mxu1  ;;  %v6659_v35 = vpop.f32.mrf.mxu0 }
 0x1c6   : > { %4077 = vst.msk [vmem:[#allocation2 + $0xb8] sm:$0xff] %vm340_vm0, %v4041_v57  ;;  %3540 = vst.msk [vmem:[#allocation2 + $0xc8] sm:$0xff] %vm340_vm0, %v3504_v58  ;;  %v4039_v1 = vadd.f32 %v4003_v63, %v3922_v56  ;;  %v3509_v24 = vadd.f32 %v6619_v61, %v3473_v0  ;;  %v4658_v58 = vld [vmem:[#allocation2 + $0x18] sm:$0xff] }
 0x1c7   : > { %v4008_v3 = vld [vmem:[#allocation2 + $0xd0] sm:$0xff]  ;;  %v3412_v4 = vpop.f32.mrf.mxu1  ;;  %v3935_v7 = vpop.f32.mrf.mxu0 }
 0x1c8   : > { %4075 = vst.msk [vmem:[#allocation2 + $0xa8] sm:$0xff] %vm340_vm0, %v4039_v1  ;;  %3545 = vst.msk [vmem:[#allocation2 + $0xf0] sm:$0xff] %vm340_vm0, %v3509_v24  ;;  %v4044_v8 = vadd.f32 %v6659_v35, %v4008_v3  ;;  %v3507_v9 = vadd.f32 %v3471_v6, %v3412_v4  ;;  %v4656_v24 = vld [vmem:[#allocation2 + $0x8] sm:$0xff] }
 0x1c9   : > { %v4006_v48 = vld [vmem:[#allocation2 + $0xc0] sm:$0xff]  ;;  %v6620_v2 = vpop.f32.mrf.mxu1  ;;  %v6660_v37 = vpop.f32.mrf.mxu0 }
 0x1ca   : > { %4080 = vst.msk [vmem:[#allocation2 + $0xd0] sm:$0xff] %vm340_vm0, %v4044_v8  ;;  %3543 = vst.msk [vmem:[#allocation2 + $0xe0] sm:$0xff] %vm340_vm0, %v3507_v9  ;;  %v4042_v60 = vadd.f32 %v4006_v48, %v3935_v7  ;;  %v3510_v11 = vadd.f32 %v6620_v2, %v3474_v10  ;;  %v4661_v8 = vld [vmem:[#allocation2 + $0x30] sm:$0xff] }
 0x1cb   : > { %v4009_v12 = vld [vmem:[#allocation2 + $0xd8] sm:$0xff]  ;;  %v3415_v15 = vpop.f32.mrf.mxu1  ;;  %v3938_v17 = vpop.f32.mrf.mxu0 }
 0x1cc   : > { %4078 = vst.msk [vmem:[#allocation2 + $0xc0] sm:$0xff] %vm340_vm0, %v4042_v60  ;;  %3546 = vst.msk [vmem:[#allocation2 + $0xf8] sm:$0xff] %vm340_vm0, %v3510_v11  ;;  %v4045_v20 = vadd.f32 %v6660_v37, %v4009_v12  ;;  %v3508_v21 = vadd.f32 %v3472_v16, %v3415_v15  ;;  %v4659_v60 = vld [vmem:[#allocation2 + $0x20] sm:$0xff] }
 0x1cd   : > { %v4007_v22 = vld [vmem:[#allocation2 + $0xc8] sm:$0xff]  ;;  %v6623_v5 = vpop.f32.mrf.mxu1  ;;  %v6663_v13 = vpop.f32.mrf.mxu0 }
 0x1ce   : > { %4081 = vst.msk [vmem:[#allocation2 + $0xd8] sm:$0xff] %vm340_vm0, %v4045_v20  ;;  %3544 = vst.msk [vmem:[#allocation2 + $0xe8] sm:$0xff] %vm340_vm0, %v3508_v21  ;;  %v4043_v59 = vadd.f32 %v4007_v22, %v3938_v17  ;;  %v3513_v43 = vadd.f32 %v6623_v5, %v3477_v53  ;;  %v4662_v20 = vld [vmem:[#allocation2 + $0x38] sm:$0xff] }
 0x1cf   : > { %v4012_v25 = vld [vmem:[#allocation2 + $0xf0] sm:$0xff]  ;;  %v3428_v28 = vpop.f32.mrf.mxu1  ;;  %v3951_v30 = vpop.f32.mrf.mxu0 }
 0x1d0   : > { %4079 = vst.msk [vmem:[#allocation2 + $0xc8] sm:$0xff] %vm340_vm0, %v4043_v59  ;;  %3549 = vst.msk [vmem:[#allocation2 + $0x110] sm:$0xff] %vm340_vm0, %v3513_v43  ;;  %v4048_v31 = vadd.f32 %v6663_v13, %v4012_v25  ;;  %v3511_v34 = vadd.f32 %v3475_v29, %v3428_v28  ;;  %v4660_v59 = vld [vmem:[#allocation2 + $0x28] sm:$0xff] }
 0x1d1   : > { %v4010_v18 = vld [vmem:[#allocation2 + $0xe0] sm:$0xff]  ;;  %v6624_v32 = vpop.f32.mrf.mxu1  ;;  %v6664_v62 = vpop.f32.mrf.mxu0 }
 0x1d2   : > { %4084 = vst.msk [vmem:[#allocation2 + $0xf0] sm:$0xff] %vm340_vm0, %v4048_v31  ;;  %3547 = vst.msk [vmem:[#allocation2 + $0x100] sm:$0xff] %vm340_vm0, %v3511_v34  ;;  %v4046_v26 = vadd.f32 %v4010_v18, %v3951_v30  ;;  %v3514_v27 = vadd.f32 %v6624_v32, %v3478_v36  ;;  %v4665_v31 = vld [vmem:[#allocation2 + $0x50] sm:$0xff] }
 0x1d3   : > { %v4013_v19 = vld [vmem:[#allocation2 + $0xf8] sm:$0xff]  ;;  %v3431_v33 = vpop.f32.mrf.mxu1  ;;  %v3954_v41 = vpop.f32.mrf.mxu0 }
 0x1d4   : > { %4082 = vst.msk [vmem:[#allocation2 + $0xe0] sm:$0xff] %vm340_vm0, %v4046_v26  ;;  %3550 = vst.msk [vmem:[#allocation2 + $0x118] sm:$0xff] %vm340_vm0, %v3514_v27  ;;  %v4049_v42 = vadd.f32 %v6664_v62, %v4013_v19  ;;  %v3512_v44 = vadd.f32 %v3476_v38, %v3431_v33  ;;  %v4663_v26 = vld [vmem:[#allocation2 + $0x40] sm:$0xff] }
 0x1d5   : > { %v4011_v46 = vld [vmem:[#allocation2 + $0xe8] sm:$0xff]  ;;  %v6667_v47 = vpop.f32.mrf.mxu0  ;;  %v6679_v50 = vpop.f32.mrf.mxu1 }
 0x1d6   : > { %4085 = vst.msk [vmem:[#allocation2 + $0xf8] sm:$0xff] %vm340_vm0, %v4049_v42  ;;  %3548 = vst.msk [vmem:[#allocation2 + $0x108] sm:$0xff] %vm340_vm0, %v3512_v44  ;;  %v4047_v14 = vadd.f32 %v4011_v46, %v3954_v41  ;;  %v4693_v23 = vadd.f32 %v6679_v50, %v4657_v49  ;;  %v4666_v44 = vld [vmem:[#allocation2 + $0x58] sm:$0xff] }
 0x1d7   : > { %v4016_v39 = vld [vmem:[#allocation2 + $0x110] sm:$0xff]  ;;  %v3967_v40 = vpop.f32.mrf.mxu0  ;;  %v4512_v51 = vpop.f32.mrf.mxu1 }
 0x1d8   : > { %4083 = vst.msk [vmem:[#allocation2 + $0xe8] sm:$0xff] %vm340_vm0, %v4047_v14  ;;  %v4052_v45 = vadd.f32 %v6667_v47, %v4016_v39  ;;  %4729 = vst.msk [vmem:[#allocation2 + $0x10] sm:$0xff] %vm340_vm0, %v4693_v23  ;;  %v4691_v54 = vadd.f32 %v4655_v52, %v4512_v51 }
 0x1d9   : > { %v4014_v55 = vld [vmem:[#allocation2 + $0x100] sm:$0xff]  ;;  %v6668_v56 = vpop.f32.mrf.mxu0  ;;  %v6680_v57 = vpop.f32.mrf.mxu1 }
 0x1da   : > { %4088 = vst.msk [vmem:[#allocation2 + $0x110] sm:$0xff] %vm340_vm0, %v4052_v45  ;;  %v4050_v63 = vadd.f32 %v4014_v55, %v3967_v40  ;;  %4727 = vst.msk [vmem:[#allocation2] sm:$0xff] %vm340_vm0, %v4691_v54  ;;  %v4694_v61 = vadd.f32 %v6680_v57, %v4658_v58  ;;  %v4664_v40 = vld [vmem:[#allocation2 + $0x48] sm:$0xff] }
 0x1db   : > { %v4017_v0 = vld [vmem:[#allocation2 + $0x118] sm:$0xff]  ;;  %v3970_v35 = vpop.f32.mrf.mxu0  ;;  %v4515_v1 = vpop.f32.mrf.mxu1 }
 0x1dc   : > { %4086 = vst.msk [vmem:[#allocation2 + $0x100] sm:$0xff] %vm340_vm0, %v4050_v63  ;;  %v4053_v3 = vadd.f32 %v6668_v56, %v4017_v0  ;;  %4730 = vst.msk [vmem:[#allocation2 + $0x18] sm:$0xff] %vm340_vm0, %v4694_v61  ;;  %v4692_v4 = vadd.f32 %v4656_v24, %v4515_v1  ;;  %v4669_v63 = vld [vmem:[#allocation2 + $0x70] sm:$0xff] }
 0x1dd   : > { %v4015_v6 = vld [vmem:[#allocation2 + $0x108] sm:$0xff]  ;;  %v6683_v7 = vpop.f32.mrf.mxu1  ;;  %v6723_v9 = vpop.f32.mrf.mxu0 }
 0x1de   : > { %4089 = vst.msk [vmem:[#allocation2 + $0x118] sm:$0xff] %vm340_vm0, %v4053_v3  ;;  %v4051_v48 = vadd.f32 %v4015_v6, %v3970_v35  ;;  %4728 = vst.msk [vmem:[#allocation2 + $0x8] sm:$0xff] %vm340_vm0, %v4692_v4  ;;  %v4697_v2 = vadd.f32 %v6683_v7, %v4661_v8  ;;  %v4667_v7 = vld [vmem:[#allocation2 + $0x60] sm:$0xff] }
 0x1df   : > { %v5197_v10 = vld [vmem:[#allocation2 + $0x10] sm:$0xff]  ;;  %v4528_v37 = vpop.f32.mrf.mxu1  ;;  %v5052_v11 = vpop.f32.mrf.mxu0 }
 0x1e0   : > { %4087 = vst.msk [vmem:[#allocation2 + $0x108] sm:$0xff] %vm340_vm0, %v4051_v48  ;;  %4733 = vst.msk [vmem:[#allocation2 + $0x30] sm:$0xff] %vm340_vm0, %v4697_v2  ;;  %v5233_v12 = vadd.f32 %v6723_v9, %v5197_v10  ;;  %v4695_v15 = vadd.f32 %v4659_v60, %v4528_v37 }
 0x1e1   : > { %v5195_v16 = vld [vmem:[#allocation2] sm:$0xff]  ;;  %v6684_v17 = vpop.f32.mrf.mxu1  ;;  %v6724_v21 = vpop.f32.mrf.mxu0 }
 0x1e2   : > { %5269 = vst.msk [vmem:[#allocation2 + $0x10] sm:$0xff] %vm340_vm0, %v5233_v12  ;;  %4731 = vst.msk [vmem:[#allocation2 + $0x20] sm:$0xff] %vm340_vm0, %v4695_v15  ;;  %v5231_v22 = vadd.f32 %v5195_v16, %v5052_v11  ;;  %v4698_v5 = vadd.f32 %v6684_v17, %v4662_v20  ;;  %v4670_v12 = vld [vmem:[#allocation2 + $0x78] sm:$0xff] }
 0x1e3   : > { %v5198_v53 = vld [vmem:[#allocation2 + $0x18] sm:$0xff]  ;;  %v4531_v13 = vpop.f32.mrf.mxu1  ;;  %v5055_v43 = vpop.f32.mrf.mxu0 }
 0x1e4   : > { %5267 = vst.msk [vmem:[#allocation2] sm:$0xff] %vm340_vm0, %v5231_v22  ;;  %4734 = vst.msk [vmem:[#allocation2 + $0x38] sm:$0xff] %vm340_vm0, %v4698_v5  ;;  %v5234_v25 = vadd.f32 %v6724_v21, %v5198_v53  ;;  %v4696_v28 = vadd.f32 %v4660_v59, %v4531_v13  ;;  %v4668_v13 = vld [vmem:[#allocation2 + $0x68] sm:$0xff] }
 0x1e5   : > { %v5196_v29 = vld [vmem:[#allocation2 + $0x8] sm:$0xff]  ;;  %v6687_v30 = vpop.f32.mrf.mxu1  ;;  %v6727_v34 = vpop.f32.mrf.mxu0 }
 0x1e6   : > { %5270 = vst.msk [vmem:[#allocation2 + $0x18] sm:$0xff] %vm340_vm0, %v5234_v25  ;;  %4732 = vst.msk [vmem:[#allocation2 + $0x28] sm:$0xff] %vm340_vm0, %v4696_v28  ;;  %v5232_v18 = vadd.f32 %v5196_v29, %v5055_v43  ;;  %v4701_v32 = vadd.f32 %v6687_v30, %v4665_v31 }
 0x1e7   : > { %v5201_v36 = vld [vmem:[#allocation2 + $0x30] sm:$0xff]  ;;  %v4544_v62 = vpop.f32.mrf.mxu1  ;;  %v5068_v27 = vpop.f32.mrf.mxu0 }
 0x1e8   : > { %5268 = vst.msk [vmem:[#allocation2 + $0x8] sm:$0xff] %vm340_vm0, %v5232_v18  ;;  %4737 = vst.msk [vmem:[#allocation2 + $0x50] sm:$0xff] %vm340_vm0, %v4701_v32  ;;  %v5237_v19 = vadd.f32 %v6727_v34, %v5201_v36  ;;  %v4699_v33 = vadd.f32 %v4663_v26, %v4544_v62  ;;  %v4673_v18 = vld [vmem:[#allocation2 + $0x90] sm:$0xff] }
 0x1e9   : > { %v5305_v38 = vld [vmem:[#allocation2 + $0x10] sm:$0xff]  ;;  %v5199_v41 = vld [vmem:[#allocation2 + $0x20] sm:$0xff]  ;;  %v6688_v42 = vpop.f32.mrf.mxu1  ;;  %v6728_v46 = vpop.f32.mrf.mxu0 }
 0x1ea   : > { %v5341_v47 = vmax.f32 %v5305_v38, 0.0  ;;  %5273 = vst.msk [vmem:[#allocation2 + $0x30] sm:$0xff] %vm340_vm0, %v5237_v19  ;;  %4735 = vst.msk [vmem:[#allocation2 + $0x40] sm:$0xff] %vm340_vm0, %v4699_v33  ;;  %v5235_v50 = vadd.f32 %v5199_v41, %v5068_v27  ;;  %v4702_v49 = vadd.f32 %v6688_v42, %v4666_v44  ;;  %v4671_v41 = vld [vmem:[#allocation2 + $0x80] sm:$0xff] }
 0x1eb   : > { %v5303_v14 = vld [vmem:[#allocation2] sm:$0xff]  ;;  %v5202_v23 = vld [vmem:[#allocation2 + $0x38] sm:$0xff]  ;;  %v4547_v39 = vpop.f32.mrf.mxu1  ;;  %v5071_v51 = vpop.f32.mrf.mxu0 }
 0x1ec   : > { %v6129_v52 = vpack.c.bf16 %v5341_v47, %v5341_v47  ;;  %v5339_v45 = vmax.f32 %v5303_v14, 0.0  ;;  %5271 = vst.msk [vmem:[#allocation2 + $0x20] sm:$0xff] %vm340_vm0, %v5235_v50  ;;  %4738 = vst.msk [vmem:[#allocation2 + $0x58] sm:$0xff] %vm340_vm0, %v4702_v49  ;;  %v5238_v54 = vadd.f32 %v6728_v46, %v5202_v23  ;;  %v4700_v55 = vadd.f32 %v4664_v40, %v4547_v39  ;;  %v4674_v39 = vld [vmem:[#allocation2 + $0x98] sm:$0xff] }
 0x1ed   : > { %v5306_v56 = vld [vmem:[#allocation2 + $0x18] sm:$0xff]  ;;  %v5200_v57 = vld [vmem:[#allocation2 + $0x28] sm:$0xff]  ;;  %v6691_v58 = vpop.f32.mrf.mxu1  ;;  %v6731_v61 = vpop.f32.mrf.mxu0 }
 0x1ee   : > { %5522 = vst.msk [vmem:[%s8095_s20 + $0x8] sm:$0xf] %vm5519_vm7, %v6129_v52  ;;  %v6127_v0 = vpack.c.bf16 %v5339_v45, %v5339_v45  ;;  %v5342_v35 = vmax.f32 %v5306_v56, 0.0  ;;  %v5236_v1 = vadd.f32 %v5200_v57, %v5071_v51  ;;  %v4705_v24 = vadd.f32 %v6691_v58, %v4669_v63  ;;  %v4672_v58 = vld [vmem:[#allocation2 + $0x88] sm:$0xff] }
 0x1ef   : > { %5274 = vst.msk [vmem:[#allocation2 + $0x38] sm:$0xff] %vm340_vm0, %v5238_v54  ;;  %4736 = vst.msk [vmem:[#allocation2 + $0x48] sm:$0xff] %vm340_vm0, %v4700_v55  ;;  %v5304_v3 = vld [vmem:[#allocation2 + $0x8] sm:$0xff]  ;;  %v5205_v4 = vld [vmem:[#allocation2 + $0x50] sm:$0xff]  ;;  %v4560_v6 = vpop.f32.mrf.mxu1  ;;  %v5084_v8 = vpop.f32.mrf.mxu0 }
 0x1f0   : > { %5520 = vst.msk [vmem:[%s8095_s20] sm:$0xf] %vm5519_vm7, %v6127_v0  ;;  %v6130_v9 = vpack.c.bf16 %v5342_v35, %v5342_v35  ;;  %v5340_v48 = vmax.f32 %v5304_v3, 0.0  ;;  %v5241_v2 = vadd.f32 %v6731_v61, %v5205_v4  ;;  %v4703_v10 = vadd.f32 %v4667_v7, %v4560_v6  ;;  %v4677_v6 = vld [vmem:[#allocation2 + $0xb0] sm:$0xff] }
 0x1f1   : > { %5272 = vst.msk [vmem:[#allocation2 + $0x28] sm:$0xff] %vm340_vm0, %v5236_v1  ;;  %4741 = vst.msk [vmem:[#allocation2 + $0x70] sm:$0xff] %vm340_vm0, %v4705_v24  ;;  %v5309_v37 = vld [vmem:[#allocation2 + $0x30] sm:$0xff]  ;;  %v5203_v60 = vld [vmem:[#allocation2 + $0x40] sm:$0xff]  ;;  %v6692_v11 = vpop.f32.mrf.mxu1  ;;  %v6732_v15 = vpop.f32.mrf.mxu0 }
 0x1f2   : > { %5523 = vst.msk [vmem:[%s8095_s20 + $0xc] sm:$0xf] %vm5519_vm7, %v6130_v9  ;;  %v6128_v16 = vpack.c.bf16 %v5340_v48, %v5340_v48  ;;  %v5345_v17 = vmax.f32 %v5309_v37, 0.0  ;;  %v5239_v20 = vadd.f32 %v5203_v60, %v5084_v8  ;;  %v4706_v21 = vadd.f32 %v6692_v11, %v4670_v12  ;;  %v4675_v11 = vld [vmem:[#allocation2 + $0xa0] sm:$0xff] }
 0x1f3   : > { %5277 = vst.msk [vmem:[#allocation2 + $0x50] sm:$0xff] %vm340_vm0, %v5241_v2  ;;  %4739 = vst.msk [vmem:[#allocation2 + $0x60] sm:$0xff] %vm340_vm0, %v4703_v10  ;;  %v5307_v22 = vld [vmem:[#allocation2 + $0x20] sm:$0xff]  ;;  %v5206_v5 = vld [vmem:[#allocation2 + $0x58] sm:$0xff]  ;;  %v4563_v53 = vpop.f32.mrf.mxu1  ;;  %v5087_v59 = vpop.f32.mrf.mxu0 }
 0x1f4   : > { %5521 = vst.msk [vmem:[%s8095_s20 + $0x4] sm:$0xf] %vm5519_vm7, %v6128_v16  ;;  %v6133_v43 = vpack.c.bf16 %v5345_v17, %v5345_v17  ;;  %v5343_v25 = vmax.f32 %v5307_v22, 0.0  ;;  %v5242_v28 = vadd.f32 %v6732_v15, %v5206_v5  ;;  %v4704_v29 = vadd.f32 %v4668_v13, %v4563_v53  ;;  %v4678_v53 = vld [vmem:[#allocation2 + $0xb8] sm:$0xff] }
 0x1f5   : > { %5275 = vst.msk [vmem:[#allocation2 + $0x40] sm:$0xff] %vm340_vm0, %v5239_v20  ;;  %4742 = vst.msk [vmem:[#allocation2 + $0x78] sm:$0xff] %vm340_vm0, %v4706_v21  ;;  %v6695_v34 = vpop.f32.mrf.mxu1  ;;  %v6735_v32 = vpop.f32.mrf.mxu0 }
 0x1f6   : > { %v5310_v30 = vld [vmem:[#allocation2 + $0x38] sm:$0xff]  ;;  %v5204_v31 = vld [vmem:[#allocation2 + $0x48] sm:$0xff]  ;;  %5526 = vst.msk [vmem:[%s8095_s20 + $0x18] sm:$0xf] %vm5519_vm7, %v6133_v43  ;;  %v6131_v36 = vpack.c.bf16 %v5343_v25, %v5343_v25  ;;  %v4709_v27 = vadd.f32 %v6695_v34, %v4673_v18 }
 0x1f7   : > { %v5346_v62 = vmax.f32 %v5310_v30, 0.0  ;;  %5278 = vst.msk [vmem:[#allocation2 + $0x58] sm:$0xff] %vm340_vm0, %v5242_v28  ;;  %4740 = vst.msk [vmem:[#allocation2 + $0x68] sm:$0xff] %vm340_vm0, %v4704_v29  ;;  %v5240_v26 = vadd.f32 %v5204_v31, %v5087_v59  ;;  %v4576_v38 = vpop.f32.mrf.mxu1  ;;  %v5100_v42 = vpop.f32.mrf.mxu0  ;;  %v4676_v34 = vld [vmem:[#allocation2 + $0xa8] sm:$0xff] }
 0x1f8   : > { %v5308_v19 = vld [vmem:[#allocation2 + $0x28] sm:$0xff]  ;;  %v5209_v33 = vld [vmem:[#allocation2 + $0x70] sm:$0xff]  ;;  %5524 = vst.msk [vmem:[%s8095_s20 + $0x10] sm:$0xf] %vm5519_vm7, %v6131_v36  ;;  %v4707_v50 = vadd.f32 %v4671_v41, %v4576_v38 }
 0x1f9   : > { %v6134_v44 = vpack.c.bf16 %v5346_v62, %v5346_v62  ;;  %v5344_v46 = vmax.f32 %v5308_v19, 0.0  ;;  %5276 = vst.msk [vmem:[#allocation2 + $0x48] sm:$0xff] %vm340_vm0, %v5240_v26  ;;  %4745 = vst.msk [vmem:[#allocation2 + $0x90] sm:$0xff] %vm340_vm0, %v4709_v27  ;;  %v5245_v47 = vadd.f32 %v6735_v32, %v5209_v33  ;;  %v6696_v23 = vpop.f32.mrf.mxu1  ;;  %v6736_v40 = vpop.f32.mrf.mxu0  ;;  %v4681_v38 = vld [vmem:[#allocation2 + $0xd0] sm:$0xff] }
 0x1fa   : > { %v5313_v49 = vld [vmem:[#allocation2 + $0x50] sm:$0xff]  ;;  %v5207_v14 = vld [vmem:[#allocation2 + $0x60] sm:$0xff]  ;;  %4743 = vst.msk [vmem:[#allocation2 + $0x80] sm:$0xff] %vm340_vm0, %v4707_v50  ;;  %v4710_v54 = vadd.f32 %v6696_v23, %v4674_v39 }
 0x1fb   : > { %5527 = vst.msk [vmem:[%s8095_s20 + $0x1c] sm:$0xf] %vm5519_vm7, %v6134_v44  ;;  %v6132_v51 = vpack.c.bf16 %v5344_v46, %v5344_v46  ;;  %v5349_v52 = vmax.f32 %v5313_v49, 0.0  ;;  %v5243_v45 = vadd.f32 %v5207_v14, %v5100_v42  ;;  %v4579_v57 = vpop.f32.mrf.mxu1  ;;  %v5103_v63 = vpop.f32.mrf.mxu0  ;;  %v4679_v23 = vld [vmem:[#allocation2 + $0xc0] sm:$0xff] }
 0x1fc   : > { %5281 = vst.msk [vmem:[#allocation2 + $0x70] sm:$0xff] %vm340_vm0, %v5245_v47  ;;  %v5311_v55 = vld [vmem:[#allocation2 + $0x40] sm:$0xff]  ;;  %v5210_v56 = vld [vmem:[#allocation2 + $0x78] sm:$0xff]  ;;  %4746 = vst.msk [vmem:[#allocation2 + $0x98] sm:$0xff] %vm340_vm0, %v4710_v54  ;;  %v4708_v1 = vadd.f32 %v4672_v58, %v4579_v57 }
 0x1fd   : > { %5525 = vst.msk [vmem:[%s8095_s20 + $0x14] sm:$0xf] %vm5519_vm7, %v6132_v51  ;;  %v6137_v61 = vpack.c.bf16 %v5349_v52, %v5349_v52  ;;  %v5347_v0 = vmax.f32 %v5311_v55, 0.0  ;;  %v5246_v35 = vadd.f32 %v6736_v40, %v5210_v56  ;;  %v6699_v4 = vpop.f32.mrf.mxu1  ;;  %v6739_v7 = vpop.f32.mrf.mxu0  ;;  %v4682_v57 = vld [vmem:[#allocation2 + $0xd8] sm:$0xff] }
 0x1fe   : > { %5279 = vst.msk [vmem:[#allocation2 + $0x60] sm:$0xff] %vm340_vm0, %v5243_v45  ;;  %v5314_v24 = vld [vmem:[#allocation2 + $0x58] sm:$0xff]  ;;  %v5208_v3 = vld [vmem:[#allocation2 + $0x68] sm:$0xff]  ;;  %4744 = vst.msk [vmem:[#allocation2 + $0x88] sm:$0xff] %vm340_vm0, %v4708_v1  ;;  %v4713_v2 = vadd.f32 %v6699_v4, %v4677_v6 }
 0x1ff   : > { %5530 = vst.msk [vmem:[%s8095_s20 + $0x28] sm:$0xf] %vm5519_vm7, %v6137_v61  ;;  %v6135_v8 = vpack.c.bf16 %v5347_v0, %v5347_v0  ;;  %v5350_v9 = vmax.f32 %v5314_v24, 0.0  ;;  %v5244_v48 = vadd.f32 %v5208_v3, %v5103_v63  ;;  %v4592_v60 = vpop.f32.mrf.mxu1  ;;  %v5116_v12 = vpop.f32.mrf.mxu0  ;;  %v4680_v4 = vld [vmem:[#allocation2 + $0xc8] sm:$0xff] }
 0x200   : > { %5282 = vst.msk [vmem:[#allocation2 + $0x78] sm:$0xff] %vm340_vm0, %v5246_v35  ;;  %v5312_v10 = vld [vmem:[#allocation2 + $0x48] sm:$0xff]  ;;  %v5213_v37 = vld [vmem:[#allocation2 + $0x90] sm:$0xff]  ;;  %4749 = vst.msk [vmem:[#allocation2 + $0xb0] sm:$0xff] %vm340_vm0, %v4713_v2  ;;  %v4711_v20 = vadd.f32 %v4675_v11, %v4592_v60 }
 0x201   : > { %5528 = vst.msk [vmem:[%s8095_s20 + $0x20] sm:$0xf] %vm5519_vm7, %v6135_v8  ;;  %v6138_v15 = vpack.c.bf16 %v5350_v9, %v5350_v9  ;;  %v5348_v16 = vmax.f32 %v5312_v10, 0.0  ;;  %v5249_v17 = vadd.f32 %v6739_v7, %v5213_v37  ;;  %v5211_v22 = vld [vmem:[#allocation2 + $0x80] sm:$0xff]  ;;  %v6700_v5 = vpop.f32.mrf.mxu1  ;;  %v6740_v13 = vpop.f32.mrf.mxu0  ;;  %v4685_v60 = vld [vmem:[#allocation2 + $0xf0] sm:$0xff] }
 0x202   : > { %5280 = vst.msk [vmem:[#allocation2 + $0x68] sm:$0xff] %vm340_vm0, %v5244_v48  ;;  %4747 = vst.msk [vmem:[#allocation2 + $0xa0] sm:$0xff] %vm340_vm0, %v4711_v20  ;;  %v5247_v25 = vadd.f32 %v5211_v22, %v5116_v12  ;;  %v4714_v28 = vadd.f32 %v6700_v5, %v4678_v53  ;;  %v4683_v5 = vld [vmem:[#allocation2 + $0xe0] sm:$0xff] }
 0x203   : > { %v5317_v21 = vld [vmem:[#allocation2 + $0x70] sm:$0xff]  ;;  %5531 = vst.msk [vmem:[%s8095_s20 + $0x2c] sm:$0xf] %vm5519_vm7, %v6138_v15  ;;  %v6136_v59 = vpack.c.bf16 %v5348_v16, %v5348_v16  ;;  %v5214_v30 = vld [vmem:[#allocation2 + $0x98] sm:$0xff]  ;;  %v4595_v31 = vpop.f32.mrf.mxu1  ;;  %v5119_v18 = vpop.f32.mrf.mxu0 }
 0x204   : > { %v5353_v43 = vmax.f32 %v5317_v21, 0.0  ;;  %5285 = vst.msk [vmem:[#allocation2 + $0x90] sm:$0xff] %vm340_vm0, %v5249_v17  ;;  %5283 = vst.msk [vmem:[#allocation2 + $0x80] sm:$0xff] %vm340_vm0, %v5247_v25  ;;  %v5250_v62 = vadd.f32 %v6740_v13, %v5214_v30  ;;  %v4712_v26 = vadd.f32 %v4676_v34, %v4595_v31  ;;  %v4686_v31 = vld [vmem:[#allocation2 + $0xf8] sm:$0xff] }
 0x205   : > { %v5315_v29 = vld [vmem:[#allocation2 + $0x60] sm:$0xff]  ;;  %5529 = vst.msk [vmem:[%s8095_s20 + $0x24] sm:$0xf] %vm5519_vm7, %v6136_v59  ;;  %v5212_v19 = vld [vmem:[#allocation2 + $0x88] sm:$0xff]  ;;  %v6703_v33 = vpop.f32.mrf.mxu1  ;;  %v6743_v41 = vpop.f32.mrf.mxu0 }
 0x206   : > { %v6141_v32 = vpack.c.bf16 %v5353_v43, %v5353_v43  ;;  %v5351_v36 = vmax.f32 %v5315_v29, 0.0  ;;  %4750 = vst.msk [vmem:[#allocation2 + $0xb8] sm:$0xff] %vm340_vm0, %v4714_v28  ;;  %5286 = vst.msk [vmem:[#allocation2 + $0x98] sm:$0xff] %vm340_vm0, %v5250_v62  ;;  %v5248_v46 = vadd.f32 %v5212_v19, %v5119_v18  ;;  %v4717_v47 = vadd.f32 %v6703_v33, %v4681_v38  ;;  %v4684_v33 = vld [vmem:[#allocation2 + $0xe8] sm:$0xff] }
 0x207   : > { %v5318_v27 = vld [vmem:[#allocation2 + $0x78] sm:$0xff]  ;;  %4748 = vst.msk [vmem:[#allocation2 + $0xa8] sm:$0xff] %vm340_vm0, %v4712_v26  ;;  %v5217_v49 = vld [vmem:[#allocation2 + $0xb0] sm:$0xff]  ;;  %v4608_v14 = vpop.f32.mrf.mxu1  ;;  %v5132_v39 = vpop.f32.mrf.mxu0 }
 0x208   : > { %5534 = vst.msk [vmem:[%s8095_s20 + $0x38] sm:$0xf] %vm5519_vm7, %v6141_v32  ;;  %v6139_v42 = vpack.c.bf16 %v5351_v36, %v5351_v36  ;;  %v5354_v44 = vmax.f32 %v5318_v27, 0.0  ;;  %v5253_v52 = vadd.f32 %v6743_v41, %v5217_v49  ;;  %v4715_v45 = vadd.f32 %v4679_v23, %v4608_v14  ;;  %v4689_v14 = vld [vmem:[#allocation2 + $0x110] sm:$0xff] }
 0x209   : > { %v5316_v50 = vld [vmem:[#allocation2 + $0x68] sm:$0xff]  ;;  %5284 = vst.msk [vmem:[#allocation2 + $0x88] sm:$0xff] %vm340_vm0, %v5248_v46  ;;  %4753 = vst.msk [vmem:[#allocation2 + $0xd0] sm:$0xff] %vm340_vm0, %v4717_v47  ;;  %v5215_v55 = vld [vmem:[#allocation2 + $0xa0] sm:$0xff]  ;;  %v6704_v56 = vpop.f32.mrf.mxu1  ;;  %v6744_v58 = vpop.f32.mrf.mxu0 }
 0x20a   : > { %5532 = vst.msk [vmem:[%s8095_s20 + $0x30] sm:$0xf] %vm5519_vm7, %v6139_v42  ;;  %v6142_v40 = vpack.c.bf16 %v5354_v44, %v5354_v44  ;;  %v5352_v51 = vmax.f32 %v5316_v50, 0.0  ;;  %v5251_v0 = vadd.f32 %v5215_v55, %v5132_v39  ;;  %v4718_v35 = vadd.f32 %v6704_v56, %v4682_v57  ;;  %v4687_v56 = vld [vmem:[#allocation2 + $0x100] sm:$0xff] }
 0x20b   : > { %v5321_v54 = vld [vmem:[#allocation2 + $0x90] sm:$0xff]  ;;  %5289 = vst.msk [vmem:[#allocation2 + $0xb0] sm:$0xff] %vm340_vm0, %v5253_v52  ;;  %4751 = vst.msk [vmem:[#allocation2 + $0xc0] sm:$0xff] %vm340_vm0, %v4715_v45  ;;  %v5319_v1 = vld [vmem:[#allocation2 + $0x80] sm:$0xff]  ;;  %v4611_v3 = vpop.f32.mrf.mxu1  ;;  %v5135_v6 = vpop.f32.mrf.mxu0 }
 0x20c   : > { %5535 = vst.msk [vmem:[%s8095_s20 + $0x3c] sm:$0xf] %vm5519_vm7, %v6142_v40  ;;  %v6140_v63 = vpack.c.bf16 %v5352_v51, %v5352_v51  ;;  %v5357_v61 = vmax.f32 %v5321_v54, 0.0  ;;  %v5355_v8 = vmax.f32 %v5319_v1, 0.0  ;;  %v4716_v48 = vadd.f32 %v4680_v4, %v4611_v3  ;;  %v4690_v3 = vld [vmem:[#allocation2 + $0x118] sm:$0xff] }
 0x20d   : > { %v5218_v24 = vld [vmem:[#allocation2 + $0xb8] sm:$0xff]  ;;  %5287 = vst.msk [vmem:[#allocation2 + $0xa0] sm:$0xff] %vm340_vm0, %v5251_v0  ;;  %4754 = vst.msk [vmem:[#allocation2 + $0xd8] sm:$0xff] %vm340_vm0, %v4718_v35  ;;  %v6707_v37 = vpop.f32.mrf.mxu1  ;;  %v6747_v11 = vpop.f32.mrf.mxu0 }
 0x20e   : > { %5533 = vst.msk [vmem:[%s8095_s20 + $0x34] sm:$0xf] %vm5519_vm7, %v6140_v63  ;;  %v6145_v7 = vpack.c.bf16 %v5357_v61, %v5357_v61  ;;  %v5254_v9 = vadd.f32 %v6744_v58, %v5218_v24  ;;  %v5322_v2 = vld [vmem:[#allocation2 + $0x98] sm:$0xff]  ;;  %v5216_v10 = vld [vmem:[#allocation2 + $0xa8] sm:$0xff]  ;;  %v6143_v12 = vpack.c.bf16 %v5355_v8, %v5355_v8  ;;  %v4721_v17 = vadd.f32 %v6707_v37, %v4685_v60 }
 0x20f   : > { %v5358_v15 = vmax.f32 %v5322_v2, 0.0  ;;  %4752 = vst.msk [vmem:[#allocation2 + $0xc8] sm:$0xff] %vm340_vm0, %v4716_v48  ;;  %v5252_v16 = vadd.f32 %v5216_v10, %v5135_v6  ;;  %v4624_v22 = vpop.f32.mrf.mxu1  ;;  %v5148_v53 = vpop.f32.mrf.mxu0  ;;  %v4688_v37 = vld [vmem:[#allocation2 + $0x108] sm:$0xff] }
 0x210   : > { %5538 = vst.msk [vmem:[%s8095_s20 + $0x48] sm:$0xf] %vm5519_vm7, %v6145_v7  ;;  %v5320_v20 = vld [vmem:[#allocation2 + $0x88] sm:$0xff]  ;;  %v5221_v21 = vld [vmem:[#allocation2 + $0xd0] sm:$0xff]  ;;  %5536 = vst.msk [vmem:[%s8095_s20 + $0x40] sm:$0xf] %vm5519_vm7, %v6143_v12  ;;  %v4719_v25 = vadd.f32 %v4683_v5, %v4624_v22 }
 0x211   : > { %5290 = vst.msk [vmem:[#allocation2 + $0xb8] sm:$0xff] %vm340_vm0, %v5254_v9  ;;  %v6146_v13 = vpack.c.bf16 %v5358_v15, %v5358_v15  ;;  %v5356_v59 = vmax.f32 %v5320_v20, 0.0  ;;  %5288 = vst.msk [vmem:[#allocation2 + $0xa8] sm:$0xff] %vm340_vm0, %v5252_v16  ;;  %v5257_v43 = vadd.f32 %v6747_v11, %v5221_v21  ;;  %v6708_v30 = vpop.f32.mrf.mxu1  ;;  %v6748_v34 = vpop.f32.mrf.mxu0 }
 0x212   : > { %4757 = vst.msk [vmem:[#allocation2 + $0xf0] sm:$0xff] %vm340_vm0, %v4721_v17  ;;  %v5325_v28 = vld [vmem:[#allocation2 + $0xb0] sm:$0xff]  ;;  %v5219_v29 = vld [vmem:[#allocation2 + $0xc0] sm:$0xff]  ;;  %4755 = vst.msk [vmem:[#allocation2 + $0xe0] sm:$0xff] %vm340_vm0, %v4719_v25  ;;  %v4722_v62 = vadd.f32 %v6708_v30, %v4686_v31 }
 0x213   : > { %5539 = vst.msk [vmem:[%s8095_s20 + $0x4c] sm:$0xf] %vm5519_vm7, %v6146_v13  ;;  %v6144_v18 = vpack.c.bf16 %v5356_v59, %v5356_v59  ;;  %v5361_v32 = vmax.f32 %v5325_v28, 0.0  ;;  %v5255_v36 = vadd.f32 %v5219_v29, %v5148_v53  ;;  %v4627_v19 = vpop.f32.mrf.mxu1  ;;  %v5151_v38 = vpop.f32.mrf.mxu0 }
 0x214   : > { %5293 = vst.msk [vmem:[#allocation2 + $0xd0] sm:$0xff] %vm340_vm0, %v5257_v43  ;;  %v5323_v26 = vld [vmem:[#allocation2 + $0xa0] sm:$0xff]  ;;  %v5222_v27 = vld [vmem:[#allocation2 + $0xd8] sm:$0xff]  ;;  %4758 = vst.msk [vmem:[#allocation2 + $0xf8] sm:$0xff] %vm340_vm0, %v4722_v62  ;;  %v4720_v46 = vadd.f32 %v4684_v33, %v4627_v19 }
 0x215   : > { %5537 = vst.msk [vmem:[%s8095_s20 + $0x44] sm:$0xf] %vm5519_vm7, %v6144_v18  ;;  %v6149_v41 = vpack.c.bf16 %v5361_v32, %v5361_v32  ;;  %v5359_v42 = vmax.f32 %v5323_v26, 0.0  ;;  %v5258_v44 = vadd.f32 %v6748_v34, %v5222_v27  ;;  %v6711_v49 = vpop.f32.mrf.mxu1  ;;  %v6751_v23 = vpop.f32.mrf.mxu0 }
 0x216   : > { %5291 = vst.msk [vmem:[#allocation2 + $0xc0] sm:$0xff] %vm340_vm0, %v5255_v36  ;;  %v5220_v50 = vld [vmem:[#allocation2 + $0xc8] sm:$0xff]  ;;  %4756 = vst.msk [vmem:[#allocation2 + $0xe8] sm:$0xff] %vm340_vm0, %v4720_v46  ;;  %v4725_v52 = vadd.f32 %v6711_v49, %v4689_v14 }
 0x217   : > { %5542 = vst.msk [vmem:[%s8095_s20 + $0x58] sm:$0xf] %vm5519_vm7, %v6149_v41  ;;  %v6147_v39 = vpack.c.bf16 %v5359_v42, %v5359_v42  ;;  %v5256_v51 = vadd.f32 %v5220_v50, %v5151_v38  ;;  %v4640_v55 = vpop.f32.mrf.mxu1  ;;  %v5164_v57 = vpop.f32.mrf.mxu0 }
 0x218   : > { %v5326_v47 = vld [vmem:[#allocation2 + $0xb8] sm:$0xff]  ;;  %5294 = vst.msk [vmem:[#allocation2 + $0xd8] sm:$0xff] %vm340_vm0, %v5258_v44  ;;  %v5324_v45 = vld [vmem:[#allocation2 + $0xa8] sm:$0xff]  ;;  %4761 = vst.msk [vmem:[#allocation2 + $0x110] sm:$0xff] %vm340_vm0, %v4725_v52  ;;  %v4723_v0 = vadd.f32 %v4687_v56, %v4640_v55 }
 0x219   : > { %v5362_v40 = vmax.f32 %v5326_v47, 0.0  ;;  %v5225_v54 = vld [vmem:[#allocation2 + $0xf0] sm:$0xff]  ;;  %5540 = vst.msk [vmem:[%s8095_s20 + $0x50] sm:$0xf] %vm5519_vm7, %v6147_v39  ;;  %v5360_v63 = vmax.f32 %v5324_v45, 0.0  ;;  %v5223_v1 = vld [vmem:[#allocation2 + $0xe0] sm:$0xff]  ;;  %v6712_v24 = vpop.f32.mrf.mxu1  ;;  %v6752_v4 = vpop.f32.mrf.mxu0 }
 0x21a   : > { %5292 = vst.msk [vmem:[#allocation2 + $0xc8] sm:$0xff] %vm340_vm0, %v5256_v51  ;;  %v5261_v61 = vadd.f32 %v6751_v23, %v5225_v54  ;;  %4759 = vst.msk [vmem:[#allocation2 + $0x100] sm:$0xff] %vm340_vm0, %v4723_v0  ;;  %v5259_v8 = vadd.f32 %v5223_v1, %v5164_v57  ;;  %v4726_v9 = vadd.f32 %v6712_v24, %v4690_v3 }
 0x21b   : > { %v6150_v58 = vpack.c.bf16 %v5362_v40, %v5362_v40  ;;  %v5329_v35 = vld [vmem:[#allocation2 + $0xd0] sm:$0xff]  ;;  %v6148_v6 = vpack.c.bf16 %v5360_v63, %v5360_v63  ;;  %v5226_v2 = vld [vmem:[#allocation2 + $0xf8] sm:$0xff]  ;;  %v4643_v10 = vpop.f32.mrf.mxu1  ;;  %v5167_v60 = vpop.f32.mrf.mxu0 }
 0x21c   : > { %v5365_v7 = vmax.f32 %v5329_v35, 0.0  ;;  %5297 = vst.msk [vmem:[#allocation2 + $0xf0] sm:$0xff] %vm340_vm0, %v5261_v61  ;;  %5295 = vst.msk [vmem:[#allocation2 + $0xe0] sm:$0xff] %vm340_vm0, %v5259_v8  ;;  %v5262_v15 = vadd.f32 %v6752_v4, %v5226_v2  ;;  %v4724_v16 = vadd.f32 %v4688_v37, %v4643_v10 }
 0x21d   : > { %5543 = vst.msk [vmem:[%s8095_s20 + $0x5c] sm:$0xf] %vm5519_vm7, %v6150_v58  ;;  %v5327_v48 = vld [vmem:[#allocation2 + $0xc0] sm:$0xff]  ;;  %5541 = vst.msk [vmem:[%s8095_s20 + $0x54] sm:$0xf] %vm5519_vm7, %v6148_v6  ;;  %v5224_v20 = vld [vmem:[#allocation2 + $0xe8] sm:$0xff]  ;;  %v6755_v21 = vpop.f32.mrf.mxu0 }
 0x21e   : > { %v6153_v11 = vpack.c.bf16 %v5365_v7, %v5365_v7  ;;  %v5363_v12 = vmax.f32 %v5327_v48, 0.0  ;;  %4762 = vst.msk [vmem:[#allocation2 + $0x118] sm:$0xff] %vm340_vm0, %v4726_v9  ;;  %5298 = vst.msk [vmem:[#allocation2 + $0xf8] sm:$0xff] %vm340_vm0, %v5262_v15  ;;  %v5260_v53 = vadd.f32 %v5224_v20, %v5167_v60 }
 0x21f   : > { %v5330_v17 = vld [vmem:[#allocation2 + $0xd8] sm:$0xff]  ;;  %4760 = vst.msk [vmem:[#allocation2 + $0x108] sm:$0xff] %vm340_vm0, %v4724_v16  ;;  %v5229_v59 = vld [vmem:[#allocation2 + $0x110] sm:$0xff]  ;;  %v5180_v43 = vpop.f32.mrf.mxu0 }
 0x220   : > { %5546 = vst.msk [vmem:[%s8095_s20 + $0x68] sm:$0xf] %vm5519_vm7, %v6153_v11  ;;  %v6151_v22 = vpack.c.bf16 %v5363_v12, %v5363_v12  ;;  %v5366_v5 = vmax.f32 %v5330_v17, 0.0  ;;  %v5265_v29 = vadd.f32 %v6755_v21, %v5229_v59 }
 0x221   : > { %v5328_v13 = vld [vmem:[#allocation2 + $0xc8] sm:$0xff]  ;;  %5296 = vst.msk [vmem:[#allocation2 + $0xe8] sm:$0xff] %vm340_vm0, %v5260_v53  ;;  %v5227_v31 = vld [vmem:[#allocation2 + $0x100] sm:$0xff]  ;;  %v6756_v34 = vpop.f32.mrf.mxu0 }
 0x222   : > { %5544 = vst.msk [vmem:[%s8095_s20 + $0x60] sm:$0xf] %vm5519_vm7, %v6151_v22  ;;  %v6154_v25 = vpack.c.bf16 %v5366_v5, %v5366_v5  ;;  %v5364_v28 = vmax.f32 %v5328_v13, 0.0  ;;  %v5263_v36 = vadd.f32 %v5227_v31, %v5180_v43 }
 0x223   : > { %v5333_v30 = vld [vmem:[#allocation2 + $0xf0] sm:$0xff]  ;;  %5301 = vst.msk [vmem:[#allocation2 + $0x110] sm:$0xff] %vm340_vm0, %v5265_v29  ;;  %v5331_v62 = vld [vmem:[#allocation2 + $0xe0] sm:$0xff]  ;;  %v5183_v41 = vpop.f32.mrf.mxu0 }
 0x224   : > { %5547 = vst.msk [vmem:[%s8095_s20 + $0x6c] sm:$0xf] %vm5519_vm7, %v6154_v25  ;;  %v6152_v18 = vpack.c.bf16 %v5364_v28, %v5364_v28  ;;  %v5369_v32 = vmax.f32 %v5333_v30, 0.0  ;;  %v5367_v19 = vmax.f32 %v5331_v62, 0.0 }
 0x225   : > { %v5230_v26 = vld [vmem:[#allocation2 + $0x118] sm:$0xff]  ;;  %5299 = vst.msk [vmem:[#allocation2 + $0x100] sm:$0xff] %vm340_vm0, %v5263_v36 }
 0x226   : > { %5545 = vst.msk [vmem:[%s8095_s20 + $0x64] sm:$0xf] %vm5519_vm7, %v6152_v18  ;;  %v6157_v27 = vpack.c.bf16 %v5369_v32, %v5369_v32  ;;  %v5266_v33 = vadd.f32 %v6756_v34, %v5230_v26  ;;  %v5334_v38 = vld [vmem:[#allocation2 + $0xf8] sm:$0xff]  ;;  %v5228_v42 = vld [vmem:[#allocation2 + $0x108] sm:$0xff]  ;;  %v6155_v44 = vpack.c.bf16 %v5367_v19, %v5367_v19 }
 0x227   : > { %v5370_v46 = vmax.f32 %v5334_v38, 0.0  ;;  %v5264_v47 = vadd.f32 %v5228_v42, %v5183_v41 }
 0x228   : > { %5550 = vst.msk [vmem:[%s8095_s20 + $0x78] sm:$0xf] %vm5519_vm7, %v6157_v27  ;;  %v5332_v50 = vld [vmem:[#allocation2 + $0xe8] sm:$0xff]  ;;  %5548 = vst.msk [vmem:[%s8095_s20 + $0x70] sm:$0xf] %vm5519_vm7, %v6155_v44 }
 0x229   : > { %5302 = vst.msk [vmem:[#allocation2 + $0x118] sm:$0xff] %vm340_vm0, %v5266_v33  ;;  %v6158_v49 = vpack.c.bf16 %v5370_v46, %v5370_v46  ;;  %v5368_v14 = vmax.f32 %v5332_v50, 0.0  ;;  %5300 = vst.msk [vmem:[#allocation2 + $0x108] sm:$0xff] %vm340_vm0, %v5264_v47 }
 0x22a   : > { %v5337_v23 = vld [vmem:[#allocation2 + $0x110] sm:$0xff] }
 0x22b   : > { %5551 = vst.msk [vmem:[%s8095_s20 + $0x7c] sm:$0xf] %vm5519_vm7, %v6158_v49  ;;  %v6156_v39 = vpack.c.bf16 %v5368_v14, %v5368_v14  ;;  %v5373_v40 = vmax.f32 %v5337_v23, 0.0 }
 0x22c   : > { %v5335_v51 = vld [vmem:[#allocation2 + $0x100] sm:$0xff] }
 0x22d   : > { %5549 = vst.msk [vmem:[%s8095_s20 + $0x74] sm:$0xf] %vm5519_vm7, %v6156_v39  ;;  %v6161_v52 = vpack.c.bf16 %v5373_v40, %v5373_v40  ;;  %v5371_v45 = vmax.f32 %v5335_v51, 0.0 }
 0x22f   : > { %5554 = vst.msk [vmem:[%s8095_s20 + $0x88] sm:$0xf] %vm5519_vm7, %v6161_v52  ;;  %v6159_v55 = vpack.c.bf16 %v5371_v45, %v5371_v45 }
 0x230   : > { %v5338_v54 = vld [vmem:[#allocation2 + $0x118] sm:$0xff]  ;;  %v5336_v57 = vld [vmem:[#allocation2 + $0x108] sm:$0xff] }
 0x231   : > { %v5374_v56 = vmax.f32 %v5338_v54, 0.0  ;;  %5552 = vst.msk [vmem:[%s8095_s20 + $0x80] sm:$0xf] %vm5519_vm7, %v6159_v55  ;;  %v5372_v63 = vmax.f32 %v5336_v57, 0.0 }
 0x233   : > { %v6162_v58 = vpack.c.bf16 %v5374_v56, %v5374_v56  ;;  %v6160_v61 = vpack.c.bf16 %v5372_v63, %v5372_v63 }
 0x235   : > { %5555 = vst.msk [vmem:[%s8095_s20 + $0x8c] sm:$0xf] %vm5519_vm7, %v6162_v58  ;;  %5553 = vst.msk [vmem:[%s8095_s20 + $0x84] sm:$0xf] %vm5519_vm7, %v6160_v61 }
 0x236 PF: > { %s12_s11 = sadd.s32 1, %s7019_s11   ;;  %s8238_s9 = smov %s7015_s10 }
 0x237   : > { %p9_p5 = scmp.ge.s32.totalorder %s12_s11, 4   ;;  %s8239_s10 = smov %s8241_s12 }
 0x239   :  { %11 = sbr.rel (!%p9_p5) target bundleno = 2 (0x2), region = 69 }

</bundles_post_ra>
